<compile_context>
chip_gen: v7x
topology: tpu7x:2x2x1
jax: 0.10.0
libtpu: 0.0.40
codegen_flags: <defaults>
</compile_context>

<pallas_src>
import functools

import jax
import jax.numpy as jnp
from jax import lax
from jax.experimental import pallas as pl
from jax.experimental.pallas import tpu as pltpu

IN_FEATURES = 196608   # fixed by the module: Linear(196608, 10)
OUT_FEATURES = 10


def _linear_bias_kernel(x_ref, w_ref, b_ref, o_ref):
    """Single-TC path. Grid step k: o += x[:, chunk] @ W[:, chunk]^T; bias at end."""
    k = pl.program_id(0)

    @pl.when(k == 0)
    def _():
        o_ref[...] = jnp.zeros_like(o_ref)

    # x tile: (B, tk), W tile: (N, tk); contract over the lane (K) axis.
    o_ref[...] += lax.dot_general(
        x_ref[...],
        w_ref[...],
        dimension_numbers=(((1,), (1,)), ((), ())),
        preferred_element_type=jnp.float32,
    )

    @pl.when(k == pl.num_programs(0) - 1)
    def _():
        o_ref[...] += b_ref[...]          # (1, N) broadcast over (B, N)


def _linear_split_kernel(x_ref, w_ref, o_ref):
    """Split-K path (v7x). Grid step (c, k): partial[c] += x @ W^T over one chunk."""
    k = pl.program_id(1)

    @pl.when(k == 0)
    def _():
        o_ref[...] = jnp.zeros_like(o_ref)

    o_ref[...] += lax.dot_general(
        x_ref[...],
        w_ref[...],
        dimension_numbers=(((1,), (1,)), ((), ())),
        preferred_element_type=jnp.float32,
    )


@functools.partial(jax.jit, static_argnames=("tk", "k_splits"))
def _line_net_forward_impl(x, w, b, *, tk, k_splits):
    """x: (B, K) f32, w: (N, K) f32 (PyTorch layout), b: (1, N) f32 -> (B, N)."""
    batch, k_dim = x.shape
    n_dim, k_dim_w = w.shape
    assert k_dim == k_dim_w, "weight / input K mismatch"
    assert k_dim % (k_splits * tk) == 0, "K must divide evenly into tiles"
    kc = k_dim // (k_splits * tk)   # K-steps per split

    itemsize = jnp.dtype(x.dtype).itemsize
    cost = pl.CostEstimate(
        flops=2 * batch * k_dim * n_dim,
        bytes_accessed=(x.size + w.size + b.size + batch * n_dim) * itemsize,
        transcendentals=0,
    )

    if k_splits == 1:
        # Single-TensorCore path: accumulate straight into the resident output
        # block, bias folded in-kernel -> no partials buffer, no XLA epilogue.
        out = pl.pallas_call(
            _linear_bias_kernel,
            out_shape=jax.ShapeDtypeStruct((batch, n_dim), jnp.float32),
            grid_spec=pltpu.PrefetchScalarGridSpec(
                num_scalar_prefetch=0,
                grid=(kc,),
                in_specs=[
                    pl.BlockSpec((batch, tk), lambda k: (0, k)),
                    pl.BlockSpec((n_dim, tk), lambda k: (0, k)),
                    pl.BlockSpec((1, n_dim), lambda k: (0, 0)),
                ],
                out_specs=pl.BlockSpec((batch, n_dim), lambda k: (0, 0)),
            ),
            compiler_params=pltpu.CompilerParams(
                dimension_semantics=("arbitrary",),
            ),
            cost_estimate=cost,
        )(x, w, b)
        return out.astype(x.dtype)

    # v7x: shard the K reduction across the two TensorCores (each has its own
    # ~3.2 TB/s HBM path). Each core writes its own f32 partial sum; partials
    # and bias are combined in a tiny XLA epilogue.
    partials = pl.pallas_call(
        _linear_split_kernel,
        out_shape=jax.ShapeDtypeStruct((k_splits, batch, n_dim), jnp.float32),
        grid_spec=pltpu.PrefetchScalarGridSpec(
            num_scalar_prefetch=0,
            grid=(k_splits, kc),
            in_specs=[
                pl.BlockSpec((batch, tk), lambda c, k: (0, c * kc + k)),
                pl.BlockSpec((n_dim, tk), lambda c, k: (0, c * kc + k)),
            ],
            out_specs=pl.BlockSpec((None, batch, n_dim), lambda c, k: (c, 0, 0)),
        ),
        compiler_params=pltpu.CompilerParams(
            # CORE_PARALLEL actually changes codegen (plain "parallel" may not
            # shard across TCs); the inner K axis is a sequential reduction.
            dimension_semantics=(pltpu.CORE_PARALLEL, "arbitrary"),
        ),
        cost_estimate=cost,
    )(x, w)
    return (jnp.sum(partials, axis=0) + b).astype(x.dtype)


def _tensorcores_per_chip():
    """Best-effort detection: v7x has 2 TensorCores per chip, v5e/v6e have 1."""
    try:
        kind = (getattr(jax.devices()[0], "device_kind", "") or "").lower()
        if "v7" in kind:
            return 2
    except Exception:
        pass
    return 1


def line_net_forward(x, w, b, *, tk=None, k_splits=None):
    k_dim = x.shape[1]
    if k_splits is None:
        k_splits = 2 if _tensorcores_per_chip() == 2 else 1
    if tk is None:
        if k_splits > 1:
            tk = k_dim // k_splits          # one K-step per core (grid=(2, 1))
        else:
            tk = 49152 if k_dim % 49152 == 0 else k_dim
    return _line_net_forward_impl(x, w, b, tk=tk, k_splits=k_splits)


def init_params(key):
    """Deterministic init matching torch.nn.Linear default U[-1/sqrt(K), 1/sqrt(K)]."""
    kw, kb = jax.random.split(key)
    bound = 1.0 / (IN_FEATURES ** 0.5)
    # Native PyTorch layout: (out_features, in_features).
    w = jax.random.uniform(
        kw, (OUT_FEATURES, IN_FEATURES), jnp.float32, minval=-bound, maxval=bound
    )
    b = jax.random.uniform(
        kb, (1, OUT_FEATURES), jnp.float32, minval=-bound, maxval=bound
    )
    return w, b


if __name__ == "__main__":
    key = jax.random.PRNGKey(0)
    k_x, k_p = jax.random.split(key)

    batch = 2
    x = jax.random.normal(k_x, (batch, IN_FEATURES), jnp.float32)
    w, b = init_params(k_p)

    try:
        out = jax.block_until_ready(line_net_forward(x, w, b))
    except Exception:
        # Safety net: the single-TensorCore path compiles on every generation.
        out = jax.block_until_ready(line_net_forward(x, w, b, k_splits=1, tk=49152))

    # Sanity check against plain-JAX reference (same math as the nn.Module).
    ref = x @ w.T + b
    assert out.shape == (batch, OUT_FEATURES)
    assert jnp.allclose(out, ref, atol=1e-3, rtol=1e-3), "mismatch vs reference"

    print("KERNEL_OK")
</pallas_src>

<mosaic_0001>
module attributes {stable_mosaic.version = 11 : i64} {
  func.func @_linear_bias_kernel(%arg0: i32, %arg1: memref<2x49152xf32, #tpu.memory_space<vmem>>, %arg2: memref<10x49152xf32, #tpu.memory_space<vmem>>, %arg3: memref<1x10xf32, #tpu.memory_space<vmem>>, %arg4: memref<2x10xf32, #tpu.memory_space<vmem>>) attributes {dimension_semantics = [#tpu.dimension_semantics<arbitrary>], iteration_bounds = array<i64: 4>, scalar_prefetch = 0 : i64, scratch_operands = 0 : i64, tpu.core_type = #tpu.core_type<tc>, window_params = [{transform_indices = @transform_0, window_bounds = array<i64: 2, 49152>}, {transform_indices = @transform_1, window_bounds = array<i64: 10, 49152>}, {pipeline_mode = #tpu.pipeline_mode<synchronous>, transform_indices = @transform_2, window_bounds = array<i64: 1, 10>}, {pipeline_mode = #tpu.pipeline_mode<synchronous>, transform_indices = @transform_3, window_bounds = array<i64: 2, 10>}]} {
    %c0_i32 = arith.constant 0 : i32
    %0 = arith.cmpi eq, %arg0, %c0_i32 : i32
    %1 = arith.extui %0 : i1 to i32
    %c0_i32_0 = arith.constant 0 : i32
    %2 = arith.cmpi ne, %1, %c0_i32_0 : i32
    scf.if %2 {
      %cst_9 = arith.constant 0.000000e+00 : f32
      %12 = vector.broadcast %cst_9 : f32 to vector<2x10xf32>
      %c0_10 = arith.constant 0 : index
      %c0_11 = arith.constant 0 : index
      %13 = vector.load %arg4[%c0_10, %c0_11] : memref<2x10xf32, #tpu.memory_space<vmem>>, vector<2x10xf32>
      tpu.vector_store %arg4[%c0_10, %c0_11], %12 {strides = array<i32>} : memref<2x10xf32, #tpu.memory_space<vmem>>, vector<2x10xf32>,
    } else {
    }
    %c0 = arith.constant 0 : index
    %c0_1 = arith.constant 0 : index
    %3 = vector.load %arg4[%c0, %c0_1] : memref<2x10xf32, #tpu.memory_space<vmem>>, vector<2x10xf32>
    %c0_2 = arith.constant 0 : index
    %c0_3 = arith.constant 0 : index
    %4 = vector.load %arg1[%c0_2, %c0_3] : memref<2x49152xf32, #tpu.memory_space<vmem>>, vector<2x49152xf32>
    %c0_4 = arith.constant 0 : index
    %c0_5 = arith.constant 0 : index
    %5 = vector.load %arg2[%c0_4, %c0_5] : memref<10x49152xf32, #tpu.memory_space<vmem>>, vector<10x49152xf32>
    %cst = arith.constant dense<0.000000e+00> : vector<2x10xf32>
    %6 = tpu.matmul %4, %5, %cst {dimension_numbers = #tpu.dot_dimension_numbers<[1], [1], [0], [0], [0, 0, 1, 0], [], []>} : vector<2x49152xf32>, vector<10x49152xf32>, vector<2x10xf32> -> vector<2x10xf32>
    %7 = arith.addf %3, %6 : vector<2x10xf32>
    %c0_6 = arith.constant 0 : index
    %c0_7 = arith.constant 0 : index
    %8 = vector.load %arg4[%c0_6, %c0_7] : memref<2x10xf32, #tpu.memory_space<vmem>>, vector<2x10xf32>
    tpu.vector_store %arg4[%c0_6, %c0_7], %7 {strides = array<i32>} : memref<2x10xf32, #tpu.memory_space<vmem>>, vector<2x10xf32>,
    %c3_i32 = arith.constant 3 : i32
    %9 = arith.cmpi eq, %arg0, %c3_i32 : i32
    %10 = arith.extui %9 : i1 to i32
    %c0_i32_8 = arith.constant 0 : i32
    %11 = arith.cmpi ne, %10, %c0_i32_8 : i32
    scf.if %11 {
      %c0_9 = arith.constant 0 : index
      %c0_10 = arith.constant 0 : index
      %12 = vector.load %arg4[%c0_9, %c0_10] : memref<2x10xf32, #tpu.memory_space<vmem>>, vector<2x10xf32>
      %c0_11 = arith.constant 0 : index
      %c0_12 = arith.constant 0 : index
      %13 = vector.load %arg3[%c0_11, %c0_12] : memref<1x10xf32, #tpu.memory_space<vmem>>, vector<1x10xf32>
      %14 = vector.broadcast %13 : vector<1x10xf32> to vector<2x10xf32>
      %15 = arith.addf %12, %14 : vector<2x10xf32>
      %c0_13 = arith.constant 0 : index
      %c0_14 = arith.constant 0 : index
      %16 = vector.load %arg4[%c0_13, %c0_14] : memref<2x10xf32, #tpu.memory_space<vmem>>, vector<2x10xf32>
      tpu.vector_store %arg4[%c0_13, %c0_14], %15 {strides = array<i32>} : memref<2x10xf32, #tpu.memory_space<vmem>>, vector<2x10xf32>,
    } else {
    }
    return
  }
  func.func @transform_0(%arg0: i32) -> (i32, i32) {
    %c0_i32 = arith.constant 0 : i32
    %c0_i32_0 = arith.constant 0 : i32
    return %c0_i32, %arg0 : i32, i32
  }
  func.func @transform_1(%arg0: i32) -> (i32, i32) {
    %c0_i32 = arith.constant 0 : i32
    %c0_i32_0 = arith.constant 0 : i32
    return %c0_i32, %arg0 : i32, i32
  }
  func.func @transform_2(%arg0: i32) -> (i32, i32) {
    %c0_i32 = arith.constant 0 : i32
    %c0_i32_0 = arith.constant 0 : i32
    %c0_i32_1 = arith.constant 0 : i32
    return %c0_i32, %c0_i32_0 : i32, i32
  }
  func.func @transform_3(%arg0: i32) -> (i32, i32) {
    %c0_i32 = arith.constant 0 : i32
    %c0_i32_0 = arith.constant 0 : i32
    %c0_i32_1 = arith.constant 0 : i32
    return %c0_i32, %c0_i32_0 : i32, i32
  }
}

</mosaic_0001>

<bundles_post_ra>
// kernel: _line_net_forward_impl.1
= control target key start
LH: loop header
LB: loop body
LE: loop exit
PB: predicated region body
PF: predicated region fallthrough
CT: control target
= control target key end

     0   :  { %8 = vsyncpa [#allocation3], 0  ;;  %s19174_s0 = inlined_call_operand.hbm [shape: f32[2,196608], index: 0, kind: input, shape index: {}]   ;;  %s19175_s1 = inlined_call_operand.hbm [shape: f32[10,196608], index: 1, kind: input, shape index: {}]   ;;  %s19176_s2 = inlined_call_operand.hbm [shape: f32[1,10], index: 2, kind: input, shape index: {}]   ;;  %s19177_s3 = inlined_call_operand.hbm [shape: f32[2,10], index: 3, kind: output, shape index: {}]  }
   0x1   :  { %10 = vsyncpa [#allocation3 + $0x1], 0 }
   0x2   :  { %11 = vsyncpa [#allocation6], 0 }
   0x3   :  { %13 = vsyncpa [#allocation6 + $0x1], 0 }
   0x4   :  { %14 = vsyncpa [#allocation4], 0  ;;  %s17901_s12 = smov 0   ;;  %s17903_s13 = smov 0  }
   0x5   :  { %s17905_s14 = smov 0   ;;  %s17907_s15 = smov 0  }
   0x6 LB: > { %s17920_s16 = sadd.s32 4294967295, %s17870_s15   ;;  %s17923_s17 = sadd.s32 1, %s17870_s15   ;;  %s17870_s15 = sphi %s17907_s15, %s19195_s15   ;;  %s17866_s14 = sphi %s17905_s14, %s19194_s14   ;;  %s17862_s13 = sphi %s17903_s13, %s19193_s13   ;;  %s17858_s12 = sphi %s17901_s12, %s19192_s12  }
   0x7   : > { %s24_s18 = ssub.s32 %s17870_s15, %s17923_s17  ;;  %s27_s19 = sadd.s32 1, %s17866_s14 }
   0x8   : > { %p25_p0 = scmp.eq.s32.totalorder %s24_s18, 0  ;;  %p34_p1 = scmp.ne.s32.totalorder %s17866_s14, %s17862_s13 }
   0x9   : > { %p40_p2 = scmp.ne.s32.totalorder %s17862_s13, %s17858_s12  ;;  %p19178_p3 = scmp.eq.s32.totalorder %s17920_s16, 0 }
   0xa   : > { %s17933_s20 = scalar_select %p25_p0, %s17866_s14, %s27_s19  }
   0xb   : > { %p17937_p4 = por %p19178_p3, %p40_p2  ;;  %p16759_p5 = scmp.ge.s32.totalorder %s17870_s15, 1 }
   0xc   : > { %p119_p6 = scmp.lt.s32.totalorder %s17870_s15, 5  ;;  %s17872_s23 = smov [#allocation7]  }
   0xd   : > { %s19182_s21 = scalar_select %p17937_p4, 1, 0 }
   0xe   : > { %p17944_p8 = pnand %p16759_p5, %p119_p6  ;;  %s132_s24 = sshll.u32 %s17872_s23, 4  ;;  %s133_s24 = int_to_ptr.vmem [resolvable:$true] %s132_s24 }
   0xf   : > { %p35_p9 = scmp.eq.s32.totalorder %s17870_s15, 0  ;;  %p17571_p11 = scmp.lt.s32.totalorder %s17870_s15, 4 }
  0x10   : > { %s19183_s22 = scalar_select %p17944_p8, 1, 0 }
  0x11   : > { %p17559_p10 = pneg %p17944_p8  ;;  %p36_p12 = por %p35_p9, %p34_p1 }
  0x12   : > { %s17956_s25 = sand.u32 1, %s17866_s14   ;;  %s16773_s29 = smul.u32 12288, %s17870_s15 }
  0x13   : > { %p17960_p13 = pnand %p17559_p10, %p19178_p3  ;;  %s17543_s27 = smul.u32 768, %s17956_s25 }
  0x14   : > { %p17965_p0 = pnand %p17571_p11, %p36_p12  ;;  %s17710_s5 = scalar_lea.hbm %s19176_s2, 16 }
  0x15   : > { %p17711_p1 = scmp.ne.s32.totalorder %s19176_s2, %s17710_s5  ;;  %p17712_p2 = pneg %p17960_p13 }
  0x16   : > { %s19185_s28 = scalar_select %p17965_p0, 1, 0 }
  0x17   : > { %p17713_p5 = pnand %p17712_p2, %p17711_p1  ;;  %p17717_p9 = scmp.lt.u32.totalorder %s17710_s5, %s19176_s2 }
  0x19   : > { %p17714_p6 = pneg %p17713_p5 }
  0x1b   : > { %p17719_p10 = pnand %p17717_p9, %p17714_p6 }
  0x1d   : > { %17722 = shalt.err (!%p17719_p10)
}
  0x1e   : > { %s17723_s10 = scalar_lea.vmem %s133_s24, 16  ;;  %s17730_s11 = scalar_lea.vmem %s133_s24, 32 }
  0x1f   : > { %p17724_p11 = scmp.ne.s32.totalorder %s133_s24, %s17723_s10  ;;  %p17731_p3 = scmp.lt.s32.totalorder %s133_s24, %s133_s24 }
  0x20   : > { %p17732_p4 = scmp.lt.s32.totalorder %s17730_s11, %s17723_s10 }
  0x21   : > { %p17726_p12 = pnand %p17724_p11, %p17712_p2 }
  0x22   : > { %p17733_p8 = por %p17732_p4, %p17731_p3 }
  0x23   : > { %p17727_p7 = pneg %p17726_p12 }
  0x25   : > { %p17734_p0 = pnand %p17733_p8, %p17727_p7 }
  0x27   : > { %17737 = shalt.err (!%p17734_p0)
}
  0x28   : > { %17562 = dma.hbm_to_vmem [thread:$0]  (!%p17960_p13), %s19176_s2, 16, %s133_s24, [#allocation6]  }
  0x29   : > { %s17989_s30 = scalar_lea.hbm %s19174_s0, %s16773_s29  ;;  %s147_s4 = scalar_lea.vmem [#allocation2], %s17543_s27 }
  0x2a   : > { %s155_s5 = sshll.u32 %s147_s4, 4  ;;  %s17544_s26 = smul.u32 6144, %s17956_s25  ;;  %s17991_s5 = int_to_ptr.vmem [resolvable:$true] %s155_s5 }
  0x2b   : > { %s144_s6 = scalar_lea.sflag [#allocation3], %s17956_s25  ;;  %s17738_s7 = scalar_lea.hbm %s17989_s30, 12288 }
  0x2c   : > { %p17739_p3 = scmp.ne.s32.totalorder %s17989_s30, %s17738_s7  ;;  %p19186_p4 = scmp.ne.s32.totalorder %s19185_s28, 0 }
  0x2d   : > { %s17743_s8 = scalar_lea.hbm %s19174_s0, 49152  ;;  %p17744_p0 = scmp.lt.u32.totalorder %s17989_s30, %s19174_s0 }
  0x2e   : > { %p17740_p7 = pneg %p19186_p4  ;;  %p17745_p1 = scmp.lt.u32.totalorder %s17743_s8, %s17738_s7 }
  0x2f   : > { %p17747_p5 = scmp.lt.u32.totalorder %s17738_s7, %s17989_s30 }
  0x30   : > { %p17741_p8 = pnand %p17740_p7, %p17739_p3  ;;  %p17746_p2 = por %p17745_p1, %p17744_p0 }
  0x32   : > { %p17742_p13 = pneg %p17741_p8  ;;  %p17748_p6 = por %p17747_p5, %p17746_p2 }
  0x34   : > { %p17749_p9 = pnand %p17748_p6, %p17742_p13 }
  0x36   : > { %17752 = shalt.err (!%p17749_p9)
}
  0x37   : > { %s17753_s27 = scalar_lea.vmem %s17991_s5, 12288  ;;  %s17873_s11 = smov [#allocation2]  }
  0x38   : > { %p17754_p10 = scmp.ne.s32.totalorder %s17991_s5, %s17753_s27  ;;  %s17758_s12 = sshll.u32 %s17873_s11, 4  ;;  %s17759_s12 = int_to_ptr.vmem [resolvable:$false] %s17758_s12 }
  0x39   : > { %s17760_s18 = scalar_lea.vmem %s17759_s12, 24576  ;;  %p17761_p3 = scmp.lt.s32.totalorder %s17991_s5, %s17759_s12 }
  0x3a   : > { %p17756_p11 = pnand %p17754_p10, %p17740_p7  ;;  %p17762_p8 = scmp.lt.s32.totalorder %s17760_s18, %s17753_s27 }
  0x3c   : > { %p17757_p12 = pneg %p17756_p11  ;;  %p17763_p0 = por %p17762_p8, %p17761_p3 }
  0x3e   : > { %p17764_p1 = pnand %p17763_p0, %p17757_p12 }
  0x40   : > { %17767 = shalt.err (!%p17764_p1)
}
  0x41   : > { %17566 = dma.hbm_to_vmem [thread:$0]  (!%p19186_p4), %s17989_s30, 12288, %s17991_s5, %s144_s6  }
  0x42   : > { %s162_s19 = sand.u32 1, %s17870_s15   ;;  %s166_s23 = scalar_lea.vmem [#allocation5], %s17544_s26 }
  0x43   : > { %s173_s4 = sshll.u32 %s166_s23, 4  ;;  %s16774_s7 = smul.u32 49152, %s17870_s15  ;;  %s18023_s4 = int_to_ptr.vmem [resolvable:$true] %s173_s4 }
  0x44   : > { %s18031_s9 = scalar_lea.sflag [#allocation6], %s162_s19  ;;  %s17773_s15 = scalar_lea.hbm %s19175_s1, 393216 }
  0x45   : > { %s18029_s8 = scalar_lea.hbm %s19175_s1, %s16774_s7 }
  0x46   : > { %s17768_s10 = scalar_lea.hbm %s18029_s8, 98304  ;;  %p17774_p6 = scmp.lt.u32.totalorder %s18029_s8, %s19175_s1 }
  0x47   : > { %p17769_p13 = scmp.ne.s32.totalorder %s18029_s8, %s17768_s10  ;;  %p17775_p9 = scmp.lt.u32.totalorder %s17773_s15, %s17768_s10 }
  0x48   : > { %p17777_p11 = scmp.lt.u32.totalorder %s17768_s10, %s18029_s8 }
  0x49   : > { %p17771_p2 = pnand %p17769_p13, %p17740_p7  ;;  %p17776_p10 = por %p17775_p9, %p17774_p6 }
  0x4b   : > { %p17772_p5 = pneg %p17771_p2  ;;  %p17778_p12 = por %p17777_p11, %p17776_p10 }
  0x4d   : > { %p17779_p3 = pnand %p17778_p12, %p17772_p5 }
  0x4f   : > { %17782 = shalt.err (!%p17779_p3)
}
  0x50   : > { %s17783_s6 = scalar_lea.vmem %s18023_s4, 98304  ;;  %s17874_s27 = smov [#allocation5]  }
  0x51   : > { %p17784_p8 = scmp.ne.s32.totalorder %s18023_s4, %s17783_s6  ;;  %s17788_s11 = sshll.u32 %s17874_s27, 4  ;;  %s17789_s11 = int_to_ptr.vmem [resolvable:$false] %s17788_s11 }
  0x52   : > { %s17790_s12 = scalar_lea.vmem %s17789_s11, 196608  ;;  %p17791_p13 = scmp.lt.s32.totalorder %s18023_s4, %s17789_s11 }
  0x53   : > { %p17786_p0 = pnand %p17784_p8, %p17740_p7  ;;  %p17792_p2 = scmp.lt.s32.totalorder %s17790_s12, %s17783_s6 }
  0x55   : > { %p17787_p1 = pneg %p17786_p0  ;;  %p17793_p6 = por %p17792_p2, %p17791_p13 }
  0x57   : > { %p17794_p9 = pnand %p17793_p6, %p17787_p1 }
  0x59   : > { %17797 = shalt.err (!%p17794_p9)
}
  0x5a   : > { %s17875_s18 = smov 196608   ;;  %s17876_s19 = smov 49152  }
  0x5b   : > { %s17877_s23 = smov 3072   ;;  %p19187_p7 = scmp.ne.s32.totalorder %s19183_s22, 0 }
  0x5c   : > { %17569 = dma.hbm_to_vmem [thread:$0]  (!%p19186_p4), %s18029_s8, 98304, %s18023_s4, %s18031_s9, %s17875_s18, %s17876_s19, %s17877_s23  }
  0x5d   : > { %185 = sbr.rel (%p19187_p7) target bundleno = 1143 (0x477), region = 32  ;;  %s187_s7 = sand.u32 (!%p19187_p7), 1, %s17862_s13  }
  0x5e   : > { %s17545_s24 = smul.u32 (!%p19187_p7), 768, %s187_s7  ;;  %s188_s29 = scalar_lea.sflag (!%p19187_p7), [#allocation3], %s187_s7 }
  0x5f   : > { %p19188_p5 = scmp.ne.s32.totalorder (!%p19187_p7), %s19182_s21, 0 }
  0x60   : > { %s18060_s10 = scalar_lea.vmem (!%p19187_p7), [#allocation2], %s17545_s24 }
  0x64   : > { %17841 = dma.done.wait (%p19188_p5), %s188_s29, 12288  }
  0x65   : > { %17843 = vsyncadd (%p19188_p5), %s188_s29, 4294955008  ;;  %s196_s25 = sand.u32 1, %s17920_s16   ;;  %s17546_s28 = smul.u32 6144, %s187_s7 }
  0x66   : > { %s197_s4 = scalar_lea.sflag [#allocation6], %s196_s25 }
  0x67   : > { %s18067_s8 = scalar_lea.vmem [#allocation5], %s17546_s28 }
  0x68   : > { %17845 = dma.done.wait (%p19188_p5), %s197_s4, 98304  }
  0x69   : > { %17847 = vsyncadd (%p19188_p5), %s197_s4, 4294868992  ;;  %p19189_p4 = scmp.eq.s32.totalorder %s17920_s16, 0 }
  0x6b   : > { %17849 = dma.done.wait (%p19189_p4), [#allocation6], 16   ;;  %p19190_p10 = pmov %p19189_p4 }
  0x6c   : > { %p19191_p11 = scmp.ne.s32.totalorder %s17920_s16, 0 }
  0x6d   : > { %17851 = vsyncadd (%p19190_p10), [#allocation6], 4294967280  ;;  %vm233_vm0 = vcmask (!%p19191_p11), 74752   ;;  %v17878_v0 = vmov (!%p19191_p11), 0.0  }
  0x6e   : > { %232 = sbr.rel (%p19191_p11) target bundleno = 117 (0x75), region = 48  ;;  %234 = vst.msk [vmem:[#allocation8] sm:$0x3] (!%p19191_p11), %vm233_vm0, %v17878_v0 }
  0x75 PF: > { %v333_v1 = vld [vmem:[%s18067_s8 + $0x8] sm:$0xff]  ;;  %v332_v3 = vld [vmem:[%s18067_s8] sm:$0xff]  ;;  %v1200_v4 = vlaneseq  ;;  %v335_v7 = vld [vmem:[%s18067_s8 + $0x18] sm:$0xff]  ;;  %v17879_v9 = vmov 1983009808   ;;  %vm16653_vm1 = vcmask 74752  }
  0x76   : > { %v717_v2 = vld [vmem:[%s18067_s8 + $0xc08] sm:$0x3]  ;;  %v716_v6 = vld [vmem:[%s18067_s8 + $0xc00] sm:$0x3]  ;;  %v719_v8 = vld [vmem:[%s18067_s8 + $0xc18] sm:$0x3]  ;;  %v1198_v10 = vunpack.c.l.s4 %v17879_v9 }
  0x77   : > { %v16775_v5 = vpack.c.bf16 %v717_v2, %v333_v1  ;;  %v16777_v11 = vpack.c.bf16 %v716_v6, %v332_v3  ;;  %v16779_v12 = vpack.c.bf16 %v719_v8, %v335_v7  ;;  %v334_v13 = vld [vmem:[%s18067_s8 + $0x10] sm:$0xff]  ;;  %v236_v15 = vld [vmem:[%s18060_s10] sm:$0xff]  ;;  %v1201_v16 = vshrl.u32 %v1200_v4, 7  ;;  %v337_v20 = vld [vmem:[%s18067_s8 + $0x28] sm:$0xff]  ;;  %p16767_p12 = scmp.ne.s32.totalorder %s17920_s16, 3 }
  0x78   : > { %v718_v14 = vld [vmem:[%s18067_s8 + $0xc10] sm:$0x3]  ;;  %v1199_v18 = vunpack.c.0.s8 %v1198_v10  ;;  %v1196_v19 = vcombine.high %v236_v15, %v236_v15  ;;  %v721_v21 = vld [vmem:[%s18067_s8 + $0xc28] sm:$0x3]  ;;  %v339_v23 = vld [vmem:[%s18067_s8 + $0x38] sm:$0xff] }
  0x79   : > { %16776 = vmatprep.subr.bf16.mxu0 %v16775_v5  ;;  %v16781_v17 = vpack.c.bf16 %v718_v14, %v334_v13  ;;  %16780 = vmatprep.subr.bf16.mxu1 %v16779_v12  ;;  %v16783_v22 = vpack.c.bf16 %v721_v21, %v337_v20  ;;  %v723_v24 = vld [vmem:[%s18067_s8 + $0xc38] sm:$0x3]  ;;  %v336_v26 = vld [vmem:[%s18067_s8 + $0x20] sm:$0xff]  ;;  %v237_v28 = vld [vmem:[%s18060_s10 + $0x8] sm:$0xff] }
  0x7a   : > { %16778 = vmatpush1.bf16.xpose.msra.mxu0 %v16777_v11  ;;  %v18092_v25 = vsub.s32 %v1199_v18, %v1201_v16  ;;  %v16787_v27 = vpack.c.bf16 %v723_v24, %v339_v23  ;;  %v720_v29 = vld [vmem:[%s18067_s8 + $0xc20] sm:$0x3]  ;;  %v338_v30 = vld [vmem:[%s18067_s8 + $0x30] sm:$0xff]  ;;  %v1213_v32 = vcombine.high %v237_v28, %v237_v28  ;;  %v341_v36 = vld [vmem:[%s18067_s8 + $0x48] sm:$0xff] }
  0x7b   : > { %16782 = vmatpush1.bf16.xpose.msra.mxu1 %v16781_v17  ;;  %16784 = vmatprep.subr.bf16.mxu0 %v16783_v22  ;;  %v722_v31 = vld [vmem:[%s18067_s8 + $0xc30] sm:$0x3]  ;;  %v725_v37 = vld [vmem:[%s18067_s8 + $0xc48] sm:$0x3]  ;;  %v343_v39 = vld [vmem:[%s18067_s8 + $0x58] sm:$0xff]  ;;  %v16785_v44 = vpack.c.bf16 %v720_v29, %v336_v26 }
  0x7c   : > { %v1203_v33 = vrot.slane %v236_v15, %v18092_v25  ;;  %v1210_v34 = vrot.slane %v1196_v19, %v18092_v25  ;;  %16788 = vmatprep.subr.bf16.mxu1 %v16787_v27  ;;  %v1220_v35 = vrot.slane %v237_v28, %v18092_v25  ;;  %v1227_v38 = vrot.slane %v1213_v32, %v18092_v25  ;;  %v727_v40 = vld [vmem:[%s18067_s8 + $0xc58] sm:$0x3]  ;;  %v238_v41 = vld [vmem:[%s18060_s10 + $0x10] sm:$0xff]  ;;  %v340_v51 = vld [vmem:[%s18067_s8 + $0x40] sm:$0xff] }
  0x7d   : > { %v16789_v45 = vpack.c.bf16 %v722_v31, %v338_v30  ;;  %v16791_v47 = vpack.c.bf16 %v725_v37, %v341_v36  ;;  %v16795_v49 = vpack.c.bf16 %v727_v40, %v343_v39  ;;  %v1230_v50 = vcombine.high %v238_v41, %v238_v41  ;;  %v724_v52 = vld [vmem:[%s18067_s8 + $0xc40] sm:$0x3]  ;;  %v342_v53 = vld [vmem:[%s18067_s8 + $0x50] sm:$0xff]  ;;  %v345_v56 = vld [vmem:[%s18067_s8 + $0x68] sm:$0xff] }
  0x7e   : > { %v1211_v42 = vcombine.high %v1203_v33, %v1203_v33  ;;  %v1212_v43 = vcombine.high %v1210_v34, %v1210_v34  ;;  %v1228_v46 = vcombine.high %v1220_v35, %v1220_v35  ;;  %v1229_v48 = vcombine.high %v1227_v38, %v1227_v38  ;;  %v726_v54 = vld [vmem:[%s18067_s8 + $0xc50] sm:$0x3]  ;;  %v729_v57 = vld [vmem:[%s18067_s8 + $0xc68] sm:$0x3]  ;;  %v347_v59 = vld [vmem:[%s18067_s8 + $0x78] sm:$0xff] }
  0x7f   : > { %v1237_v55 = vrot.slane %v238_v41, %v18092_v25  ;;  %v1244_v58 = vrot.slane %v1230_v50, %v18092_v25  ;;  %v731_v60 = vld [vmem:[%s18067_s8 + $0xc78] sm:$0x3]  ;;  %v16793_v62 = vpack.c.bf16 %v724_v52, %v340_v51  ;;  %v16797_v63 = vpack.c.bf16 %v726_v54, %v342_v53  ;;  %v344_v5 = vld [vmem:[%s18067_s8 + $0x60] sm:$0xff]  ;;  %v346_v7 = vld [vmem:[%s18067_s8 + $0x70] sm:$0xff] }
  0x80   : > { %3276 = vmatprep.mubr.f32.mxu0 %v1211_v42  ;;  %3346 = vmatprep.mubr.f32.mxu1 %v1212_v43  ;;  %v239_v61 = vld [vmem:[%s18060_s10 + $0x18] sm:$0xff]  ;;  %v16799_v1 = vpack.c.bf16 %v729_v57, %v345_v56  ;;  %v16803_v3 = vpack.c.bf16 %v731_v60, %v347_v59  ;;  %v728_v6 = vld [vmem:[%s18067_s8 + $0xc60] sm:$0x3]  ;;  %v730_v8 = vld [vmem:[%s18067_s8 + $0xc70] sm:$0x3] }
  0x81   : > { %3277 = vmatmul.mubr.f32.vlgmr.msra.gmra.mrb[0].mxu0 %v1203_v33  ;;  %v1245_v0 = vcombine.high %v1237_v55, %v1237_v55  ;;  %v1246_v2 = vcombine.high %v1244_v58, %v1244_v58  ;;  %v1247_v4 = vcombine.high %v239_v61, %v239_v61  ;;  %v1254_v9 = vrot.slane %v239_v61, %v18092_v25  ;;  %v349_v10 = vld [vmem:[%s18067_s8 + $0x88] sm:$0xff]  ;;  %v351_v13 = vld [vmem:[%s18067_s8 + $0x98] sm:$0xff]  ;;  %v240_v15 = vld [vmem:[%s18060_s10 + $0x20] sm:$0xff] }
  0x82   : > { %3347 = vmatmul.mubr.f32.vlgmr.msra.gmra.mrb[0].mxu1 %v1210_v34  ;;  %16786 = vmatpush1.bf16.xpose.msra.mxu0 %v16785_v44  ;;  %v733_v11 = vld [vmem:[%s18067_s8 + $0xc88] sm:$0x3]  ;;  %v735_v14 = vld [vmem:[%s18067_s8 + $0xc98] sm:$0x3]  ;;  %v16801_v16 = vpack.c.bf16 %v728_v6, %v344_v5  ;;  %v16805_v17 = vpack.c.bf16 %v730_v8, %v346_v7  ;;  %v1264_v22 = vcombine.high %v240_v15, %v240_v15  ;;  %v348_v23 = vld [vmem:[%s18067_s8 + $0x80] sm:$0xff] }
  0x83   : > { %16790 = vmatpush1.bf16.xpose.msra.mxu1 %v16789_v45  ;;  %3416 = vmatprep.mubr.f32.mxu0 %v1228_v46  ;;  %v1261_v12 = vrot.slane %v1247_v4, %v18092_v25  ;;  %v1262_v18 = vcombine.high %v1254_v9, %v1254_v9  ;;  %v16807_v19 = vpack.c.bf16 %v733_v11, %v349_v10  ;;  %v732_v24 = vld [vmem:[%s18067_s8 + $0xc80] sm:$0x3]  ;;  %v350_v26 = vld [vmem:[%s18067_s8 + $0x90] sm:$0xff]  ;;  %v353_v29 = vld [vmem:[%s18067_s8 + $0xa8] sm:$0xff] }
  0x84   : > { %16792 = vmatprep.subr.bf16.mxu0 %v16791_v47  ;;  %3486 = vmatprep.mubr.f32.mxu1 %v1229_v48  ;;  %v16811_v21 = vpack.c.bf16 %v735_v14, %v351_v13  ;;  %v734_v27 = vld [vmem:[%s18067_s8 + $0xc90] sm:$0x3]  ;;  %v1271_v28 = vrot.slane %v240_v15, %v18092_v25  ;;  %v737_v30 = vld [vmem:[%s18067_s8 + $0xca8] sm:$0x3]  ;;  %v1278_v31 = vrot.slane %v1264_v22, %v18092_v25  ;;  %v355_v32 = vld [vmem:[%s18067_s8 + $0xb8] sm:$0xff] }
  0x85   : > { %16796 = vmatprep.subr.bf16.mxu1 %v16795_v49  ;;  %v1263_v20 = vcombine.high %v1261_v12, %v1261_v12  ;;  %v739_v33 = vld [vmem:[%s18067_s8 + $0xcb8] sm:$0x3]  ;;  %v241_v34 = vld [vmem:[%s18060_s10 + $0x28] sm:$0xff]  ;;  %v16813_v36 = vpack.c.bf16 %v734_v27, %v350_v26  ;;  %v352_v42 = vld [vmem:[%s18067_s8 + $0xa0] sm:$0xff] }
  0x86   : > { %v1279_v37 = vcombine.high %v1271_v28, %v1271_v28  ;;  %v1280_v39 = vcombine.high %v1278_v31, %v1278_v31  ;;  %v16819_v40 = vpack.c.bf16 %v739_v33, %v355_v32  ;;  %v1281_v41 = vcombine.high %v241_v34, %v241_v34  ;;  %v736_v43 = vld [vmem:[%s18067_s8 + $0xca0] sm:$0x3]  ;;  %v354_v44 = vld [vmem:[%s18067_s8 + $0xb0] sm:$0xff]  ;;  %v357_v47 = vld [vmem:[%s18067_s8 + $0xc8] sm:$0xff] }
  0x87   : > { %v738_v45 = vld [vmem:[%s18067_s8 + $0xcb0] sm:$0x3]  ;;  %v1288_v46 = vrot.slane %v241_v34, %v18092_v25  ;;  %v741_v48 = vld [vmem:[%s18067_s8 + $0xcc8] sm:$0x3]  ;;  %v359_v50 = vld [vmem:[%s18067_s8 + $0xd8] sm:$0xff]  ;;  %v16817_v53 = vpack.c.bf16 %v736_v43, %v352_v42 }
  0x88   : > { %v1295_v49 = vrot.slane %v1281_v41, %v18092_v25  ;;  %v743_v51 = vld [vmem:[%s18067_s8 + $0xcd8] sm:$0x3]  ;;  %v242_v52 = vld [vmem:[%s18060_s10 + $0x30] sm:$0xff]  ;;  %v16821_v54 = vpack.c.bf16 %v738_v45, %v354_v44  ;;  %v16823_v56 = vpack.c.bf16 %v741_v48, %v357_v47  ;;  %v356_v60 = vld [vmem:[%s18067_s8 + $0xc0] sm:$0xff] }
  0x89   : > { %3417 = vmatmul.mubr.f32.vlgmr.msra.gmra.mrb[2].mxu0 %v1220_v35  ;;  %v16809_v35 = vpack.c.bf16 %v732_v24, %v348_v23  ;;  %v1298_v59 = vcombine.high %v242_v52, %v242_v52  ;;  %v740_v61 = vld [vmem:[%s18067_s8 + $0xcc0] sm:$0x3]  ;;  %v363_v4 = vld [vmem:[%s18067_s8 + $0xf8] sm:$0xff]  ;;  %v245_v43 = vld [vmem:[%s18060_s10 + $0x48] sm:$0xff] }
  0x8a   : > { %3487 = vmatmul.mubr.f32.vlgmr.msra.gmra.mrb[2].mxu1 %v1227_v38  ;;  %16794 = vmatpush1.bf16.xpose.msra.mxu0 %v16793_v62  ;;  %v16815_v38 = vpack.c.bf16 %v737_v30, %v353_v29  ;;  %v1297_v57 = vcombine.high %v1295_v49, %v1295_v49  ;;  %v358_v62 = vld [vmem:[%s18067_s8 + $0xd0] sm:$0xff]  ;;  %v747_v5 = vld [vmem:[%s18067_s8 + $0xcf8] sm:$0x3]  ;;  %v16825_v7 = vpack.c.bf16 %v740_v61, %v356_v60  ;;  %v360_v14 = vld [vmem:[%s18067_s8 + $0xe0] sm:$0xff] }
  0x8b   : > { %16798 = vmatpush1.bf16.xpose.msra.mxu1 %v16797_v63  ;;  %3556 = vmatprep.mubr.f32.mxu0 %v1245_v0  ;;  %v742_v63 = vld [vmem:[%s18067_s8 + $0xcd0] sm:$0x3]  ;;  %v1305_v0 = vrot.slane %v242_v52, %v18092_v25  ;;  %v243_v6 = vld [vmem:[%s18060_s10 + $0x38] sm:$0xff]  ;;  %v744_v15 = vld [vmem:[%s18067_s8 + $0xce0] sm:$0x3] }
  0x8c   : > { %16800 = vmatprep.subr.bf16.mxu0 %v16799_v1  ;;  %3626 = vmatprep.mubr.f32.mxu1 %v1246_v2  ;;  %v361_v1 = vld [vmem:[%s18067_s8 + $0xe8] sm:$0xff]  ;;  %v16829_v8 = vpack.c.bf16 %v742_v63, %v358_v62  ;;  %v1315_v13 = vcombine.high %v243_v6, %v243_v6  ;;  %v367_v22 = vld [vmem:[%s18067_s8 + $0x118] sm:$0xff]  ;;  %v244_v24 = vld [vmem:[%s18060_s10 + $0x40] sm:$0xff]  ;;  %v16833_v26 = vpack.c.bf16 %v744_v15, %v360_v14 }
  0x8d   : > { %16804 = vmatprep.subr.bf16.mxu1 %v16803_v3  ;;  %v745_v2 = vld [vmem:[%s18067_s8 + $0xce8] sm:$0x3]  ;;  %v1312_v3 = vrot.slane %v1298_v59, %v18092_v25  ;;  %v751_v23 = vld [vmem:[%s18067_s8 + $0xd18] sm:$0x3]  ;;  %v1332_v32 = vcombine.high %v244_v24, %v244_v24  ;;  %v364_v33 = vld [vmem:[%s18067_s8 + $0x100] sm:$0xff] }
  0x8e   : > { %v16831_v10 = vpack.c.bf16 %v745_v2, %v361_v1  ;;  %v748_v34 = vld [vmem:[%s18067_s8 + $0xd00] sm:$0x3]  ;;  %v371_v41 = vld [vmem:[%s18067_s8 + $0x138] sm:$0xff]  ;;  %v246_v61 = vld [vmem:[%s18060_s10 + $0x50] sm:$0xff] }
  0x8f   : > { %v1314_v11 = vcombine.high %v1312_v3, %v1312_v3  ;;  %v755_v42 = vld [vmem:[%s18067_s8 + $0xd38] sm:$0x3]  ;;  %v16841_v44 = vpack.c.bf16 %v748_v34, %v364_v33  ;;  %v752_v52 = vld [vmem:[%s18067_s8 + $0xd20] sm:$0x3] }
  0x90   : > { %v375_v59 = vld [vmem:[%s18067_s8 + $0x158] sm:$0xff]  ;;  %v248_v34 = vld [vmem:[%s18060_s10 + $0x60] sm:$0xff] }
  0x91   : > { %3557 = vmatmul.mubr.f32.vlgmr.msra.gmra.mrb[4].mxu0 %v1237_v55  ;;  %v1296_v55 = vcombine.high %v1288_v46, %v1288_v46  ;;  %v759_v60 = vld [vmem:[%s18067_s8 + $0xd58] sm:$0x3] }
  0x92   : > { %3627 = vmatmul.mubr.f32.vlgmr.msra.gmra.mrb[4].mxu1 %v1244_v58  ;;  %16802 = vmatpush1.bf16.xpose.msra.mxu0 %v16801_v16  ;;  %v16827_v58 = vpack.c.bf16 %v743_v51, %v359_v50  ;;  %v362_v16 = vld [vmem:[%s18067_s8 + $0xf0] sm:$0xff]  ;;  %v1349_v50 = vcombine.high %v245_v43, %v245_v43  ;;  %v368_v51 = vld [vmem:[%s18067_s8 + $0x120] sm:$0xff]  ;;  %v763_v14 = vld [vmem:[%s18067_s8 + $0xd78] sm:$0x3] }
  0x93   : > { %16806 = vmatpush1.bf16.xpose.msra.mxu1 %v16805_v17  ;;  %3696 = vmatprep.mubr.f32.mxu0 %v1262_v18  ;;  %v746_v17 = vld [vmem:[%s18067_s8 + $0xcf0] sm:$0x3]  ;;  %v1322_v18 = vrot.slane %v243_v6, %v18092_v25  ;;  %v16849_v62 = vpack.c.bf16 %v752_v52, %v368_v51  ;;  %v756_v6 = vld [vmem:[%s18067_s8 + $0xd40] sm:$0x3]  ;;  %v247_v15 = vld [vmem:[%s18060_s10 + $0x58] sm:$0xff] }
  0x94   : > { %16808 = vmatprep.subr.bf16.mxu0 %v16807_v19  ;;  %3766 = vmatprep.mubr.f32.mxu1 %v1263_v20  ;;  %v365_v19 = vld [vmem:[%s18067_s8 + $0x108] sm:$0xff]  ;;  %v16837_v27 = vpack.c.bf16 %v746_v17, %v362_v16  ;;  %v767_v33 = vld [vmem:[%s18067_s8 + $0xd98] sm:$0x3] }
  0x95   : > { %16812 = vmatprep.subr.bf16.mxu1 %v16811_v21  ;;  %v749_v20 = vld [vmem:[%s18067_s8 + $0xd08] sm:$0x3]  ;;  %v1329_v21 = vrot.slane %v1315_v13, %v18092_v25  ;;  %v379_v13 = vld [vmem:[%s18067_s8 + $0x178] sm:$0xff] }
  0x96   : > { %v16839_v29 = vpack.c.bf16 %v749_v20, %v365_v19  ;;  %v771_v51 = vld [vmem:[%s18067_s8 + $0xdb8] sm:$0x3]  ;;  %v249_v52 = vld [vmem:[%s18060_s10 + $0x68] sm:$0xff] }
  0x97   : > { %v1331_v30 = vcombine.high %v1329_v21, %v1329_v21 }
  0x99   : > { %3697 = vmatmul.mubr.f32.vlgmr.msra.gmra.mrb[6].mxu0 %v1254_v9  ;;  %v1313_v9 = vcombine.high %v1305_v0, %v1305_v0 }
  0x9a   : > { %3767 = vmatmul.mubr.f32.vlgmr.msra.gmra.mrb[6].mxu1 %v1261_v12  ;;  %16810 = vmatpush1.bf16.xpose.msra.mxu0 %v16809_v35  ;;  %v16835_v12 = vpack.c.bf16 %v747_v5, %v363_v4  ;;  %v366_v35 = vld [vmem:[%s18067_s8 + $0x110] sm:$0xff]  ;;  %v1366_v4 = vcombine.high %v246_v61, %v246_v61  ;;  %v372_v5 = vld [vmem:[%s18067_s8 + $0x140] sm:$0xff] }
  0x9b   : > { %16814 = vmatpush1.bf16.xpose.msra.mxu1 %v16813_v36  ;;  %3836 = vmatprep.mubr.f32.mxu0 %v1279_v37  ;;  %v750_v36 = vld [vmem:[%s18067_s8 + $0xd10] sm:$0x3]  ;;  %v1339_v37 = vrot.slane %v244_v24, %v18092_v25  ;;  %v16857_v16 = vpack.c.bf16 %v756_v6, %v372_v5  ;;  %v760_v24 = vld [vmem:[%s18067_s8 + $0xd60] sm:$0x3]  ;;  %v775_v5 = vld [vmem:[%s18067_s8 + $0xdd8] sm:$0x3] }
  0x9c   : > { %16816 = vmatprep.subr.bf16.mxu0 %v16815_v38  ;;  %3906 = vmatprep.mubr.f32.mxu1 %v1280_v39  ;;  %v369_v38 = vld [vmem:[%s18067_s8 + $0x128] sm:$0xff]  ;;  %v16845_v45 = vpack.c.bf16 %v750_v36, %v366_v35  ;;  %v250_v6 = vld [vmem:[%s18060_s10 + $0x70] sm:$0xff] }
  0x9d   : > { %16820 = vmatprep.subr.bf16.mxu1 %v16819_v40  ;;  %v753_v39 = vld [vmem:[%s18067_s8 + $0xd28] sm:$0x3]  ;;  %v1346_v40 = vrot.slane %v1332_v32, %v18092_v25  ;;  %v383_v32 = vld [vmem:[%s18067_s8 + $0x198] sm:$0xff] }
  0x9e   : > { %v16847_v47 = vpack.c.bf16 %v753_v39, %v369_v38 }
  0x9f   : > { %v1348_v48 = vcombine.high %v1346_v40, %v1346_v40 }
  0xa1   : > { %3837 = vmatmul.mubr.f32.vlgmr.msra.gmra.mrb[8].mxu0 %v1271_v28  ;;  %v1330_v28 = vcombine.high %v1322_v18, %v1322_v18 }
  0xa2   : > { %3907 = vmatmul.mubr.f32.vlgmr.msra.gmra.mrb[8].mxu1 %v1278_v31  ;;  %16818 = vmatpush1.bf16.xpose.msra.mxu0 %v16817_v53  ;;  %v16843_v31 = vpack.c.bf16 %v751_v23, %v367_v22  ;;  %v370_v53 = vld [vmem:[%s18067_s8 + $0x130] sm:$0xff]  ;;  %v1383_v22 = vcombine.high %v247_v15, %v247_v15  ;;  %v376_v23 = vld [vmem:[%s18067_s8 + $0x160] sm:$0xff] }
  0xa3   : > { %16822 = vmatpush1.bf16.xpose.msra.mxu1 %v16821_v54  ;;  %3976 = vmatprep.mubr.f32.mxu0 %v1296_v55  ;;  %v754_v54 = vld [vmem:[%s18067_s8 + $0xd30] sm:$0x3]  ;;  %v1356_v55 = vrot.slane %v245_v43, %v18092_v25  ;;  %v16865_v35 = vpack.c.bf16 %v760_v24, %v376_v23  ;;  %v764_v43 = vld [vmem:[%s18067_s8 + $0xd80] sm:$0x3]  ;;  %v779_v23 = vld [vmem:[%s18067_s8 + $0xdf8] sm:$0x3] }
  0xa4   : > { %16824 = vmatprep.subr.bf16.mxu0 %v16823_v56  ;;  %4046 = vmatprep.mubr.f32.mxu1 %v1297_v57  ;;  %v373_v56 = vld [vmem:[%s18067_s8 + $0x148] sm:$0xff]  ;;  %v16853_v63 = vpack.c.bf16 %v754_v54, %v370_v53  ;;  %v251_v24 = vld [vmem:[%s18060_s10 + $0x78] sm:$0xff] }
  0xa5   : > { %16828 = vmatprep.subr.bf16.mxu1 %v16827_v58  ;;  %v757_v57 = vld [vmem:[%s18067_s8 + $0xd48] sm:$0x3]  ;;  %v1363_v58 = vrot.slane %v1349_v50, %v18092_v25  ;;  %v387_v50 = vld [vmem:[%s18067_s8 + $0x1b8] sm:$0xff] }
  0xa6   : > { %v16855_v1 = vpack.c.bf16 %v757_v57, %v373_v56 }
  0xa7   : > { %v1365_v2 = vcombine.high %v1363_v58, %v1363_v58 }
  0xa9   : > { %3977 = vmatmul.mubr.f32.vlgmr.msra.gmra.mrb[10].mxu0 %v1288_v46  ;;  %v1347_v46 = vcombine.high %v1339_v37, %v1339_v37 }
  0xaa   : > { %4047 = vmatmul.mubr.f32.vlgmr.msra.gmra.mrb[10].mxu1 %v1295_v49  ;;  %16826 = vmatpush1.bf16.xpose.msra.mxu0 %v16825_v7  ;;  %v16851_v49 = vpack.c.bf16 %v755_v42, %v371_v41  ;;  %v374_v7 = vld [vmem:[%s18067_s8 + $0x150] sm:$0xff]  ;;  %v1400_v41 = vcombine.high %v248_v34, %v248_v34  ;;  %v380_v42 = vld [vmem:[%s18067_s8 + $0x180] sm:$0xff] }
  0xab   : > { %16830 = vmatpush1.bf16.xpose.msra.mxu1 %v16829_v8  ;;  %4116 = vmatprep.mubr.f32.mxu0 %v1313_v9  ;;  %v758_v8 = vld [vmem:[%s18067_s8 + $0xd50] sm:$0x3]  ;;  %v1373_v9 = vrot.slane %v246_v61, %v18092_v25  ;;  %v16873_v53 = vpack.c.bf16 %v764_v43, %v380_v42  ;;  %v768_v61 = vld [vmem:[%s18067_s8 + $0xda0] sm:$0x3]  ;;  %v783_v42 = vld [vmem:[%s18067_s8 + $0xe18] sm:$0x3] }
  0xac   : > { %16832 = vmatprep.subr.bf16.mxu0 %v16831_v10  ;;  %4186 = vmatprep.mubr.f32.mxu1 %v1314_v11  ;;  %v377_v10 = vld [vmem:[%s18067_s8 + $0x168] sm:$0xff]  ;;  %v16861_v17 = vpack.c.bf16 %v758_v8, %v374_v7  ;;  %v252_v43 = vld [vmem:[%s18060_s10 + $0x80] sm:$0xff] }
  0xad   : > { %16836 = vmatprep.subr.bf16.mxu1 %v16835_v12  ;;  %v761_v11 = vld [vmem:[%s18067_s8 + $0xd68] sm:$0x3]  ;;  %v1380_v12 = vrot.slane %v1366_v4, %v18092_v25  ;;  %v391_v4 = vld [vmem:[%s18067_s8 + $0x1d8] sm:$0xff] }
  0xae   : > { %v16863_v19 = vpack.c.bf16 %v761_v11, %v377_v10 }
  0xaf   : > { %v1382_v20 = vcombine.high %v1380_v12, %v1380_v12 }
  0xb1   : > { %4117 = vmatmul.mubr.f32.vlgmr.msra.gmra.mrb[12].mxu0 %v1305_v0  ;;  %v1364_v0 = vcombine.high %v1356_v55, %v1356_v55 }
  0xb2   : > { %4187 = vmatmul.mubr.f32.vlgmr.msra.gmra.mrb[12].mxu1 %v1312_v3  ;;  %16834 = vmatpush1.bf16.xpose.msra.mxu0 %v16833_v26  ;;  %v16859_v3 = vpack.c.bf16 %v759_v60, %v375_v59  ;;  %v378_v26 = vld [vmem:[%s18067_s8 + $0x170] sm:$0xff]  ;;  %v1417_v59 = vcombine.high %v249_v52, %v249_v52  ;;  %v384_v60 = vld [vmem:[%s18067_s8 + $0x1a0] sm:$0xff] }
  0xb3   : > { %16838 = vmatpush1.bf16.xpose.msra.mxu1 %v16837_v27  ;;  %4256 = vmatprep.mubr.f32.mxu0 %v1330_v28  ;;  %v762_v27 = vld [vmem:[%s18067_s8 + $0xd70] sm:$0x3]  ;;  %v1390_v28 = vrot.slane %v247_v15, %v18092_v25  ;;  %v16881_v7 = vpack.c.bf16 %v768_v61, %v384_v60  ;;  %v772_v15 = vld [vmem:[%s18067_s8 + $0xdc0] sm:$0x3]  ;;  %v787_v60 = vld [vmem:[%s18067_s8 + $0xe38] sm:$0x3] }
  0xb4   : > { %16840 = vmatprep.subr.bf16.mxu0 %v16839_v29  ;;  %4326 = vmatprep.mubr.f32.mxu1 %v1331_v30  ;;  %v381_v29 = vld [vmem:[%s18067_s8 + $0x188] sm:$0xff]  ;;  %v16869_v36 = vpack.c.bf16 %v762_v27, %v378_v26 }
  0xb5   : > { %16844 = vmatprep.subr.bf16.mxu1 %v16843_v31  ;;  %v765_v30 = vld [vmem:[%s18067_s8 + $0xd88] sm:$0x3]  ;;  %v1397_v31 = vrot.slane %v1383_v22, %v18092_v25  ;;  %v395_v22 = vld [vmem:[%s18067_s8 + $0x1f8] sm:$0xff] }
  0xb6   : > { %v16871_v38 = vpack.c.bf16 %v765_v30, %v381_v29  ;;  %v253_v61 = vld [vmem:[%s18060_s10 + $0x88] sm:$0xff] }
  0xb7   : > { %v1399_v39 = vcombine.high %v1397_v31, %v1397_v31 }
  0xb9   : > { %4257 = vmatmul.mubr.f32.vlgmr.msra.gmra.mrb[14].mxu0 %v1322_v18  ;;  %v1381_v18 = vcombine.high %v1373_v9, %v1373_v9 }
  0xba   : > { %4327 = vmatmul.mubr.f32.vlgmr.msra.gmra.mrb[14].mxu1 %v1329_v21  ;;  %16842 = vmatpush1.bf16.xpose.msra.mxu0 %v16841_v44  ;;  %v16867_v21 = vpack.c.bf16 %v763_v14, %v379_v13  ;;  %v382_v44 = vld [vmem:[%s18067_s8 + $0x190] sm:$0xff]  ;;  %v1434_v13 = vcombine.high %v250_v6, %v250_v6  ;;  %v388_v14 = vld [vmem:[%s18067_s8 + $0x1c0] sm:$0xff] }
  0xbb   : > { %16846 = vmatpush1.bf16.xpose.msra.mxu1 %v16845_v45  ;;  %4396 = vmatprep.mubr.f32.mxu0 %v1347_v46  ;;  %v766_v45 = vld [vmem:[%s18067_s8 + $0xd90] sm:$0x3]  ;;  %v1407_v46 = vrot.slane %v248_v34, %v18092_v25  ;;  %v16889_v26 = vpack.c.bf16 %v772_v15, %v388_v14  ;;  %v776_v34 = vld [vmem:[%s18067_s8 + $0xde0] sm:$0x3]  ;;  %v791_v14 = vld [vmem:[%s18067_s8 + $0xe58] sm:$0x3] }
  0xbc   : > { %16848 = vmatprep.subr.bf16.mxu0 %v16847_v47  ;;  %4466 = vmatprep.mubr.f32.mxu1 %v1348_v48  ;;  %v385_v47 = vld [vmem:[%s18067_s8 + $0x1a8] sm:$0xff]  ;;  %v16877_v54 = vpack.c.bf16 %v766_v45, %v382_v44  ;;  %v254_v15 = vld [vmem:[%s18060_s10 + $0x90] sm:$0xff] }
  0xbd   : > { %16852 = vmatprep.subr.bf16.mxu1 %v16851_v49  ;;  %v769_v48 = vld [vmem:[%s18067_s8 + $0xda8] sm:$0x3]  ;;  %v1414_v49 = vrot.slane %v1400_v41, %v18092_v25  ;;  %v399_v41 = vld [vmem:[%s18067_s8 + $0x218] sm:$0xff] }
  0xbe   : > { %v16879_v56 = vpack.c.bf16 %v769_v48, %v385_v47 }
  0xbf   : > { %v1416_v57 = vcombine.high %v1414_v49, %v1414_v49 }
  0xc1   : > { %4397 = vmatmul.mubr.f32.vlgmr.msra.gmra.mrb[16].mxu0 %v1339_v37  ;;  %v1398_v37 = vcombine.high %v1390_v28, %v1390_v28 }
  0xc2   : > { %4467 = vmatmul.mubr.f32.vlgmr.msra.gmra.mrb[16].mxu1 %v1346_v40  ;;  %16850 = vmatpush1.bf16.xpose.msra.mxu0 %v16849_v62  ;;  %v16875_v40 = vpack.c.bf16 %v767_v33, %v383_v32  ;;  %v386_v62 = vld [vmem:[%s18067_s8 + $0x1b0] sm:$0xff]  ;;  %v1451_v32 = vcombine.high %v251_v24, %v251_v24  ;;  %v392_v33 = vld [vmem:[%s18067_s8 + $0x1e0] sm:$0xff] }
  0xc3   : > { %16854 = vmatpush1.bf16.xpose.msra.mxu1 %v16853_v63  ;;  %4536 = vmatprep.mubr.f32.mxu0 %v1364_v0  ;;  %v770_v63 = vld [vmem:[%s18067_s8 + $0xdb0] sm:$0x3]  ;;  %v1424_v0 = vrot.slane %v249_v52, %v18092_v25  ;;  %v16897_v44 = vpack.c.bf16 %v776_v34, %v392_v33  ;;  %v780_v52 = vld [vmem:[%s18067_s8 + $0xe00] sm:$0x3]  ;;  %v795_v33 = vld [vmem:[%s18067_s8 + $0xe78] sm:$0x3] }
  0xc4   : > { %16856 = vmatprep.subr.bf16.mxu0 %v16855_v1  ;;  %4606 = vmatprep.mubr.f32.mxu1 %v1365_v2  ;;  %v389_v1 = vld [vmem:[%s18067_s8 + $0x1c8] sm:$0xff]  ;;  %v16885_v8 = vpack.c.bf16 %v770_v63, %v386_v62  ;;  %v255_v34 = vld [vmem:[%s18060_s10 + $0x98] sm:$0xff] }
  0xc5   : > { %16860 = vmatprep.subr.bf16.mxu1 %v16859_v3  ;;  %v773_v2 = vld [vmem:[%s18067_s8 + $0xdc8] sm:$0x3]  ;;  %v1431_v3 = vrot.slane %v1417_v59, %v18092_v25  ;;  %v403_v59 = vld [vmem:[%s18067_s8 + $0x238] sm:$0xff] }
  0xc6   : > { %v16887_v10 = vpack.c.bf16 %v773_v2, %v389_v1 }
  0xc7   : > { %v1433_v11 = vcombine.high %v1431_v3, %v1431_v3 }
  0xc9   : > { %4537 = vmatmul.mubr.f32.vlgmr.msra.gmra.mrb[18].mxu0 %v1356_v55  ;;  %v1415_v55 = vcombine.high %v1407_v46, %v1407_v46 }
  0xca   : > { %4607 = vmatmul.mubr.f32.vlgmr.msra.gmra.mrb[18].mxu1 %v1363_v58  ;;  %16858 = vmatpush1.bf16.xpose.msra.mxu0 %v16857_v16  ;;  %v16883_v58 = vpack.c.bf16 %v771_v51, %v387_v50  ;;  %v390_v16 = vld [vmem:[%s18067_s8 + $0x1d0] sm:$0xff]  ;;  %v1468_v50 = vcombine.high %v252_v43, %v252_v43  ;;  %v396_v51 = vld [vmem:[%s18067_s8 + $0x200] sm:$0xff] }
  0xcb   : > { %16862 = vmatpush1.bf16.xpose.msra.mxu1 %v16861_v17  ;;  %4676 = vmatprep.mubr.f32.mxu0 %v1381_v18  ;;  %v774_v17 = vld [vmem:[%s18067_s8 + $0xdd0] sm:$0x3]  ;;  %v1441_v18 = vrot.slane %v250_v6, %v18092_v25  ;;  %v16905_v62 = vpack.c.bf16 %v780_v52, %v396_v51  ;;  %v784_v6 = vld [vmem:[%s18067_s8 + $0xe20] sm:$0x3]  ;;  %v799_v51 = vld [vmem:[%s18067_s8 + $0xe98] sm:$0x3] }
  0xcc   : > { %16864 = vmatprep.subr.bf16.mxu0 %v16863_v19  ;;  %4746 = vmatprep.mubr.f32.mxu1 %v1382_v20  ;;  %v393_v19 = vld [vmem:[%s18067_s8 + $0x1e8] sm:$0xff]  ;;  %v16893_v27 = vpack.c.bf16 %v774_v17, %v390_v16  ;;  %v256_v52 = vld [vmem:[%s18060_s10 + $0xa0] sm:$0xff] }
  0xcd   : > { %16868 = vmatprep.subr.bf16.mxu1 %v16867_v21  ;;  %v777_v20 = vld [vmem:[%s18067_s8 + $0xde8] sm:$0x3]  ;;  %v1448_v21 = vrot.slane %v1434_v13, %v18092_v25  ;;  %v407_v13 = vld [vmem:[%s18067_s8 + $0x258] sm:$0xff] }
  0xce   : > { %v16895_v29 = vpack.c.bf16 %v777_v20, %v393_v19 }
  0xcf   : > { %v1450_v30 = vcombine.high %v1448_v21, %v1448_v21 }
  0xd1   : > { %4677 = vmatmul.mubr.f32.vlgmr.msra.gmra.mrb[20].mxu0 %v1373_v9  ;;  %v1432_v9 = vcombine.high %v1424_v0, %v1424_v0 }
  0xd2   : > { %4747 = vmatmul.mubr.f32.vlgmr.msra.gmra.mrb[20].mxu1 %v1380_v12  ;;  %16866 = vmatpush1.bf16.xpose.msra.mxu0 %v16865_v35  ;;  %v16891_v12 = vpack.c.bf16 %v775_v5, %v391_v4  ;;  %v394_v35 = vld [vmem:[%s18067_s8 + $0x1f0] sm:$0xff]  ;;  %v1485_v4 = vcombine.high %v253_v61, %v253_v61  ;;  %v400_v5 = vld [vmem:[%s18067_s8 + $0x220] sm:$0xff] }
  0xd3   : > { %16870 = vmatpush1.bf16.xpose.msra.mxu1 %v16869_v36  ;;  %4816 = vmatprep.mubr.f32.mxu0 %v1398_v37  ;;  %v778_v36 = vld [vmem:[%s18067_s8 + $0xdf0] sm:$0x3]  ;;  %v1458_v37 = vrot.slane %v251_v24, %v18092_v25  ;;  %v16913_v16 = vpack.c.bf16 %v784_v6, %v400_v5  ;;  %v788_v24 = vld [vmem:[%s18067_s8 + $0xe40] sm:$0x3]  ;;  %v803_v5 = vld [vmem:[%s18067_s8 + $0xeb8] sm:$0x3] }
  0xd4   : > { %16872 = vmatprep.subr.bf16.mxu0 %v16871_v38  ;;  %4886 = vmatprep.mubr.f32.mxu1 %v1399_v39  ;;  %v397_v38 = vld [vmem:[%s18067_s8 + $0x208] sm:$0xff]  ;;  %v16901_v45 = vpack.c.bf16 %v778_v36, %v394_v35 }
  0xd5   : > { %16876 = vmatprep.subr.bf16.mxu1 %v16875_v40  ;;  %v781_v39 = vld [vmem:[%s18067_s8 + $0xe08] sm:$0x3]  ;;  %v1465_v40 = vrot.slane %v1451_v32, %v18092_v25  ;;  %v411_v32 = vld [vmem:[%s18067_s8 + $0x278] sm:$0xff] }
  0xd6   : > { %v16903_v47 = vpack.c.bf16 %v781_v39, %v397_v38  ;;  %v257_v6 = vld [vmem:[%s18060_s10 + $0xa8] sm:$0xff] }
  0xd7   : > { %v1467_v48 = vcombine.high %v1465_v40, %v1465_v40 }
  0xd9   : > { %4817 = vmatmul.mubr.f32.vlgmr.msra.gmra.mrb[22].mxu0 %v1390_v28  ;;  %v1449_v28 = vcombine.high %v1441_v18, %v1441_v18 }
  0xda   : > { %4887 = vmatmul.mubr.f32.vlgmr.msra.gmra.mrb[22].mxu1 %v1397_v31  ;;  %16874 = vmatpush1.bf16.xpose.msra.mxu0 %v16873_v53  ;;  %v16899_v31 = vpack.c.bf16 %v779_v23, %v395_v22  ;;  %v398_v53 = vld [vmem:[%s18067_s8 + $0x210] sm:$0xff]  ;;  %v1502_v22 = vcombine.high %v254_v15, %v254_v15  ;;  %v404_v23 = vld [vmem:[%s18067_s8 + $0x240] sm:$0xff] }
  0xdb   : > { %16878 = vmatpush1.bf16.xpose.msra.mxu1 %v16877_v54  ;;  %4956 = vmatprep.mubr.f32.mxu0 %v1415_v55  ;;  %v782_v54 = vld [vmem:[%s18067_s8 + $0xe10] sm:$0x3]  ;;  %v1475_v55 = vrot.slane %v252_v43, %v18092_v25  ;;  %v16921_v35 = vpack.c.bf16 %v788_v24, %v404_v23  ;;  %v792_v43 = vld [vmem:[%s18067_s8 + $0xe60] sm:$0x3]  ;;  %v807_v23 = vld [vmem:[%s18067_s8 + $0xed8] sm:$0x3] }
  0xdc   : > { %16880 = vmatprep.subr.bf16.mxu0 %v16879_v56  ;;  %5026 = vmatprep.mubr.f32.mxu1 %v1416_v57  ;;  %v401_v56 = vld [vmem:[%s18067_s8 + $0x228] sm:$0xff]  ;;  %v16909_v63 = vpack.c.bf16 %v782_v54, %v398_v53  ;;  %v258_v24 = vld [vmem:[%s18060_s10 + $0xb0] sm:$0xff] }
  0xdd   : > { %16884 = vmatprep.subr.bf16.mxu1 %v16883_v58  ;;  %v785_v57 = vld [vmem:[%s18067_s8 + $0xe28] sm:$0x3]  ;;  %v1482_v58 = vrot.slane %v1468_v50, %v18092_v25  ;;  %v415_v50 = vld [vmem:[%s18067_s8 + $0x298] sm:$0xff] }
  0xde   : > { %v16911_v1 = vpack.c.bf16 %v785_v57, %v401_v56 }
  0xdf   : > { %v1484_v2 = vcombine.high %v1482_v58, %v1482_v58 }
  0xe1   : > { %4957 = vmatmul.mubr.f32.vlgmr.msra.gmra.mrb[24].mxu0 %v1407_v46  ;;  %v1466_v46 = vcombine.high %v1458_v37, %v1458_v37 }
  0xe2   : > { %5027 = vmatmul.mubr.f32.vlgmr.msra.gmra.mrb[24].mxu1 %v1414_v49  ;;  %16882 = vmatpush1.bf16.xpose.msra.mxu0 %v16881_v7  ;;  %v16907_v49 = vpack.c.bf16 %v783_v42, %v399_v41  ;;  %v402_v7 = vld [vmem:[%s18067_s8 + $0x230] sm:$0xff]  ;;  %v1519_v41 = vcombine.high %v255_v34, %v255_v34  ;;  %v408_v42 = vld [vmem:[%s18067_s8 + $0x260] sm:$0xff] }
  0xe3   : > { %16886 = vmatpush1.bf16.xpose.msra.mxu1 %v16885_v8  ;;  %5096 = vmatprep.mubr.f32.mxu0 %v1432_v9  ;;  %v786_v8 = vld [vmem:[%s18067_s8 + $0xe30] sm:$0x3]  ;;  %v1492_v9 = vrot.slane %v253_v61, %v18092_v25  ;;  %v16929_v53 = vpack.c.bf16 %v792_v43, %v408_v42  ;;  %v796_v61 = vld [vmem:[%s18067_s8 + $0xe80] sm:$0x3]  ;;  %v811_v42 = vld [vmem:[%s18067_s8 + $0xef8] sm:$0x3] }
  0xe4   : > { %16888 = vmatprep.subr.bf16.mxu0 %v16887_v10  ;;  %5166 = vmatprep.mubr.f32.mxu1 %v1433_v11  ;;  %v405_v10 = vld [vmem:[%s18067_s8 + $0x248] sm:$0xff]  ;;  %v16917_v17 = vpack.c.bf16 %v786_v8, %v402_v7  ;;  %v259_v43 = vld [vmem:[%s18060_s10 + $0xb8] sm:$0xff] }
  0xe5   : > { %16892 = vmatprep.subr.bf16.mxu1 %v16891_v12  ;;  %v789_v11 = vld [vmem:[%s18067_s8 + $0xe48] sm:$0x3]  ;;  %v1499_v12 = vrot.slane %v1485_v4, %v18092_v25  ;;  %v419_v4 = vld [vmem:[%s18067_s8 + $0x2b8] sm:$0xff] }
  0xe6   : > { %v16919_v19 = vpack.c.bf16 %v789_v11, %v405_v10 }
  0xe7   : > { %v1501_v20 = vcombine.high %v1499_v12, %v1499_v12 }
  0xe9   : > { %5097 = vmatmul.mubr.f32.vlgmr.msra.gmra.mrb[26].mxu0 %v1424_v0  ;;  %v1483_v0 = vcombine.high %v1475_v55, %v1475_v55 }
  0xea   : > { %5167 = vmatmul.mubr.f32.vlgmr.msra.gmra.mrb[26].mxu1 %v1431_v3  ;;  %16890 = vmatpush1.bf16.xpose.msra.mxu0 %v16889_v26  ;;  %v16915_v3 = vpack.c.bf16 %v787_v60, %v403_v59  ;;  %v406_v26 = vld [vmem:[%s18067_s8 + $0x250] sm:$0xff]  ;;  %v1536_v59 = vcombine.high %v256_v52, %v256_v52  ;;  %v412_v60 = vld [vmem:[%s18067_s8 + $0x280] sm:$0xff] }
  0xeb   : > { %16894 = vmatpush1.bf16.xpose.msra.mxu1 %v16893_v27  ;;  %5236 = vmatprep.mubr.f32.mxu0 %v1449_v28  ;;  %v790_v27 = vld [vmem:[%s18067_s8 + $0xe50] sm:$0x3]  ;;  %v1509_v28 = vrot.slane %v254_v15, %v18092_v25  ;;  %v16937_v7 = vpack.c.bf16 %v796_v61, %v412_v60  ;;  %v800_v15 = vld [vmem:[%s18067_s8 + $0xea0] sm:$0x3]  ;;  %v815_v60 = vld [vmem:[%s18067_s8 + $0xf18] sm:$0x3] }
  0xec   : > { %16896 = vmatprep.subr.bf16.mxu0 %v16895_v29  ;;  %5306 = vmatprep.mubr.f32.mxu1 %v1450_v30  ;;  %v409_v29 = vld [vmem:[%s18067_s8 + $0x268] sm:$0xff]  ;;  %v16925_v36 = vpack.c.bf16 %v790_v27, %v406_v26  ;;  %v260_v61 = vld [vmem:[%s18060_s10 + $0xc0] sm:$0xff] }
  0xed   : > { %16900 = vmatprep.subr.bf16.mxu1 %v16899_v31  ;;  %v793_v30 = vld [vmem:[%s18067_s8 + $0xe68] sm:$0x3]  ;;  %v1516_v31 = vrot.slane %v1502_v22, %v18092_v25  ;;  %v423_v22 = vld [vmem:[%s18067_s8 + $0x2d8] sm:$0xff] }
  0xee   : > { %v16927_v38 = vpack.c.bf16 %v793_v30, %v409_v29 }
  0xef   : > { %v1518_v39 = vcombine.high %v1516_v31, %v1516_v31 }
  0xf1   : > { %5237 = vmatmul.mubr.f32.vlgmr.msra.gmra.mrb[28].mxu0 %v1441_v18  ;;  %v1500_v18 = vcombine.high %v1492_v9, %v1492_v9 }
  0xf2   : > { %5307 = vmatmul.mubr.f32.vlgmr.msra.gmra.mrb[28].mxu1 %v1448_v21  ;;  %16898 = vmatpush1.bf16.xpose.msra.mxu0 %v16897_v44  ;;  %v16923_v21 = vpack.c.bf16 %v791_v14, %v407_v13  ;;  %v410_v44 = vld [vmem:[%s18067_s8 + $0x270] sm:$0xff]  ;;  %v1553_v13 = vcombine.high %v257_v6, %v257_v6  ;;  %v416_v14 = vld [vmem:[%s18067_s8 + $0x2a0] sm:$0xff] }
  0xf3   : > { %16902 = vmatpush1.bf16.xpose.msra.mxu1 %v16901_v45  ;;  %5376 = vmatprep.mubr.f32.mxu0 %v1466_v46  ;;  %v794_v45 = vld [vmem:[%s18067_s8 + $0xe70] sm:$0x3]  ;;  %v1526_v46 = vrot.slane %v255_v34, %v18092_v25  ;;  %v16945_v26 = vpack.c.bf16 %v800_v15, %v416_v14  ;;  %v804_v34 = vld [vmem:[%s18067_s8 + $0xec0] sm:$0x3]  ;;  %v819_v14 = vld [vmem:[%s18067_s8 + $0xf38] sm:$0x3] }
  0xf4   : > { %16904 = vmatprep.subr.bf16.mxu0 %v16903_v47  ;;  %5446 = vmatprep.mubr.f32.mxu1 %v1467_v48  ;;  %v413_v47 = vld [vmem:[%s18067_s8 + $0x288] sm:$0xff]  ;;  %v16933_v54 = vpack.c.bf16 %v794_v45, %v410_v44 }
  0xf5   : > { %16908 = vmatprep.subr.bf16.mxu1 %v16907_v49  ;;  %v797_v48 = vld [vmem:[%s18067_s8 + $0xe88] sm:$0x3]  ;;  %v1533_v49 = vrot.slane %v1519_v41, %v18092_v25  ;;  %v427_v41 = vld [vmem:[%s18067_s8 + $0x2f8] sm:$0xff] }
  0xf6   : > { %v16935_v56 = vpack.c.bf16 %v797_v48, %v413_v47  ;;  %v261_v15 = vld [vmem:[%s18060_s10 + $0xc8] sm:$0xff] }
  0xf7   : > { %v1535_v57 = vcombine.high %v1533_v49, %v1533_v49 }
  0xf9   : > { %5377 = vmatmul.mubr.f32.vlgmr.msra.gmra.mrb[30].mxu0 %v1458_v37  ;;  %v1517_v37 = vcombine.high %v1509_v28, %v1509_v28 }
  0xfa   : > { %5447 = vmatmul.mubr.f32.vlgmr.msra.gmra.mrb[30].mxu1 %v1465_v40  ;;  %16906 = vmatpush1.bf16.xpose.msra.mxu0 %v16905_v62  ;;  %v16931_v40 = vpack.c.bf16 %v795_v33, %v411_v32  ;;  %v414_v62 = vld [vmem:[%s18067_s8 + $0x290] sm:$0xff]  ;;  %v1570_v32 = vcombine.high %v258_v24, %v258_v24  ;;  %v420_v33 = vld [vmem:[%s18067_s8 + $0x2c0] sm:$0xff] }
  0xfb   : > { %16910 = vmatpush1.bf16.xpose.msra.mxu1 %v16909_v63  ;;  %5516 = vmatprep.mubr.f32.mxu0 %v1483_v0  ;;  %v798_v63 = vld [vmem:[%s18067_s8 + $0xe90] sm:$0x3]  ;;  %v1543_v0 = vrot.slane %v256_v52, %v18092_v25  ;;  %v16953_v44 = vpack.c.bf16 %v804_v34, %v420_v33  ;;  %v808_v52 = vld [vmem:[%s18067_s8 + $0xee0] sm:$0x3]  ;;  %v823_v33 = vld [vmem:[%s18067_s8 + $0xf58] sm:$0x3] }
  0xfc   : > { %16912 = vmatprep.subr.bf16.mxu0 %v16911_v1  ;;  %5586 = vmatprep.mubr.f32.mxu1 %v1484_v2  ;;  %v417_v1 = vld [vmem:[%s18067_s8 + $0x2a8] sm:$0xff]  ;;  %v16941_v8 = vpack.c.bf16 %v798_v63, %v414_v62  ;;  %v262_v34 = vld [vmem:[%s18060_s10 + $0xd0] sm:$0xff] }
  0xfd   : > { %16916 = vmatprep.subr.bf16.mxu1 %v16915_v3  ;;  %v801_v2 = vld [vmem:[%s18067_s8 + $0xea8] sm:$0x3]  ;;  %v1550_v3 = vrot.slane %v1536_v59, %v18092_v25  ;;  %v431_v59 = vld [vmem:[%s18067_s8 + $0x318] sm:$0xff] }
  0xfe   : > { %v16943_v10 = vpack.c.bf16 %v801_v2, %v417_v1 }
  0xff   : > { %v1552_v11 = vcombine.high %v1550_v3, %v1550_v3 }
 0x101   : > { %5517 = vmatmul.mubr.f32.vlgmr.msra.gmra.mrb[32].mxu0 %v1475_v55  ;;  %v1534_v55 = vcombine.high %v1526_v46, %v1526_v46 }
 0x102   : > { %5587 = vmatmul.mubr.f32.vlgmr.msra.gmra.mrb[32].mxu1 %v1482_v58  ;;  %16914 = vmatpush1.bf16.xpose.msra.mxu0 %v16913_v16  ;;  %v16939_v58 = vpack.c.bf16 %v799_v51, %v415_v50  ;;  %v418_v16 = vld [vmem:[%s18067_s8 + $0x2b0] sm:$0xff]  ;;  %v1587_v50 = vcombine.high %v259_v43, %v259_v43  ;;  %v424_v51 = vld [vmem:[%s18067_s8 + $0x2e0] sm:$0xff] }
 0x103   : > { %16918 = vmatpush1.bf16.xpose.msra.mxu1 %v16917_v17  ;;  %5656 = vmatprep.mubr.f32.mxu0 %v1500_v18  ;;  %v802_v17 = vld [vmem:[%s18067_s8 + $0xeb0] sm:$0x3]  ;;  %v1560_v18 = vrot.slane %v257_v6, %v18092_v25  ;;  %v16961_v62 = vpack.c.bf16 %v808_v52, %v424_v51  ;;  %v812_v6 = vld [vmem:[%s18067_s8 + $0xf00] sm:$0x3]  ;;  %v827_v51 = vld [vmem:[%s18067_s8 + $0xf78] sm:$0x3] }
 0x104   : > { %16920 = vmatprep.subr.bf16.mxu0 %v16919_v19  ;;  %5726 = vmatprep.mubr.f32.mxu1 %v1501_v20  ;;  %v421_v19 = vld [vmem:[%s18067_s8 + $0x2c8] sm:$0xff]  ;;  %v16949_v27 = vpack.c.bf16 %v802_v17, %v418_v16  ;;  %v263_v52 = vld [vmem:[%s18060_s10 + $0xd8] sm:$0xff] }
 0x105   : > { %16924 = vmatprep.subr.bf16.mxu1 %v16923_v21  ;;  %v805_v20 = vld [vmem:[%s18067_s8 + $0xec8] sm:$0x3]  ;;  %v1567_v21 = vrot.slane %v1553_v13, %v18092_v25  ;;  %v435_v13 = vld [vmem:[%s18067_s8 + $0x338] sm:$0xff] }
 0x106   : > { %v16951_v29 = vpack.c.bf16 %v805_v20, %v421_v19 }
 0x107   : > { %v1569_v30 = vcombine.high %v1567_v21, %v1567_v21 }
 0x109   : > { %5657 = vmatmul.mubr.f32.vlgmr.msra.gmra.mrb[34].mxu0 %v1492_v9  ;;  %v1551_v9 = vcombine.high %v1543_v0, %v1543_v0 }
 0x10a   : > { %5727 = vmatmul.mubr.f32.vlgmr.msra.gmra.mrb[34].mxu1 %v1499_v12  ;;  %16922 = vmatpush1.bf16.xpose.msra.mxu0 %v16921_v35  ;;  %v16947_v12 = vpack.c.bf16 %v803_v5, %v419_v4  ;;  %v422_v35 = vld [vmem:[%s18067_s8 + $0x2d0] sm:$0xff]  ;;  %v1604_v4 = vcombine.high %v260_v61, %v260_v61  ;;  %v428_v5 = vld [vmem:[%s18067_s8 + $0x300] sm:$0xff] }
 0x10b   : > { %16926 = vmatpush1.bf16.xpose.msra.mxu1 %v16925_v36  ;;  %5796 = vmatprep.mubr.f32.mxu0 %v1517_v37  ;;  %v806_v36 = vld [vmem:[%s18067_s8 + $0xed0] sm:$0x3]  ;;  %v1577_v37 = vrot.slane %v258_v24, %v18092_v25  ;;  %v16969_v16 = vpack.c.bf16 %v812_v6, %v428_v5  ;;  %v816_v24 = vld [vmem:[%s18067_s8 + $0xf20] sm:$0x3]  ;;  %v831_v5 = vld [vmem:[%s18067_s8 + $0xf98] sm:$0x3] }
 0x10c   : > { %16928 = vmatprep.subr.bf16.mxu0 %v16927_v38  ;;  %5866 = vmatprep.mubr.f32.mxu1 %v1518_v39  ;;  %v425_v38 = vld [vmem:[%s18067_s8 + $0x2e8] sm:$0xff]  ;;  %v16957_v45 = vpack.c.bf16 %v806_v36, %v422_v35  ;;  %v264_v6 = vld [vmem:[%s18060_s10 + $0xe0] sm:$0xff] }
 0x10d   : > { %16932 = vmatprep.subr.bf16.mxu1 %v16931_v40  ;;  %v809_v39 = vld [vmem:[%s18067_s8 + $0xee8] sm:$0x3]  ;;  %v1584_v40 = vrot.slane %v1570_v32, %v18092_v25  ;;  %v439_v32 = vld [vmem:[%s18067_s8 + $0x358] sm:$0xff] }
 0x10e   : > { %v16959_v47 = vpack.c.bf16 %v809_v39, %v425_v38 }
 0x10f   : > { %v1586_v48 = vcombine.high %v1584_v40, %v1584_v40 }
 0x111   : > { %5797 = vmatmul.mubr.f32.vlgmr.msra.gmra.mrb[36].mxu0 %v1509_v28  ;;  %v1568_v28 = vcombine.high %v1560_v18, %v1560_v18 }
 0x112   : > { %5867 = vmatmul.mubr.f32.vlgmr.msra.gmra.mrb[36].mxu1 %v1516_v31  ;;  %16930 = vmatpush1.bf16.xpose.msra.mxu0 %v16929_v53  ;;  %v16955_v31 = vpack.c.bf16 %v807_v23, %v423_v22  ;;  %v426_v53 = vld [vmem:[%s18067_s8 + $0x2f0] sm:$0xff]  ;;  %v1621_v22 = vcombine.high %v261_v15, %v261_v15  ;;  %v432_v23 = vld [vmem:[%s18067_s8 + $0x320] sm:$0xff] }
 0x113   : > { %16934 = vmatpush1.bf16.xpose.msra.mxu1 %v16933_v54  ;;  %5936 = vmatprep.mubr.f32.mxu0 %v1534_v55  ;;  %v810_v54 = vld [vmem:[%s18067_s8 + $0xef0] sm:$0x3]  ;;  %v1594_v55 = vrot.slane %v259_v43, %v18092_v25  ;;  %v16977_v35 = vpack.c.bf16 %v816_v24, %v432_v23  ;;  %v820_v43 = vld [vmem:[%s18067_s8 + $0xf40] sm:$0x3] }
 0x114   : > { %16936 = vmatprep.subr.bf16.mxu0 %v16935_v56  ;;  %6006 = vmatprep.mubr.f32.mxu1 %v1535_v57  ;;  %v429_v56 = vld [vmem:[%s18067_s8 + $0x308] sm:$0xff]  ;;  %v16965_v63 = vpack.c.bf16 %v810_v54, %v426_v53 }
 0x115   : > { %16940 = vmatprep.subr.bf16.mxu1 %v16939_v58  ;;  %v813_v57 = vld [vmem:[%s18067_s8 + $0xf08] sm:$0x3]  ;;  %v1601_v58 = vrot.slane %v1587_v50, %v18092_v25  ;;  %v443_v50 = vld [vmem:[%s18067_s8 + $0x378] sm:$0xff] }
 0x116   : > { %v16967_v1 = vpack.c.bf16 %v813_v57, %v429_v56 }
 0x117   : > { %v1603_v2 = vcombine.high %v1601_v58, %v1601_v58 }
 0x119   : > { %5937 = vmatmul.mubr.f32.vlgmr.msra.gmra.mrb[38].mxu0 %v1526_v46  ;;  %v1585_v46 = vcombine.high %v1577_v37, %v1577_v37 }
 0x11a   : > { %6007 = vmatmul.mubr.f32.vlgmr.msra.gmra.mrb[38].mxu1 %v1533_v49  ;;  %16938 = vmatpush1.bf16.xpose.msra.mxu0 %v16937_v7  ;;  %v16963_v49 = vpack.c.bf16 %v811_v42, %v427_v41  ;;  %v430_v7 = vld [vmem:[%s18067_s8 + $0x310] sm:$0xff]  ;;  %v1638_v41 = vcombine.high %v262_v34, %v262_v34  ;;  %v436_v42 = vld [vmem:[%s18067_s8 + $0x340] sm:$0xff] }
 0x11b   : > { %16942 = vmatpush1.bf16.xpose.msra.mxu1 %v16941_v8  ;;  %6076 = vmatprep.mubr.f32.mxu0 %v1551_v9  ;;  %v814_v8 = vld [vmem:[%s18067_s8 + $0xf10] sm:$0x3]  ;;  %v1611_v9 = vrot.slane %v260_v61, %v18092_v25  ;;  %v16985_v53 = vpack.c.bf16 %v820_v43, %v436_v42  ;;  %v824_v61 = vld [vmem:[%s18067_s8 + $0xf60] sm:$0x3] }
 0x11c   : > { %16944 = vmatprep.subr.bf16.mxu0 %v16943_v10  ;;  %6146 = vmatprep.mubr.f32.mxu1 %v1552_v11  ;;  %v433_v10 = vld [vmem:[%s18067_s8 + $0x328] sm:$0xff]  ;;  %v16973_v17 = vpack.c.bf16 %v814_v8, %v430_v7 }
 0x11d   : > { %16948 = vmatprep.subr.bf16.mxu1 %v16947_v12  ;;  %v817_v11 = vld [vmem:[%s18067_s8 + $0xf28] sm:$0x3]  ;;  %v1618_v12 = vrot.slane %v1604_v4, %v18092_v25  ;;  %v447_v4 = vld [vmem:[%s18067_s8 + $0x398] sm:$0xff] }
 0x11e   : > { %v16975_v19 = vpack.c.bf16 %v817_v11, %v433_v10 }
 0x11f   : > { %v1620_v20 = vcombine.high %v1618_v12, %v1618_v12 }
 0x121   : > { %6077 = vmatmul.mubr.f32.vlgmr.msra.gmra.mrb[40].mxu0 %v1543_v0  ;;  %v1602_v0 = vcombine.high %v1594_v55, %v1594_v55 }
 0x122   : > { %6147 = vmatmul.mubr.f32.vlgmr.msra.gmra.mrb[40].mxu1 %v1550_v3  ;;  %16946 = vmatpush1.bf16.xpose.msra.mxu0 %v16945_v26  ;;  %v16971_v3 = vpack.c.bf16 %v815_v60, %v431_v59  ;;  %v434_v26 = vld [vmem:[%s18067_s8 + $0x330] sm:$0xff]  ;;  %v1655_v59 = vcombine.high %v263_v52, %v263_v52  ;;  %v440_v60 = vld [vmem:[%s18067_s8 + $0x360] sm:$0xff] }
 0x123   : > { %16950 = vmatpush1.bf16.xpose.msra.mxu1 %v16949_v27  ;;  %6216 = vmatprep.mubr.f32.mxu0 %v1568_v28  ;;  %v818_v27 = vld [vmem:[%s18067_s8 + $0xf30] sm:$0x3]  ;;  %v1628_v28 = vrot.slane %v261_v15, %v18092_v25  ;;  %v16993_v7 = vpack.c.bf16 %v824_v61, %v440_v60  ;;  %v828_v15 = vld [vmem:[%s18067_s8 + $0xf80] sm:$0x3] }
 0x124   : > { %16952 = vmatprep.subr.bf16.mxu0 %v16951_v29  ;;  %6286 = vmatprep.mubr.f32.mxu1 %v1569_v30  ;;  %v437_v29 = vld [vmem:[%s18067_s8 + $0x348] sm:$0xff]  ;;  %v16981_v36 = vpack.c.bf16 %v818_v27, %v434_v26 }
 0x125   : > { %16956 = vmatprep.subr.bf16.mxu1 %v16955_v31  ;;  %v821_v30 = vld [vmem:[%s18067_s8 + $0xf48] sm:$0x3]  ;;  %v1635_v31 = vrot.slane %v1621_v22, %v18092_v25 }
 0x126   : > { %v16983_v38 = vpack.c.bf16 %v821_v30, %v437_v29  ;;  %v833_v22 = vld [vmem:[%s18067_s8 + $0xfa8] sm:$0x3]  ;;  %v835_v29 = vld [vmem:[%s18067_s8 + $0xfb8] sm:$0x3] }
 0x127   : > { %v1637_v39 = vcombine.high %v1635_v31, %v1635_v31  ;;  %v265_v30 = vld [vmem:[%s18060_s10 + $0xe8] sm:$0xff] }
 0x128   : > { %v1696_v42 = vrot.slane %v265_v30, %v18092_v25 }
 0x129   : > { %6217 = vmatmul.mubr.f32.vlgmr.msra.gmra.mrb[42].mxu0 %v1560_v18  ;;  %v1619_v18 = vcombine.high %v1611_v9, %v1611_v9 }
 0x12a   : > { %6287 = vmatmul.mubr.f32.vlgmr.msra.gmra.mrb[42].mxu1 %v1567_v21  ;;  %16954 = vmatpush1.bf16.xpose.msra.mxu0 %v16953_v44  ;;  %v16979_v21 = vpack.c.bf16 %v819_v14, %v435_v13  ;;  %v438_v44 = vld [vmem:[%s18067_s8 + $0x350] sm:$0xff]  ;;  %v1672_v13 = vcombine.high %v264_v6, %v264_v6  ;;  %v444_v14 = vld [vmem:[%s18067_s8 + $0x380] sm:$0xff] }
 0x12b   : > { %16958 = vmatpush1.bf16.xpose.msra.mxu1 %v16957_v45  ;;  %6356 = vmatprep.mubr.f32.mxu0 %v1585_v46  ;;  %v822_v45 = vld [vmem:[%s18067_s8 + $0xf50] sm:$0x3]  ;;  %v1645_v46 = vrot.slane %v262_v34, %v18092_v25 }
 0x12c   : > { %16960 = vmatprep.subr.bf16.mxu0 %v16959_v47  ;;  %6426 = vmatprep.mubr.f32.mxu1 %v1586_v48  ;;  %v441_v47 = vld [vmem:[%s18067_s8 + $0x368] sm:$0xff]  ;;  %v16989_v54 = vpack.c.bf16 %v822_v45, %v438_v44  ;;  %v1686_v23 = vrot.slane %v1672_v13, %v18092_v25  ;;  %v267_v13 = vld [vmem:[%s18060_s10 + $0xf8] sm:$0xff] }
 0x12d   : > { %16964 = vmatprep.subr.bf16.mxu1 %v16963_v49  ;;  %v825_v48 = vld [vmem:[%s18067_s8 + $0xf68] sm:$0x3]  ;;  %v1652_v49 = vrot.slane %v1638_v41, %v18092_v25  ;;  %v834_v41 = vld [vmem:[%s18067_s8 + $0xfb0] sm:$0x3] }
 0x12e   : > { %v16991_v56 = vpack.c.bf16 %v825_v48, %v441_v47  ;;  %v453_v45 = vld [vmem:[%s18067_s8 + $0x3c8] sm:$0xff] }
 0x12f   : > { %v1654_v57 = vcombine.high %v1652_v49, %v1652_v49 }
 0x131   : > { %6357 = vmatmul.mubr.f32.vlgmr.msra.gmra.mrb[44].mxu0 %v1577_v37  ;;  %v1636_v37 = vcombine.high %v1628_v28, %v1628_v28 }
 0x132   : > { %6427 = vmatmul.mubr.f32.vlgmr.msra.gmra.mrb[44].mxu1 %v1584_v40  ;;  %16962 = vmatpush1.bf16.xpose.msra.mxu0 %v16961_v62  ;;  %v16987_v40 = vpack.c.bf16 %v823_v33, %v439_v32  ;;  %v442_v62 = vld [vmem:[%s18067_s8 + $0x370] sm:$0xff] }
 0x133   : > { %16966 = vmatpush1.bf16.xpose.msra.mxu1 %v16965_v63  ;;  %6496 = vmatprep.mubr.f32.mxu0 %v1602_v0  ;;  %v826_v63 = vld [vmem:[%s18067_s8 + $0xf70] sm:$0x3]  ;;  %v1662_v0 = vrot.slane %v263_v52, %v18092_v25  ;;  %v839_v52 = vld [vmem:[%s18067_s8 + $0xfd8] sm:$0x3] }
 0x134   : > { %16968 = vmatprep.subr.bf16.mxu0 %v16967_v1  ;;  %6566 = vmatprep.mubr.f32.mxu1 %v1603_v2  ;;  %v445_v1 = vld [vmem:[%s18067_s8 + $0x388] sm:$0xff]  ;;  %v16997_v8 = vpack.c.bf16 %v826_v63, %v442_v62  ;;  %v452_v62 = vld [vmem:[%s18067_s8 + $0x3c0] sm:$0xff] }
 0x135   : > { %16972 = vmatprep.subr.bf16.mxu1 %v16971_v3  ;;  %v829_v2 = vld [vmem:[%s18067_s8 + $0xf88] sm:$0x3]  ;;  %v1669_v3 = vrot.slane %v1655_v59, %v18092_v25  ;;  %v836_v63 = vld [vmem:[%s18067_s8 + $0xfc0] sm:$0x3] }
 0x136   : > { %v16999_v10 = vpack.c.bf16 %v829_v2, %v445_v1  ;;  %v838_v1 = vld [vmem:[%s18067_s8 + $0xfd0] sm:$0x3] }
 0x137   : > { %v1671_v11 = vcombine.high %v1669_v3, %v1669_v3 }
 0x139   : > { %6497 = vmatmul.mubr.f32.vlgmr.msra.gmra.mrb[46].mxu0 %v1594_v55  ;;  %v1653_v55 = vcombine.high %v1645_v46, %v1645_v46 }
 0x13a   : > { %6567 = vmatmul.mubr.f32.vlgmr.msra.gmra.mrb[46].mxu1 %v1601_v58  ;;  %16970 = vmatpush1.bf16.xpose.msra.mxu0 %v16969_v16  ;;  %v16995_v58 = vpack.c.bf16 %v827_v51, %v443_v50  ;;  %v446_v16 = vld [vmem:[%s18067_s8 + $0x390] sm:$0xff]  ;;  %v455_v51 = vld [vmem:[%s18067_s8 + $0x3d8] sm:$0xff] }
 0x13b   : > { %16974 = vmatpush1.bf16.xpose.msra.mxu1 %v16973_v17  ;;  %6636 = vmatprep.mubr.f32.mxu0 %v1619_v18  ;;  %v830_v17 = vld [vmem:[%s18067_s8 + $0xf90] sm:$0x3]  ;;  %v1679_v18 = vrot.slane %v264_v6, %v18092_v25  ;;  %v17019_v60 = vpack.c.bf16 %v839_v52, %v455_v51  ;;  %v841_v6 = vld [vmem:[%s18067_s8 + $0xfe8] sm:$0x3] }
 0x13c   : > { %16976 = vmatprep.subr.bf16.mxu0 %v16975_v19  ;;  %6706 = vmatprep.mubr.f32.mxu1 %v1620_v20  ;;  %v17005_v32 = vpack.c.bf16 %v830_v17, %v446_v16 }
 0x13d   : > { %16980 = vmatprep.subr.bf16.mxu1 %v16979_v21  ;;  %v449_v21 = vld [vmem:[%s18067_s8 + $0x3a8] sm:$0xff]  ;;  %v1687_v33 = vcombine.high %v1679_v18, %v1679_v18 }
 0x13e   : > { %v17007_v34 = vpack.c.bf16 %v833_v22, %v449_v21  ;;  %v1723_v21 = vcombine.high %v267_v13, %v267_v13  ;;  %v456_v22 = vld [vmem:[%s18067_s8 + $0x3e0] sm:$0xff] }
 0x141   : > { %6637 = vmatmul.mubr.f32.vlgmr.msra.gmra.mrb[48].mxu0 %v1611_v9  ;;  %v1670_v9 = vcombine.high %v1662_v0, %v1662_v0 }
 0x142   : > { %6707 = vmatmul.mubr.f32.vlgmr.msra.gmra.mrb[48].mxu1 %v1618_v12  ;;  %16978 = vmatpush1.bf16.xpose.msra.mxu0 %v16977_v35  ;;  %v17003_v12 = vpack.c.bf16 %v831_v5, %v447_v4  ;;  %v1688_v35 = vcombine.high %v1686_v23, %v1686_v23  ;;  %v457_v5 = vld [vmem:[%s18067_s8 + $0x3e8] sm:$0xff] }
 0x143   : > { %16982 = vmatpush1.bf16.xpose.msra.mxu1 %v16981_v36  ;;  %6776 = vmatprep.mubr.f32.mxu0 %v1636_v37  ;;  %v1689_v37 = vcombine.high %v265_v30, %v265_v30  ;;  %v461_v30 = vld [vmem:[%s18067_s8 + $0x408] sm:$0xff] }
 0x144   : > { %16984 = vmatprep.subr.bf16.mxu0 %v16983_v38  ;;  %6846 = vmatprep.mubr.f32.mxu1 %v1637_v39  ;;  %v448_v38 = vld [vmem:[%s18067_s8 + $0x3a0] sm:$0xff] }
 0x145   : > { %16988 = vmatprep.subr.bf16.mxu1 %v16987_v40  ;;  %v832_v39 = vld [vmem:[%s18067_s8 + $0xfa0] sm:$0x3]  ;;  %v450_v40 = vld [vmem:[%s18067_s8 + $0x3b0] sm:$0xff]  ;;  %v1703_v47 = vrot.slane %v1689_v37, %v18092_v25  ;;  %v847_v37 = vld [vmem:[%s18067_s8 + $0x1018] sm:$0x3] }
 0x147   : > { %v1705_v59 = vcombine.high %v1703_v47, %v1703_v47 }
 0x149   : > { %6777 = vmatmul.mubr.f32.vlgmr.msra.gmra.mrb[50].mxu0 %v1628_v28  ;;  %v451_v28 = vld [vmem:[%s18067_s8 + $0x3b8] sm:$0xff] }
 0x14a   : > { %6847 = vmatmul.mubr.f32.vlgmr.msra.gmra.mrb[50].mxu1 %v1635_v31  ;;  %16986 = vmatpush1.bf16.xpose.msra.mxu0 %v16985_v53  ;;  %v17001_v31 = vpack.c.bf16 %v828_v15, %v444_v14  ;;  %v17011_v36 = vpack.c.bf16 %v835_v29, %v451_v28  ;;  %v266_v53 = vld [vmem:[%s18060_s10 + $0xf0] sm:$0xff]  ;;  %v17017_v14 = vpack.c.bf16 %v836_v63, %v452_v62  ;;  %v269_v62 = vld [vmem:[%s18060_s10 + $0x108] sm:$0xff] }
 0x14b   : > { %16990 = vmatpush1.bf16.xpose.msra.mxu1 %v16989_v54  ;;  %6916 = vmatprep.mubr.f32.mxu0 %v1653_v55  ;;  %v17009_v54 = vpack.c.bf16 %v832_v39, %v448_v38  ;;  %v17013_v55 = vpack.c.bf16 %v834_v41, %v450_v40  ;;  %v1706_v61 = vcombine.high %v266_v53, %v266_v53  ;;  %v268_v38 = vld [vmem:[%s18060_s10 + $0x100] sm:$0xff] }
 0x14c   : > { %16992 = vmatprep.subr.bf16.mxu0 %v16991_v56  ;;  %6986 = vmatprep.mubr.f32.mxu1 %v1654_v57  ;;  %v1704_v57 = vcombine.high %v1696_v42, %v1696_v42  ;;  %v1713_v2 = vrot.slane %v266_v53, %v18092_v25  ;;  %v1747_v51 = vrot.slane %v268_v38, %v18092_v25 }
 0x14d   : > { %16996 = vmatprep.subr.bf16.mxu1 %v16995_v58 }
 0x14e   : > { %v1721_v17 = vcombine.high %v1713_v2, %v1713_v2 }
 0x151   : > { %6917 = vmatmul.mubr.f32.vlgmr.msra.gmra.mrb[52].mxu0 %v1645_v46  ;;  %v837_v46 = vld [vmem:[%s18067_s8 + $0xfc8] sm:$0x3] }
 0x152   : > { %6987 = vmatmul.mubr.f32.vlgmr.msra.gmra.mrb[52].mxu1 %v1652_v49  ;;  %16994 = vmatpush1.bf16.xpose.msra.mxu0 %v16993_v7  ;;  %v17015_v58 = vpack.c.bf16 %v837_v46, %v453_v45  ;;  %v1720_v7 = vrot.slane %v1706_v61, %v18092_v25  ;;  %v1740_v46 = vcombine.high %v268_v38, %v268_v38  ;;  %v851_v61 = vld [vmem:[%s18067_s8 + $0x1038] sm:$0x3] }
 0x153   : > { %16998 = vmatpush1.bf16.xpose.msra.mxu1 %v16997_v8  ;;  %7056 = vmatprep.mubr.f32.mxu0 %v1670_v9 }
 0x154   : > { %17000 = vmatprep.subr.bf16.mxu0 %v16999_v10  ;;  %v3278_v19 = vpop.f32.mrb[0].mxu0  ;;  %7126 = vmatprep.mubr.f32.mxu1 %v1671_v11  ;;  %v459_v11 = vld [vmem:[%s18067_s8 + $0x3f8] sm:$0xff] }
 0x155   : > { %v3348_v20 = vpop.f32.mrb[0].mxu1  ;;  %17004 = vmatprep.subr.bf16.mxu1 %v17003_v12  ;;  %v3280_v26 = vpop.f32.mrb[1].mxu0  ;;  %v843_v12 = vld [vmem:[%s18067_s8 + $0xff8] sm:$0x3] }
 0x156   : > { %v3349_v24 = vadd.f32 %v3348_v20, %v3278_v19  ;;  %v3350_v27 = vpop.f32.mrb[1].mxu1  ;;  %v1722_v19 = vcombine.high %v1720_v7, %v1720_v7  ;;  %v17027_v20 = vpack.c.bf16 %v843_v12, %v459_v11  ;;  %v842_v26 = vld [vmem:[%s18067_s8 + $0xff0] sm:$0x3]  ;;  %v1764_v11 = vrot.slane %v269_v62, %v18092_v25 }
 0x157   : > { %v1730_v27 = vrot.slane %v267_v13, %v18092_v25 }
 0x159   : > { %7057 = vmatmul.mubr.f32.vlgmr.msra.gmra.mrb[54].mxu0 %v1662_v0  ;;  %v454_v0 = vld [vmem:[%s18067_s8 + $0x3d0] sm:$0xff] }
 0x15a   : > { %7127 = vmatmul.mubr.f32.vlgmr.msra.gmra.mrb[54].mxu1 %v1669_v3  ;;  %17002 = vmatpush1.bf16.xpose.msra.mxu0 %v17001_v31  ;;  %v17021_v15 = vpack.c.bf16 %v838_v1, %v454_v0  ;;  %v845_v31 = vld [vmem:[%s18067_s8 + $0x1008] sm:$0x3] }
 0x15b   : > { %17006 = vmatpush1.bf16.xpose.msra.mxu1 %v17005_v32  ;;  %7196 = vmatprep.mubr.f32.mxu0 %v1687_v33  ;;  %v1737_v32 = vrot.slane %v1723_v21, %v18092_v25  ;;  %v855_v21 = vld [vmem:[%s18067_s8 + $0x1058] sm:$0x3] }
 0x15c   : > { %17008 = vmatprep.subr.bf16.mxu0 %v17007_v34  ;;  %v3418_v43 = vpop.f32.mrb[2].mxu0  ;;  %7266 = vmatprep.mubr.f32.mxu1 %v1688_v35 }
 0x15d   : > { %v3488_v44 = vpop.f32.mrb[2].mxu1  ;;  %17012 = vmatprep.subr.bf16.mxu1 %v17011_v36  ;;  %v3419_v48 = vadd.f32 %v3418_v43, %v3349_v24  ;;  %v3420_v49 = vpop.f32.mrb[3].mxu0  ;;  %v458_v24 = vld [vmem:[%s18067_s8 + $0x3f0] sm:$0xff]  ;;  %v463_v36 = vld [vmem:[%s18067_s8 + $0x418] sm:$0xff]  ;;  %v17031_v43 = vpack.c.bf16 %v845_v31, %v461_v30 }
 0x15e   : > { %v3490_v50 = vpop.f32.mrb[3].mxu1  ;;  %v17029_v40 = vpack.c.bf16 %v842_v26, %v458_v24  ;;  %v17035_v45 = vpack.c.bf16 %v847_v37, %v463_v36  ;;  %v462_v49 = vld [vmem:[%s18067_s8 + $0x410] sm:$0xff] }
 0x15f   : > { %v3489_v56 = vadd.f32 %v3488_v44, %v3419_v48  ;;  %v1739_v44 = vcombine.high %v1737_v32, %v1737_v32  ;;  %v844_v48 = vld [vmem:[%s18067_s8 + $0x1000] sm:$0x3]  ;;  %v846_v50 = vld [vmem:[%s18067_s8 + $0x1010] sm:$0x3] }
 0x160   : > { %v17037_v0 = vpack.c.bf16 %v846_v50, %v462_v49 }
 0x161   : > { %7197 = vmatmul.mubr.f32.vlgmr.msra.gmra.mrb[56].mxu0 %v1679_v18  ;;  %v17023_v18 = vpack.c.bf16 %v841_v6, %v457_v5  ;;  %v1757_v6 = vcombine.high %v269_v62, %v269_v62 }
 0x162   : > { %7267 = vmatmul.mubr.f32.vlgmr.msra.gmra.mrb[56].mxu1 %v1686_v23  ;;  %17010 = vmatpush1.bf16.xpose.msra.mxu0 %v17009_v54  ;;  %v840_v23 = vld [vmem:[%s18067_s8 + $0xfe0] sm:$0x3]  ;;  %v465_v54 = vld [vmem:[%s18067_s8 + $0x428] sm:$0xff] }
 0x163   : > { %17014 = vmatpush1.bf16.xpose.msra.mxu1 %v17013_v55  ;;  %7336 = vmatprep.mubr.f32.mxu0 %v1704_v57  ;;  %v17025_v39 = vpack.c.bf16 %v840_v23, %v456_v22  ;;  %v849_v55 = vld [vmem:[%s18067_s8 + $0x1028] sm:$0x3]  ;;  %v270_v22 = vld [vmem:[%s18060_s10 + $0x110] sm:$0xff] }
 0x164   : > { %17016 = vmatprep.subr.bf16.mxu0 %v17015_v58  ;;  %v3558_v3 = vpop.f32.mrb[4].mxu0  ;;  %7406 = vmatprep.mubr.f32.mxu1 %v1705_v59  ;;  %v1774_v31 = vcombine.high %v270_v22, %v270_v22  ;;  %v1781_v36 = vrot.slane %v270_v22, %v18092_v25 }
 0x165   : > { %v3628_v4 = vpop.f32.mrb[4].mxu1  ;;  %17020 = vmatprep.subr.bf16.mxu1 %v17019_v60  ;;  %v3559_v8 = vadd.f32 %v3558_v3, %v3489_v56  ;;  %v3560_v9 = vpop.f32.mrb[5].mxu0  ;;  %v1754_v56 = vrot.slane %v1740_v46, %v18092_v25  ;;  %v467_v60 = vld [vmem:[%s18067_s8 + $0x438] sm:$0xff]  ;;  %v17039_v3 = vpack.c.bf16 %v849_v55, %v465_v54 }
 0x166   : > { %v3630_v10 = vpop.f32.mrb[5].mxu1  ;;  %v17043_v5 = vpack.c.bf16 %v851_v61, %v467_v60  ;;  %v466_v9 = vld [vmem:[%s18067_s8 + $0x430] sm:$0xff]  ;;  %v859_v46 = vld [vmem:[%s18067_s8 + $0x1078] sm:$0x3] }
 0x167   : > { %v3629_v16 = vadd.f32 %v3628_v4, %v3559_v8  ;;  %v1756_v4 = vcombine.high %v1754_v56, %v1754_v56  ;;  %v848_v8 = vld [vmem:[%s18067_s8 + $0x1020] sm:$0x3]  ;;  %v850_v10 = vld [vmem:[%s18067_s8 + $0x1030] sm:$0x3] }
 0x168   : > { %v17045_v24 = vpack.c.bf16 %v850_v10, %v466_v9 }
 0x169   : > { %7337 = vmatmul.mubr.f32.vlgmr.msra.gmra.mrb[58].mxu0 %v1696_v42  ;;  %v1738_v42 = vcombine.high %v1730_v27, %v1730_v27 }
 0x16a   : > { %7407 = vmatmul.mubr.f32.vlgmr.msra.gmra.mrb[58].mxu1 %v1703_v47  ;;  %17018 = vmatpush1.bf16.xpose.msra.mxu0 %v17017_v14  ;;  %v460_v47 = vld [vmem:[%s18067_s8 + $0x400] sm:$0xff]  ;;  %v469_v14 = vld [vmem:[%s18067_s8 + $0x448] sm:$0xff] }
 0x16b   : > { %17022 = vmatpush1.bf16.xpose.msra.mxu1 %v17021_v15  ;;  %7476 = vmatprep.mubr.f32.mxu0 %v1721_v17  ;;  %v17033_v63 = vpack.c.bf16 %v844_v48, %v460_v47  ;;  %v853_v15 = vld [vmem:[%s18067_s8 + $0x1048] sm:$0x3]  ;;  %v271_v47 = vld [vmem:[%s18060_s10 + $0x118] sm:$0xff] }
 0x16c   : > { %17024 = vmatprep.subr.bf16.mxu0 %v17023_v18  ;;  %v3698_v28 = vpop.f32.mrb[6].mxu0  ;;  %7546 = vmatprep.mubr.f32.mxu1 %v1722_v19  ;;  %v1791_v55 = vcombine.high %v271_v47, %v271_v47  ;;  %v1798_v60 = vrot.slane %v271_v47, %v18092_v25 }
 0x16d   : > { %v3768_v29 = vpop.f32.mrb[6].mxu1  ;;  %17028 = vmatprep.subr.bf16.mxu1 %v17027_v20  ;;  %v3699_v33 = vadd.f32 %v3698_v28, %v3629_v16  ;;  %v3700_v34 = vpop.f32.mrb[7].mxu0  ;;  %v1771_v16 = vrot.slane %v1757_v6, %v18092_v25  ;;  %v471_v20 = vld [vmem:[%s18067_s8 + $0x458] sm:$0xff]  ;;  %v17047_v28 = vpack.c.bf16 %v853_v15, %v469_v14 }
 0x16e   : > { %v3770_v35 = vpop.f32.mrb[7].mxu1  ;;  %v17051_v30 = vpack.c.bf16 %v855_v21, %v471_v20  ;;  %v470_v34 = vld [vmem:[%s18067_s8 + $0x450] sm:$0xff]  ;;  %v863_v6 = vld [vmem:[%s18067_s8 + $0x1098] sm:$0x3] }
 0x16f   : > { %v3769_v41 = vadd.f32 %v3768_v29, %v3699_v33  ;;  %v1773_v29 = vcombine.high %v1771_v16, %v1771_v16  ;;  %v852_v33 = vld [vmem:[%s18067_s8 + $0x1040] sm:$0x3]  ;;  %v854_v35 = vld [vmem:[%s18067_s8 + $0x1050] sm:$0x3] }
 0x170   : > { %v17053_v49 = vpack.c.bf16 %v854_v35, %v470_v34 }
 0x171   : > { %7477 = vmatmul.mubr.f32.vlgmr.msra.gmra.mrb[60].mxu0 %v1713_v2  ;;  %v1755_v2 = vcombine.high %v1747_v51, %v1747_v51 }
 0x172   : > { %7547 = vmatmul.mubr.f32.vlgmr.msra.gmra.mrb[60].mxu1 %v1720_v7  ;;  %17026 = vmatpush1.bf16.xpose.msra.mxu0 %v17025_v39  ;;  %v464_v7 = vld [vmem:[%s18067_s8 + $0x420] sm:$0xff]  ;;  %v473_v39 = vld [vmem:[%s18067_s8 + $0x468] sm:$0xff] }
 0x173   : > { %17030 = vmatpush1.bf16.xpose.msra.mxu1 %v17029_v40  ;;  %7616 = vmatprep.mubr.f32.mxu0 %v1738_v42  ;;  %v17041_v23 = vpack.c.bf16 %v848_v8, %v464_v7  ;;  %v857_v40 = vld [vmem:[%s18067_s8 + $0x1068] sm:$0x3]  ;;  %v272_v7 = vld [vmem:[%s18060_s10 + $0x120] sm:$0xff] }
 0x174   : > { %17032 = vmatprep.subr.bf16.mxu0 %v17031_v43  ;;  %v3838_v52 = vpop.f32.mrb[8].mxu0  ;;  %7686 = vmatprep.mubr.f32.mxu1 %v1739_v44  ;;  %v1808_v15 = vcombine.high %v272_v7, %v272_v7  ;;  %v1815_v20 = vrot.slane %v272_v7, %v18092_v25 }
 0x175   : > { %v3908_v53 = vpop.f32.mrb[8].mxu1  ;;  %17036 = vmatprep.subr.bf16.mxu1 %v17035_v45  ;;  %v3839_v57 = vadd.f32 %v3838_v52, %v3769_v41  ;;  %v3840_v58 = vpop.f32.mrb[9].mxu0  ;;  %v1788_v41 = vrot.slane %v1774_v31, %v18092_v25  ;;  %v475_v45 = vld [vmem:[%s18067_s8 + $0x478] sm:$0xff]  ;;  %v17055_v52 = vpack.c.bf16 %v857_v40, %v473_v39 }
 0x176   : > { %v3910_v59 = vpop.f32.mrb[9].mxu1  ;;  %v17059_v54 = vpack.c.bf16 %v859_v46, %v475_v45  ;;  %v474_v58 = vld [vmem:[%s18067_s8 + $0x470] sm:$0xff]  ;;  %v867_v31 = vld [vmem:[%s18067_s8 + $0x10b8] sm:$0x3] }
 0x177   : > { %v3909_v1 = vadd.f32 %v3908_v53, %v3839_v57  ;;  %v1790_v53 = vcombine.high %v1788_v41, %v1788_v41  ;;  %v856_v57 = vld [vmem:[%s18067_s8 + $0x1060] sm:$0x3]  ;;  %v858_v59 = vld [vmem:[%s18067_s8 + $0x1070] sm:$0x3] }
 0x178   : > { %v17061_v9 = vpack.c.bf16 %v858_v59, %v474_v58 }
 0x179   : > { %7617 = vmatmul.mubr.f32.vlgmr.msra.gmra.mrb[62].mxu0 %v1730_v27  ;;  %v1772_v27 = vcombine.high %v1764_v11, %v1764_v11 }
 0x17a   : > { %7687 = vmatmul.mubr.f32.vlgmr.msra.gmra.mrb[62].mxu1 %v1737_v32  ;;  %17034 = vmatpush1.bf16.xpose.msra.mxu0 %v17033_v63  ;;  %v468_v32 = vld [vmem:[%s18067_s8 + $0x440] sm:$0xff]  ;;  %v477_v63 = vld [vmem:[%s18067_s8 + $0x488] sm:$0xff] }
 0x17b   : > { %17038 = vmatpush1.bf16.xpose.msra.mxu1 %v17037_v0  ;;  %7756 = vmatprep.mubr.f32.mxu0 %v1755_v2  ;;  %v17049_v48 = vpack.c.bf16 %v852_v33, %v468_v32  ;;  %v861_v0 = vld [vmem:[%s18067_s8 + $0x1088] sm:$0x3] }
 0x17c   : > { %17040 = vmatprep.subr.bf16.mxu0 %v17039_v3  ;;  %v3978_v12 = vpop.f32.mrb[10].mxu0  ;;  %7826 = vmatprep.mubr.f32.mxu1 %v1756_v4  ;;  %v273_v32 = vld [vmem:[%s18060_s10 + $0x128] sm:$0xff] }
 0x17d   : > { %v4048_v13 = vpop.f32.mrb[10].mxu1  ;;  %17044 = vmatprep.subr.bf16.mxu1 %v17043_v5  ;;  %v3979_v17 = vadd.f32 %v3978_v12, %v3909_v1  ;;  %v3980_v18 = vpop.f32.mrb[11].mxu0  ;;  %v1805_v1 = vrot.slane %v1791_v55, %v18092_v25  ;;  %v479_v5 = vld [vmem:[%s18067_s8 + $0x498] sm:$0xff]  ;;  %v17063_v12 = vpack.c.bf16 %v861_v0, %v477_v63  ;;  %v1825_v40 = vcombine.high %v273_v32, %v273_v32 }
 0x17e   : > { %v4050_v19 = vpop.f32.mrb[11].mxu1  ;;  %v17067_v14 = vpack.c.bf16 %v863_v6, %v479_v5  ;;  %v478_v18 = vld [vmem:[%s18067_s8 + $0x490] sm:$0xff]  ;;  %v1832_v45 = vrot.slane %v273_v32, %v18092_v25  ;;  %v871_v55 = vld [vmem:[%s18067_s8 + $0x10d8] sm:$0x3] }
 0x17f   : > { %v4049_v26 = vadd.f32 %v4048_v13, %v3979_v17  ;;  %v1807_v13 = vcombine.high %v1805_v1, %v1805_v1  ;;  %v860_v17 = vld [vmem:[%s18067_s8 + $0x1080] sm:$0x3]  ;;  %v862_v19 = vld [vmem:[%s18067_s8 + $0x1090] sm:$0x3] }
 0x180   : > { %v17069_v34 = vpack.c.bf16 %v862_v19, %v478_v18 }
 0x181   : > { %7757 = vmatmul.mubr.f32.vlgmr.msra.gmra.mrb[64].mxu0 %v1747_v51  ;;  %v1789_v51 = vcombine.high %v1781_v36, %v1781_v36 }
 0x182   : > { %7827 = vmatmul.mubr.f32.vlgmr.msra.gmra.mrb[64].mxu1 %v1754_v56  ;;  %17042 = vmatpush1.bf16.xpose.msra.mxu0 %v17041_v23  ;;  %v472_v56 = vld [vmem:[%s18067_s8 + $0x460] sm:$0xff]  ;;  %v481_v23 = vld [vmem:[%s18067_s8 + $0x4a8] sm:$0xff] }
 0x183   : > { %17046 = vmatpush1.bf16.xpose.msra.mxu1 %v17045_v24  ;;  %7896 = vmatprep.mubr.f32.mxu0 %v1772_v27  ;;  %v17057_v8 = vpack.c.bf16 %v856_v57, %v472_v56  ;;  %v865_v24 = vld [vmem:[%s18067_s8 + $0x10a8] sm:$0x3]  ;;  %v274_v56 = vld [vmem:[%s18060_s10 + $0x130] sm:$0xff] }
 0x184   : > { %17048 = vmatprep.subr.bf16.mxu0 %v17047_v28  ;;  %v4118_v37 = vpop.f32.mrb[12].mxu0  ;;  %7966 = vmatprep.mubr.f32.mxu1 %v1773_v29  ;;  %v1842_v0 = vcombine.high %v274_v56, %v274_v56  ;;  %v1849_v5 = vrot.slane %v274_v56, %v18092_v25 }
 0x185   : > { %v4188_v38 = vpop.f32.mrb[12].mxu1  ;;  %17052 = vmatprep.subr.bf16.mxu1 %v17051_v30  ;;  %v4119_v42 = vadd.f32 %v4118_v37, %v4049_v26  ;;  %v4120_v43 = vpop.f32.mrb[13].mxu0  ;;  %v1822_v26 = vrot.slane %v1808_v15, %v18092_v25  ;;  %v483_v30 = vld [vmem:[%s18067_s8 + $0x4b8] sm:$0xff]  ;;  %v17071_v37 = vpack.c.bf16 %v865_v24, %v481_v23 }
 0x186   : > { %v4190_v44 = vpop.f32.mrb[13].mxu1  ;;  %v17075_v39 = vpack.c.bf16 %v867_v31, %v483_v30  ;;  %v482_v43 = vld [vmem:[%s18067_s8 + $0x4b0] sm:$0xff]  ;;  %v875_v15 = vld [vmem:[%s18067_s8 + $0x10f8] sm:$0x3] }
 0x187   : > { %v4189_v50 = vadd.f32 %v4188_v38, %v4119_v42  ;;  %v1824_v38 = vcombine.high %v1822_v26, %v1822_v26  ;;  %v864_v42 = vld [vmem:[%s18067_s8 + $0x10a0] sm:$0x3]  ;;  %v866_v44 = vld [vmem:[%s18067_s8 + $0x10b0] sm:$0x3] }
 0x188   : > { %v17077_v58 = vpack.c.bf16 %v866_v44, %v482_v43 }
 0x189   : > { %7897 = vmatmul.mubr.f32.vlgmr.msra.gmra.mrb[66].mxu0 %v1764_v11  ;;  %v1806_v11 = vcombine.high %v1798_v60, %v1798_v60 }
 0x18a   : > { %7967 = vmatmul.mubr.f32.vlgmr.msra.gmra.mrb[66].mxu1 %v1771_v16  ;;  %17050 = vmatpush1.bf16.xpose.msra.mxu0 %v17049_v48  ;;  %v476_v16 = vld [vmem:[%s18067_s8 + $0x480] sm:$0xff]  ;;  %v485_v48 = vld [vmem:[%s18067_s8 + $0x4c8] sm:$0xff] }
 0x18b   : > { %17054 = vmatpush1.bf16.xpose.msra.mxu1 %v17053_v49  ;;  %8036 = vmatprep.mubr.f32.mxu0 %v1789_v51  ;;  %v17065_v33 = vpack.c.bf16 %v860_v17, %v476_v16  ;;  %v869_v49 = vld [vmem:[%s18067_s8 + $0x10c8] sm:$0x3]  ;;  %v275_v16 = vld [vmem:[%s18060_s10 + $0x138] sm:$0xff] }
 0x18c   : > { %17056 = vmatprep.subr.bf16.mxu0 %v17055_v52  ;;  %v4258_v61 = vpop.f32.mrb[14].mxu0  ;;  %8106 = vmatprep.mubr.f32.mxu1 %v1790_v53  ;;  %v1859_v24 = vcombine.high %v275_v16, %v275_v16  ;;  %v1866_v30 = vrot.slane %v275_v16, %v18092_v25 }
 0x18d   : > { %v4328_v62 = vpop.f32.mrb[14].mxu1  ;;  %17060 = vmatprep.subr.bf16.mxu1 %v17059_v54  ;;  %v4259_v2 = vadd.f32 %v4258_v61, %v4189_v50  ;;  %v4260_v3 = vpop.f32.mrb[15].mxu0  ;;  %v1839_v50 = vrot.slane %v1825_v40, %v18092_v25  ;;  %v487_v54 = vld [vmem:[%s18067_s8 + $0x4d8] sm:$0xff]  ;;  %v17079_v61 = vpack.c.bf16 %v869_v49, %v485_v48 }
 0x18e   : > { %v4330_v4 = vpop.f32.mrb[15].mxu1  ;;  %v17083_v63 = vpack.c.bf16 %v871_v55, %v487_v54  ;;  %v486_v3 = vld [vmem:[%s18067_s8 + $0x4d0] sm:$0xff]  ;;  %v879_v40 = vld [vmem:[%s18067_s8 + $0x1118] sm:$0x3] }
 0x18f   : > { %v4329_v10 = vadd.f32 %v4328_v62, %v4259_v2  ;;  %v1841_v62 = vcombine.high %v1839_v50, %v1839_v50  ;;  %v868_v2 = vld [vmem:[%s18067_s8 + $0x10c0] sm:$0x3]  ;;  %v870_v4 = vld [vmem:[%s18067_s8 + $0x10d0] sm:$0x3] }
 0x190   : > { %v17085_v18 = vpack.c.bf16 %v870_v4, %v486_v3 }
 0x191   : > { %8037 = vmatmul.mubr.f32.vlgmr.msra.gmra.mrb[68].mxu0 %v1781_v36  ;;  %v1823_v36 = vcombine.high %v1815_v20, %v1815_v20 }
 0x192   : > { %8107 = vmatmul.mubr.f32.vlgmr.msra.gmra.mrb[68].mxu1 %v1788_v41  ;;  %17058 = vmatpush1.bf16.xpose.msra.mxu0 %v17057_v8  ;;  %v480_v41 = vld [vmem:[%s18067_s8 + $0x4a0] sm:$0xff]  ;;  %v489_v8 = vld [vmem:[%s18067_s8 + $0x4e8] sm:$0xff] }
 0x193   : > { %17062 = vmatpush1.bf16.xpose.msra.mxu1 %v17061_v9  ;;  %8176 = vmatprep.mubr.f32.mxu0 %v1806_v11  ;;  %v17073_v57 = vpack.c.bf16 %v864_v42, %v480_v41  ;;  %v873_v9 = vld [vmem:[%s18067_s8 + $0x10e8] sm:$0x3]  ;;  %v276_v41 = vld [vmem:[%s18060_s10 + $0x140] sm:$0xff] }
 0x194   : > { %17064 = vmatprep.subr.bf16.mxu0 %v17063_v12  ;;  %v4398_v21 = vpop.f32.mrb[16].mxu0  ;;  %8246 = vmatprep.mubr.f32.mxu1 %v1807_v13  ;;  %v1876_v49 = vcombine.high %v276_v41, %v276_v41  ;;  %v1883_v54 = vrot.slane %v276_v41, %v18092_v25 }
 0x195   : > { %v4468_v22 = vpop.f32.mrb[16].mxu1  ;;  %17068 = vmatprep.subr.bf16.mxu1 %v17067_v14  ;;  %v4399_v27 = vadd.f32 %v4398_v21, %v4329_v10  ;;  %v4400_v28 = vpop.f32.mrb[17].mxu0  ;;  %v1856_v10 = vrot.slane %v1842_v0, %v18092_v25  ;;  %v491_v14 = vld [vmem:[%s18067_s8 + $0x4f8] sm:$0xff]  ;;  %v17087_v21 = vpack.c.bf16 %v873_v9, %v489_v8 }
 0x196   : > { %v4470_v29 = vpop.f32.mrb[17].mxu1  ;;  %v17091_v23 = vpack.c.bf16 %v875_v15, %v491_v14  ;;  %v490_v28 = vld [vmem:[%s18067_s8 + $0x4f0] sm:$0xff]  ;;  %v883_v0 = vld [vmem:[%s18067_s8 + $0x1138] sm:$0x3] }
 0x197   : > { %v4469_v35 = vadd.f32 %v4468_v22, %v4399_v27  ;;  %v1858_v22 = vcombine.high %v1856_v10, %v1856_v10  ;;  %v872_v27 = vld [vmem:[%s18067_s8 + $0x10e0] sm:$0x3]  ;;  %v874_v29 = vld [vmem:[%s18067_s8 + $0x10f0] sm:$0x3] }
 0x198   : > { %v17093_v43 = vpack.c.bf16 %v874_v29, %v490_v28 }
 0x199   : > { %8177 = vmatmul.mubr.f32.vlgmr.msra.gmra.mrb[70].mxu0 %v1798_v60  ;;  %v1840_v60 = vcombine.high %v1832_v45, %v1832_v45 }
 0x19a   : > { %8247 = vmatmul.mubr.f32.vlgmr.msra.gmra.mrb[70].mxu1 %v1805_v1  ;;  %17066 = vmatpush1.bf16.xpose.msra.mxu0 %v17065_v33  ;;  %v484_v1 = vld [vmem:[%s18067_s8 + $0x4c0] sm:$0xff]  ;;  %v493_v33 = vld [vmem:[%s18067_s8 + $0x508] sm:$0xff] }
 0x19b   : > { %17070 = vmatpush1.bf16.xpose.msra.mxu1 %v17069_v34  ;;  %8316 = vmatprep.mubr.f32.mxu0 %v1823_v36  ;;  %v17081_v17 = vpack.c.bf16 %v868_v2, %v484_v1  ;;  %v877_v34 = vld [vmem:[%s18067_s8 + $0x1108] sm:$0x3] }
 0x19c   : > { %17072 = vmatprep.subr.bf16.mxu0 %v17071_v37  ;;  %v4538_v46 = vpop.f32.mrb[18].mxu0  ;;  %8386 = vmatprep.mubr.f32.mxu1 %v1824_v38  ;;  %v277_v1 = vld [vmem:[%s18060_s10 + $0x148] sm:$0xff] }
 0x19d   : > { %v4608_v47 = vpop.f32.mrb[18].mxu1  ;;  %17076 = vmatprep.subr.bf16.mxu1 %v17075_v39  ;;  %v4539_v51 = vadd.f32 %v4538_v46, %v4469_v35  ;;  %v4540_v52 = vpop.f32.mrb[19].mxu0  ;;  %v1873_v35 = vrot.slane %v1859_v24, %v18092_v25  ;;  %v495_v39 = vld [vmem:[%s18067_s8 + $0x518] sm:$0xff]  ;;  %v17095_v46 = vpack.c.bf16 %v877_v34, %v493_v33  ;;  %v1893_v9 = vcombine.high %v277_v1, %v277_v1 }
 0x19e   : > { %v4610_v53 = vpop.f32.mrb[19].mxu1  ;;  %v17099_v48 = vpack.c.bf16 %v879_v40, %v495_v39  ;;  %v494_v52 = vld [vmem:[%s18067_s8 + $0x510] sm:$0xff]  ;;  %v1900_v14 = vrot.slane %v277_v1, %v18092_v25  ;;  %v887_v24 = vld [vmem:[%s18067_s8 + $0x1158] sm:$0x3] }
 0x19f   : > { %v4609_v59 = vadd.f32 %v4608_v47, %v4539_v51  ;;  %v1875_v47 = vcombine.high %v1873_v35, %v1873_v35  ;;  %v876_v51 = vld [vmem:[%s18067_s8 + $0x1100] sm:$0x3]  ;;  %v878_v53 = vld [vmem:[%s18067_s8 + $0x1110] sm:$0x3] }
 0x1a0   : > { %v17101_v3 = vpack.c.bf16 %v878_v53, %v494_v52 }
 0x1a1   : > { %8317 = vmatmul.mubr.f32.vlgmr.msra.gmra.mrb[72].mxu0 %v1815_v20  ;;  %v1857_v20 = vcombine.high %v1849_v5, %v1849_v5 }
 0x1a2   : > { %8387 = vmatmul.mubr.f32.vlgmr.msra.gmra.mrb[72].mxu1 %v1822_v26  ;;  %17074 = vmatpush1.bf16.xpose.msra.mxu0 %v17073_v57  ;;  %v488_v26 = vld [vmem:[%s18067_s8 + $0x4e0] sm:$0xff]  ;;  %v497_v57 = vld [vmem:[%s18067_s8 + $0x528] sm:$0xff] }
 0x1a3   : > { %17078 = vmatpush1.bf16.xpose.msra.mxu1 %v17077_v58  ;;  %8456 = vmatprep.mubr.f32.mxu0 %v1840_v60  ;;  %v17089_v42 = vpack.c.bf16 %v872_v27, %v488_v26  ;;  %v881_v58 = vld [vmem:[%s18067_s8 + $0x1128] sm:$0x3]  ;;  %v278_v26 = vld [vmem:[%s18060_s10 + $0x150] sm:$0xff] }
 0x1a4   : > { %17080 = vmatprep.subr.bf16.mxu0 %v17079_v61  ;;  %v4678_v6 = vpop.f32.mrb[20].mxu0  ;;  %8526 = vmatprep.mubr.f32.mxu1 %v1841_v62  ;;  %v1910_v34 = vcombine.high %v278_v26, %v278_v26  ;;  %v1917_v39 = vrot.slane %v278_v26, %v18092_v25 }
 0x1a5   : > { %v4748_v7 = vpop.f32.mrb[20].mxu1  ;;  %17084 = vmatprep.subr.bf16.mxu1 %v17083_v63  ;;  %v4679_v11 = vadd.f32 %v4678_v6, %v4609_v59  ;;  %v4680_v12 = vpop.f32.mrb[21].mxu0  ;;  %v1890_v59 = vrot.slane %v1876_v49, %v18092_v25  ;;  %v499_v63 = vld [vmem:[%s18067_s8 + $0x538] sm:$0xff]  ;;  %v17103_v6 = vpack.c.bf16 %v881_v58, %v497_v57 }
 0x1a6   : > { %v4750_v13 = vpop.f32.mrb[21].mxu1  ;;  %v17107_v8 = vpack.c.bf16 %v883_v0, %v499_v63  ;;  %v498_v12 = vld [vmem:[%s18067_s8 + $0x530] sm:$0xff]  ;;  %v891_v49 = vld [vmem:[%s18067_s8 + $0x1178] sm:$0x3] }
 0x1a7   : > { %v4749_v19 = vadd.f32 %v4748_v7, %v4679_v11  ;;  %v1892_v7 = vcombine.high %v1890_v59, %v1890_v59  ;;  %v880_v11 = vld [vmem:[%s18067_s8 + $0x1120] sm:$0x3]  ;;  %v882_v13 = vld [vmem:[%s18067_s8 + $0x1130] sm:$0x3] }
 0x1a8   : > { %v17109_v28 = vpack.c.bf16 %v882_v13, %v498_v12 }
 0x1a9   : > { %8457 = vmatmul.mubr.f32.vlgmr.msra.gmra.mrb[74].mxu0 %v1832_v45  ;;  %v1874_v45 = vcombine.high %v1866_v30, %v1866_v30 }
 0x1aa   : > { %8527 = vmatmul.mubr.f32.vlgmr.msra.gmra.mrb[74].mxu1 %v1839_v50  ;;  %17082 = vmatpush1.bf16.xpose.msra.mxu0 %v17081_v17  ;;  %v492_v50 = vld [vmem:[%s18067_s8 + $0x500] sm:$0xff]  ;;  %v501_v17 = vld [vmem:[%s18067_s8 + $0x548] sm:$0xff] }
 0x1ab   : > { %17086 = vmatpush1.bf16.xpose.msra.mxu1 %v17085_v18  ;;  %8596 = vmatprep.mubr.f32.mxu0 %v1857_v20  ;;  %v17097_v2 = vpack.c.bf16 %v876_v51, %v492_v50  ;;  %v885_v18 = vld [vmem:[%s18067_s8 + $0x1148] sm:$0x3]  ;;  %v279_v50 = vld [vmem:[%s18060_s10 + $0x158] sm:$0xff] }
 0x1ac   : > { %17088 = vmatprep.subr.bf16.mxu0 %v17087_v21  ;;  %v4818_v31 = vpop.f32.mrb[22].mxu0  ;;  %8666 = vmatprep.mubr.f32.mxu1 %v1858_v22  ;;  %v1927_v58 = vcombine.high %v279_v50, %v279_v50  ;;  %v1934_v63 = vrot.slane %v279_v50, %v18092_v25 }
 0x1ad   : > { %v4888_v32 = vpop.f32.mrb[22].mxu1  ;;  %17092 = vmatprep.subr.bf16.mxu1 %v17091_v23  ;;  %v4819_v36 = vadd.f32 %v4818_v31, %v4749_v19  ;;  %v4820_v37 = vpop.f32.mrb[23].mxu0  ;;  %v1907_v19 = vrot.slane %v1893_v9, %v18092_v25  ;;  %v503_v23 = vld [vmem:[%s18067_s8 + $0x558] sm:$0xff]  ;;  %v17111_v31 = vpack.c.bf16 %v885_v18, %v501_v17 }
 0x1ae   : > { %v4890_v38 = vpop.f32.mrb[23].mxu1  ;;  %v17115_v33 = vpack.c.bf16 %v887_v24, %v503_v23  ;;  %v502_v37 = vld [vmem:[%s18067_s8 + $0x550] sm:$0xff]  ;;  %v895_v9 = vld [vmem:[%s18067_s8 + $0x1198] sm:$0x3] }
 0x1af   : > { %v4889_v44 = vadd.f32 %v4888_v32, %v4819_v36  ;;  %v1909_v32 = vcombine.high %v1907_v19, %v1907_v19  ;;  %v884_v36 = vld [vmem:[%s18067_s8 + $0x1140] sm:$0x3]  ;;  %v886_v38 = vld [vmem:[%s18067_s8 + $0x1150] sm:$0x3] }
 0x1b0   : > { %v17117_v52 = vpack.c.bf16 %v886_v38, %v502_v37 }
 0x1b1   : > { %8597 = vmatmul.mubr.f32.vlgmr.msra.gmra.mrb[76].mxu0 %v1849_v5  ;;  %v1891_v5 = vcombine.high %v1883_v54, %v1883_v54 }
 0x1b2   : > { %8667 = vmatmul.mubr.f32.vlgmr.msra.gmra.mrb[76].mxu1 %v1856_v10  ;;  %17090 = vmatpush1.bf16.xpose.msra.mxu0 %v17089_v42  ;;  %v496_v10 = vld [vmem:[%s18067_s8 + $0x520] sm:$0xff]  ;;  %v505_v42 = vld [vmem:[%s18067_s8 + $0x568] sm:$0xff] }
 0x1b3   : > { %17094 = vmatpush1.bf16.xpose.msra.mxu1 %v17093_v43  ;;  %8736 = vmatprep.mubr.f32.mxu0 %v1874_v45  ;;  %v17105_v27 = vpack.c.bf16 %v880_v11, %v496_v10  ;;  %v889_v43 = vld [vmem:[%s18067_s8 + $0x1168] sm:$0x3]  ;;  %v280_v10 = vld [vmem:[%s18060_s10 + $0x160] sm:$0xff] }
 0x1b4   : > { %17096 = vmatprep.subr.bf16.mxu0 %v17095_v46  ;;  %v4958_v55 = vpop.f32.mrb[24].mxu0  ;;  %8806 = vmatprep.mubr.f32.mxu1 %v1875_v47  ;;  %v1944_v18 = vcombine.high %v280_v10, %v280_v10  ;;  %v1951_v23 = vrot.slane %v280_v10, %v18092_v25 }
 0x1b5   : > { %v5028_v56 = vpop.f32.mrb[24].mxu1  ;;  %17100 = vmatprep.subr.bf16.mxu1 %v17099_v48  ;;  %v4959_v60 = vadd.f32 %v4958_v55, %v4889_v44  ;;  %v4960_v61 = vpop.f32.mrb[25].mxu0  ;;  %v1924_v44 = vrot.slane %v1910_v34, %v18092_v25  ;;  %v507_v48 = vld [vmem:[%s18067_s8 + $0x578] sm:$0xff]  ;;  %v17119_v55 = vpack.c.bf16 %v889_v43, %v505_v42 }
 0x1b6   : > { %v5030_v62 = vpop.f32.mrb[25].mxu1  ;;  %v17123_v57 = vpack.c.bf16 %v891_v49, %v507_v48  ;;  %v506_v61 = vld [vmem:[%s18067_s8 + $0x570] sm:$0xff]  ;;  %v899_v34 = vld [vmem:[%s18067_s8 + $0x11b8] sm:$0x3] }
 0x1b7   : > { %v5029_v4 = vadd.f32 %v5028_v56, %v4959_v60  ;;  %v1926_v56 = vcombine.high %v1924_v44, %v1924_v44  ;;  %v888_v60 = vld [vmem:[%s18067_s8 + $0x1160] sm:$0x3]  ;;  %v890_v62 = vld [vmem:[%s18067_s8 + $0x1170] sm:$0x3] }
 0x1b8   : > { %v17125_v12 = vpack.c.bf16 %v890_v62, %v506_v61 }
 0x1b9   : > { %8737 = vmatmul.mubr.f32.vlgmr.msra.gmra.mrb[78].mxu0 %v1866_v30  ;;  %v1908_v30 = vcombine.high %v1900_v14, %v1900_v14 }
 0x1ba   : > { %8807 = vmatmul.mubr.f32.vlgmr.msra.gmra.mrb[78].mxu1 %v1873_v35  ;;  %17098 = vmatpush1.bf16.xpose.msra.mxu0 %v17097_v2  ;;  %v500_v35 = vld [vmem:[%s18067_s8 + $0x540] sm:$0xff]  ;;  %v509_v2 = vld [vmem:[%s18067_s8 + $0x588] sm:$0xff] }
 0x1bb   : > { %17102 = vmatpush1.bf16.xpose.msra.mxu1 %v17101_v3  ;;  %8876 = vmatprep.mubr.f32.mxu0 %v1891_v5  ;;  %v17113_v51 = vpack.c.bf16 %v884_v36, %v500_v35  ;;  %v893_v3 = vld [vmem:[%s18067_s8 + $0x1188] sm:$0x3] }
 0x1bc   : > { %17104 = vmatprep.subr.bf16.mxu0 %v17103_v6  ;;  %v5098_v15 = vpop.f32.mrb[26].mxu0  ;;  %8946 = vmatprep.mubr.f32.mxu1 %v1892_v7  ;;  %v281_v35 = vld [vmem:[%s18060_s10 + $0x168] sm:$0xff] }
 0x1bd   : > { %v5168_v16 = vpop.f32.mrb[26].mxu1  ;;  %17108 = vmatprep.subr.bf16.mxu1 %v17107_v8  ;;  %v5099_v20 = vadd.f32 %v5098_v15, %v5029_v4  ;;  %v5100_v21 = vpop.f32.mrb[27].mxu0  ;;  %v1941_v4 = vrot.slane %v1927_v58, %v18092_v25  ;;  %v511_v8 = vld [vmem:[%s18067_s8 + $0x598] sm:$0xff]  ;;  %v17127_v15 = vpack.c.bf16 %v893_v3, %v509_v2  ;;  %v1961_v43 = vcombine.high %v281_v35, %v281_v35 }
 0x1be   : > { %v5170_v22 = vpop.f32.mrb[27].mxu1  ;;  %v17131_v17 = vpack.c.bf16 %v895_v9, %v511_v8  ;;  %v510_v21 = vld [vmem:[%s18067_s8 + $0x590] sm:$0xff]  ;;  %v1968_v48 = vrot.slane %v281_v35, %v18092_v25  ;;  %v903_v58 = vld [vmem:[%s18067_s8 + $0x11d8] sm:$0x3] }
 0x1bf   : > { %v5169_v29 = vadd.f32 %v5168_v16, %v5099_v20  ;;  %v1943_v16 = vcombine.high %v1941_v4, %v1941_v4  ;;  %v892_v20 = vld [vmem:[%s18067_s8 + $0x1180] sm:$0x3]  ;;  %v894_v22 = vld [vmem:[%s18067_s8 + $0x1190] sm:$0x3] }
 0x1c0   : > { %v17133_v37 = vpack.c.bf16 %v894_v22, %v510_v21 }
 0x1c1   : > { %8877 = vmatmul.mubr.f32.vlgmr.msra.gmra.mrb[80].mxu0 %v1883_v54  ;;  %v1925_v54 = vcombine.high %v1917_v39, %v1917_v39 }
 0x1c2   : > { %8947 = vmatmul.mubr.f32.vlgmr.msra.gmra.mrb[80].mxu1 %v1890_v59  ;;  %17106 = vmatpush1.bf16.xpose.msra.mxu0 %v17105_v27  ;;  %v504_v59 = vld [vmem:[%s18067_s8 + $0x560] sm:$0xff]  ;;  %v513_v27 = vld [vmem:[%s18067_s8 + $0x5a8] sm:$0xff] }
 0x1c3   : > { %17110 = vmatpush1.bf16.xpose.msra.mxu1 %v17109_v28  ;;  %9016 = vmatprep.mubr.f32.mxu0 %v1908_v30  ;;  %v17121_v11 = vpack.c.bf16 %v888_v60, %v504_v59  ;;  %v897_v28 = vld [vmem:[%s18067_s8 + $0x11a8] sm:$0x3]  ;;  %v282_v59 = vld [vmem:[%s18060_s10 + $0x170] sm:$0xff] }
 0x1c4   : > { %17112 = vmatprep.subr.bf16.mxu0 %v17111_v31  ;;  %v5238_v40 = vpop.f32.mrb[28].mxu0  ;;  %9086 = vmatprep.mubr.f32.mxu1 %v1909_v32  ;;  %v1978_v3 = vcombine.high %v282_v59, %v282_v59  ;;  %v1985_v8 = vrot.slane %v282_v59, %v18092_v25 }
 0x1c5   : > { %v5308_v41 = vpop.f32.mrb[28].mxu1  ;;  %17116 = vmatprep.subr.bf16.mxu1 %v17115_v33  ;;  %v5239_v45 = vadd.f32 %v5238_v40, %v5169_v29  ;;  %v5240_v46 = vpop.f32.mrb[29].mxu0  ;;  %v1958_v29 = vrot.slane %v1944_v18, %v18092_v25  ;;  %v515_v33 = vld [vmem:[%s18067_s8 + $0x5b8] sm:$0xff]  ;;  %v17135_v40 = vpack.c.bf16 %v897_v28, %v513_v27 }
 0x1c6   : > { %v5310_v47 = vpop.f32.mrb[29].mxu1  ;;  %v17139_v42 = vpack.c.bf16 %v899_v34, %v515_v33  ;;  %v514_v46 = vld [vmem:[%s18067_s8 + $0x5b0] sm:$0xff]  ;;  %v907_v18 = vld [vmem:[%s18067_s8 + $0x11f8] sm:$0x3] }
 0x1c7   : > { %v5309_v53 = vadd.f32 %v5308_v41, %v5239_v45  ;;  %v1960_v41 = vcombine.high %v1958_v29, %v1958_v29  ;;  %v896_v45 = vld [vmem:[%s18067_s8 + $0x11a0] sm:$0x3]  ;;  %v898_v47 = vld [vmem:[%s18067_s8 + $0x11b0] sm:$0x3] }
 0x1c8   : > { %v17141_v61 = vpack.c.bf16 %v898_v47, %v514_v46 }
 0x1c9   : > { %9017 = vmatmul.mubr.f32.vlgmr.msra.gmra.mrb[82].mxu0 %v1900_v14  ;;  %v1942_v14 = vcombine.high %v1934_v63, %v1934_v63 }
 0x1ca   : > { %9087 = vmatmul.mubr.f32.vlgmr.msra.gmra.mrb[82].mxu1 %v1907_v19  ;;  %17114 = vmatpush1.bf16.xpose.msra.mxu0 %v17113_v51  ;;  %v508_v19 = vld [vmem:[%s18067_s8 + $0x580] sm:$0xff]  ;;  %v517_v51 = vld [vmem:[%s18067_s8 + $0x5c8] sm:$0xff] }
 0x1cb   : > { %17118 = vmatpush1.bf16.xpose.msra.mxu1 %v17117_v52  ;;  %9156 = vmatprep.mubr.f32.mxu0 %v1925_v54  ;;  %v17129_v36 = vpack.c.bf16 %v892_v20, %v508_v19  ;;  %v901_v52 = vld [vmem:[%s18067_s8 + $0x11c8] sm:$0x3]  ;;  %v283_v19 = vld [vmem:[%s18060_s10 + $0x178] sm:$0xff] }
 0x1cc   : > { %17120 = vmatprep.subr.bf16.mxu0 %v17119_v55  ;;  %v5378_v0 = vpop.f32.mrb[30].mxu0  ;;  %9226 = vmatprep.mubr.f32.mxu1 %v1926_v56  ;;  %v1995_v28 = vcombine.high %v283_v19, %v283_v19  ;;  %v2002_v33 = vrot.slane %v283_v19, %v18092_v25 }
 0x1cd   : > { %v5448_v1 = vpop.f32.mrb[30].mxu1  ;;  %17124 = vmatprep.subr.bf16.mxu1 %v17123_v57  ;;  %v5379_v5 = vadd.f32 %v5378_v0, %v5309_v53  ;;  %v5380_v6 = vpop.f32.mrb[31].mxu0  ;;  %v1975_v53 = vrot.slane %v1961_v43, %v18092_v25  ;;  %v519_v57 = vld [vmem:[%s18067_s8 + $0x5d8] sm:$0xff]  ;;  %v17143_v0 = vpack.c.bf16 %v901_v52, %v517_v51 }
 0x1ce   : > { %v5450_v7 = vpop.f32.mrb[31].mxu1  ;;  %v17147_v2 = vpack.c.bf16 %v903_v58, %v519_v57  ;;  %v518_v6 = vld [vmem:[%s18067_s8 + $0x5d0] sm:$0xff]  ;;  %v911_v43 = vld [vmem:[%s18067_s8 + $0x1218] sm:$0x3] }
 0x1cf   : > { %v5449_v13 = vadd.f32 %v5448_v1, %v5379_v5  ;;  %v1977_v1 = vcombine.high %v1975_v53, %v1975_v53  ;;  %v900_v5 = vld [vmem:[%s18067_s8 + $0x11c0] sm:$0x3]  ;;  %v902_v7 = vld [vmem:[%s18067_s8 + $0x11d0] sm:$0x3] }
 0x1d0   : > { %v17149_v21 = vpack.c.bf16 %v902_v7, %v518_v6 }
 0x1d1   : > { %9157 = vmatmul.mubr.f32.vlgmr.msra.gmra.mrb[84].mxu0 %v1917_v39  ;;  %v1959_v39 = vcombine.high %v1951_v23, %v1951_v23 }
 0x1d2   : > { %9227 = vmatmul.mubr.f32.vlgmr.msra.gmra.mrb[84].mxu1 %v1924_v44  ;;  %17122 = vmatpush1.bf16.xpose.msra.mxu0 %v17121_v11  ;;  %v512_v44 = vld [vmem:[%s18067_s8 + $0x5a0] sm:$0xff]  ;;  %v521_v11 = vld [vmem:[%s18067_s8 + $0x5e8] sm:$0xff] }
 0x1d3   : > { %17126 = vmatpush1.bf16.xpose.msra.mxu1 %v17125_v12  ;;  %9296 = vmatprep.mubr.f32.mxu0 %v1942_v14  ;;  %v17137_v60 = vpack.c.bf16 %v896_v45, %v512_v44  ;;  %v905_v12 = vld [vmem:[%s18067_s8 + $0x11e8] sm:$0x3]  ;;  %v284_v44 = vld [vmem:[%s18060_s10 + $0x180] sm:$0xff] }
 0x1d4   : > { %17128 = vmatprep.subr.bf16.mxu0 %v17127_v15  ;;  %v5518_v24 = vpop.f32.mrb[32].mxu0  ;;  %9366 = vmatprep.mubr.f32.mxu1 %v1943_v16  ;;  %v2012_v52 = vcombine.high %v284_v44, %v284_v44  ;;  %v2019_v57 = vrot.slane %v284_v44, %v18092_v25 }
 0x1d5   : > { %v5588_v26 = vpop.f32.mrb[32].mxu1  ;;  %17132 = vmatprep.subr.bf16.mxu1 %v17131_v17  ;;  %v5519_v30 = vadd.f32 %v5518_v24, %v5449_v13  ;;  %v5520_v31 = vpop.f32.mrb[33].mxu0  ;;  %v1992_v13 = vrot.slane %v1978_v3, %v18092_v25  ;;  %v523_v17 = vld [vmem:[%s18067_s8 + $0x5f8] sm:$0xff]  ;;  %v17151_v24 = vpack.c.bf16 %v905_v12, %v521_v11 }
 0x1d6   : > { %v5590_v32 = vpop.f32.mrb[33].mxu1  ;;  %v17155_v27 = vpack.c.bf16 %v907_v18, %v523_v17  ;;  %v522_v31 = vld [vmem:[%s18067_s8 + $0x5f0] sm:$0xff]  ;;  %v915_v3 = vld [vmem:[%s18067_s8 + $0x1238] sm:$0x3] }
 0x1d7   : > { %v5589_v38 = vadd.f32 %v5588_v26, %v5519_v30  ;;  %v1994_v26 = vcombine.high %v1992_v13, %v1992_v13  ;;  %v904_v30 = vld [vmem:[%s18067_s8 + $0x11e0] sm:$0x3]  ;;  %v906_v32 = vld [vmem:[%s18067_s8 + $0x11f0] sm:$0x3] }
 0x1d8   : > { %v17157_v46 = vpack.c.bf16 %v906_v32, %v522_v31 }
 0x1d9   : > { %9297 = vmatmul.mubr.f32.vlgmr.msra.gmra.mrb[86].mxu0 %v1934_v63  ;;  %v1976_v63 = vcombine.high %v1968_v48, %v1968_v48 }
 0x1da   : > { %9367 = vmatmul.mubr.f32.vlgmr.msra.gmra.mrb[86].mxu1 %v1941_v4  ;;  %17130 = vmatpush1.bf16.xpose.msra.mxu0 %v17129_v36  ;;  %v516_v4 = vld [vmem:[%s18067_s8 + $0x5c0] sm:$0xff]  ;;  %v525_v36 = vld [vmem:[%s18067_s8 + $0x608] sm:$0xff] }
 0x1db   : > { %17134 = vmatpush1.bf16.xpose.msra.mxu1 %v17133_v37  ;;  %9436 = vmatprep.mubr.f32.mxu0 %v1959_v39  ;;  %v17145_v20 = vpack.c.bf16 %v900_v5, %v516_v4  ;;  %v909_v37 = vld [vmem:[%s18067_s8 + $0x1208] sm:$0x3] }
 0x1dc   : > { %17136 = vmatprep.subr.bf16.mxu0 %v17135_v40  ;;  %v5658_v49 = vpop.f32.mrb[34].mxu0  ;;  %9506 = vmatprep.mubr.f32.mxu1 %v1960_v41  ;;  %v285_v4 = vld [vmem:[%s18060_s10 + $0x188] sm:$0xff] }
 0x1dd   : > { %v5728_v50 = vpop.f32.mrb[34].mxu1  ;;  %17140 = vmatprep.subr.bf16.mxu1 %v17139_v42  ;;  %v5659_v54 = vadd.f32 %v5658_v49, %v5589_v38  ;;  %v5660_v55 = vpop.f32.mrb[35].mxu0  ;;  %v2009_v38 = vrot.slane %v1995_v28, %v18092_v25  ;;  %v527_v42 = vld [vmem:[%s18067_s8 + $0x618] sm:$0xff]  ;;  %v17159_v49 = vpack.c.bf16 %v909_v37, %v525_v36  ;;  %v2029_v12 = vcombine.high %v285_v4, %v285_v4 }
 0x1de   : > { %v5730_v56 = vpop.f32.mrb[35].mxu1  ;;  %v17163_v51 = vpack.c.bf16 %v911_v43, %v527_v42  ;;  %v526_v55 = vld [vmem:[%s18067_s8 + $0x610] sm:$0xff]  ;;  %v2036_v17 = vrot.slane %v285_v4, %v18092_v25  ;;  %v919_v28 = vld [vmem:[%s18067_s8 + $0x1258] sm:$0x3] }
 0x1df   : > { %v5729_v62 = vadd.f32 %v5728_v50, %v5659_v54  ;;  %v2011_v50 = vcombine.high %v2009_v38, %v2009_v38  ;;  %v908_v54 = vld [vmem:[%s18067_s8 + $0x1200] sm:$0x3]  ;;  %v910_v56 = vld [vmem:[%s18067_s8 + $0x1210] sm:$0x3] }
 0x1e0   : > { %v17165_v6 = vpack.c.bf16 %v910_v56, %v526_v55 }
 0x1e1   : > { %9437 = vmatmul.mubr.f32.vlgmr.msra.gmra.mrb[88].mxu0 %v1951_v23  ;;  %v1993_v23 = vcombine.high %v1985_v8, %v1985_v8 }
 0x1e2   : > { %9507 = vmatmul.mubr.f32.vlgmr.msra.gmra.mrb[88].mxu1 %v1958_v29  ;;  %17138 = vmatpush1.bf16.xpose.msra.mxu0 %v17137_v60  ;;  %v520_v29 = vld [vmem:[%s18067_s8 + $0x5e0] sm:$0xff]  ;;  %v529_v60 = vld [vmem:[%s18067_s8 + $0x628] sm:$0xff] }
 0x1e3   : > { %17142 = vmatpush1.bf16.xpose.msra.mxu1 %v17141_v61  ;;  %9576 = vmatprep.mubr.f32.mxu0 %v1976_v63  ;;  %v17153_v45 = vpack.c.bf16 %v904_v30, %v520_v29  ;;  %v913_v61 = vld [vmem:[%s18067_s8 + $0x1228] sm:$0x3]  ;;  %v286_v29 = vld [vmem:[%s18060_s10 + $0x190] sm:$0xff] }
 0x1e4   : > { %17144 = vmatprep.subr.bf16.mxu0 %v17143_v0  ;;  %v5798_v9 = vpop.f32.mrb[36].mxu0  ;;  %9646 = vmatprep.mubr.f32.mxu1 %v1977_v1  ;;  %v2046_v37 = vcombine.high %v286_v29, %v286_v29  ;;  %v2053_v42 = vrot.slane %v286_v29, %v18092_v25 }
 0x1e5   : > { %v5868_v10 = vpop.f32.mrb[36].mxu1  ;;  %17148 = vmatprep.subr.bf16.mxu1 %v17147_v2  ;;  %v5799_v14 = vadd.f32 %v5798_v9, %v5729_v62  ;;  %v5800_v15 = vpop.f32.mrb[37].mxu0  ;;  %v2026_v62 = vrot.slane %v2012_v52, %v18092_v25  ;;  %v531_v2 = vld [vmem:[%s18067_s8 + $0x638] sm:$0xff]  ;;  %v17167_v9 = vpack.c.bf16 %v913_v61, %v529_v60 }
 0x1e6   : > { %v5870_v16 = vpop.f32.mrb[37].mxu1  ;;  %v17171_v11 = vpack.c.bf16 %v915_v3, %v531_v2  ;;  %v530_v15 = vld [vmem:[%s18067_s8 + $0x630] sm:$0xff]  ;;  %v923_v52 = vld [vmem:[%s18067_s8 + $0x1278] sm:$0x3] }
 0x1e7   : > { %v5869_v22 = vadd.f32 %v5868_v10, %v5799_v14  ;;  %v2028_v10 = vcombine.high %v2026_v62, %v2026_v62  ;;  %v912_v14 = vld [vmem:[%s18067_s8 + $0x1220] sm:$0x3]  ;;  %v914_v16 = vld [vmem:[%s18067_s8 + $0x1230] sm:$0x3] }
 0x1e8   : > { %v17173_v31 = vpack.c.bf16 %v914_v16, %v530_v15 }
 0x1e9   : > { %9577 = vmatmul.mubr.f32.vlgmr.msra.gmra.mrb[90].mxu0 %v1968_v48  ;;  %v2010_v48 = vcombine.high %v2002_v33, %v2002_v33 }
 0x1ea   : > { %9647 = vmatmul.mubr.f32.vlgmr.msra.gmra.mrb[90].mxu1 %v1975_v53  ;;  %17146 = vmatpush1.bf16.xpose.msra.mxu0 %v17145_v20  ;;  %v524_v53 = vld [vmem:[%s18067_s8 + $0x600] sm:$0xff]  ;;  %v533_v20 = vld [vmem:[%s18067_s8 + $0x648] sm:$0xff] }
 0x1eb   : > { %17150 = vmatpush1.bf16.xpose.msra.mxu1 %v17149_v21  ;;  %9716 = vmatprep.mubr.f32.mxu0 %v1993_v23  ;;  %v17161_v5 = vpack.c.bf16 %v908_v54, %v524_v53  ;;  %v917_v21 = vld [vmem:[%s18067_s8 + $0x1248] sm:$0x3]  ;;  %v287_v53 = vld [vmem:[%s18060_s10 + $0x198] sm:$0xff] }
 0x1ec   : > { %17152 = vmatprep.subr.bf16.mxu0 %v17151_v24  ;;  %v5938_v34 = vpop.f32.mrb[38].mxu0  ;;  %9786 = vmatprep.mubr.f32.mxu1 %v1994_v26  ;;  %v2063_v61 = vcombine.high %v287_v53, %v287_v53  ;;  %v2070_v2 = vrot.slane %v287_v53, %v18092_v25 }
 0x1ed   : > { %v6008_v35 = vpop.f32.mrb[38].mxu1  ;;  %17156 = vmatprep.subr.bf16.mxu1 %v17155_v27  ;;  %v5939_v39 = vadd.f32 %v5938_v34, %v5869_v22  ;;  %v5940_v40 = vpop.f32.mrb[39].mxu0  ;;  %v2043_v22 = vrot.slane %v2029_v12, %v18092_v25  ;;  %v535_v27 = vld [vmem:[%s18067_s8 + $0x658] sm:$0xff]  ;;  %v17175_v34 = vpack.c.bf16 %v917_v21, %v533_v20 }
 0x1ee   : > { %v6010_v41 = vpop.f32.mrb[39].mxu1  ;;  %v17179_v36 = vpack.c.bf16 %v919_v28, %v535_v27  ;;  %v534_v40 = vld [vmem:[%s18067_s8 + $0x650] sm:$0xff]  ;;  %v927_v12 = vld [vmem:[%s18067_s8 + $0x1298] sm:$0x3] }
 0x1ef   : > { %v6009_v47 = vadd.f32 %v6008_v35, %v5939_v39  ;;  %v2045_v35 = vcombine.high %v2043_v22, %v2043_v22  ;;  %v916_v39 = vld [vmem:[%s18067_s8 + $0x1240] sm:$0x3]  ;;  %v918_v41 = vld [vmem:[%s18067_s8 + $0x1250] sm:$0x3] }
 0x1f0   : > { %v17181_v55 = vpack.c.bf16 %v918_v41, %v534_v40 }
 0x1f1   : > { %9717 = vmatmul.mubr.f32.vlgmr.msra.gmra.mrb[92].mxu0 %v1985_v8  ;;  %v2027_v8 = vcombine.high %v2019_v57, %v2019_v57 }
 0x1f2   : > { %9787 = vmatmul.mubr.f32.vlgmr.msra.gmra.mrb[92].mxu1 %v1992_v13  ;;  %17154 = vmatpush1.bf16.xpose.msra.mxu0 %v17153_v45  ;;  %v528_v13 = vld [vmem:[%s18067_s8 + $0x620] sm:$0xff]  ;;  %v537_v45 = vld [vmem:[%s18067_s8 + $0x668] sm:$0xff] }
 0x1f3   : > { %17158 = vmatpush1.bf16.xpose.msra.mxu1 %v17157_v46  ;;  %9856 = vmatprep.mubr.f32.mxu0 %v2010_v48  ;;  %v17169_v30 = vpack.c.bf16 %v912_v14, %v528_v13  ;;  %v921_v46 = vld [vmem:[%s18067_s8 + $0x1268] sm:$0x3]  ;;  %v288_v13 = vld [vmem:[%s18060_s10 + $0x1a0] sm:$0xff] }
 0x1f4   : > { %17160 = vmatprep.subr.bf16.mxu0 %v17159_v49  ;;  %v6078_v58 = vpop.f32.mrb[40].mxu0  ;;  %9926 = vmatprep.mubr.f32.mxu1 %v2011_v50  ;;  %v2080_v21 = vcombine.high %v288_v13, %v288_v13  ;;  %v2087_v27 = vrot.slane %v288_v13, %v18092_v25 }
 0x1f5   : > { %v6148_v59 = vpop.f32.mrb[40].mxu1  ;;  %17164 = vmatprep.subr.bf16.mxu1 %v17163_v51  ;;  %v6079_v63 = vadd.f32 %v6078_v58, %v6009_v47  ;;  %v6080_v0 = vpop.f32.mrb[41].mxu0  ;;  %v2060_v47 = vrot.slane %v2046_v37, %v18092_v25  ;;  %v539_v51 = vld [vmem:[%s18067_s8 + $0x678] sm:$0xff]  ;;  %v17183_v58 = vpack.c.bf16 %v921_v46, %v537_v45 }
 0x1f6   : > { %v6150_v1 = vpop.f32.mrb[41].mxu1  ;;  %v17187_v60 = vpack.c.bf16 %v923_v52, %v539_v51  ;;  %v538_v0 = vld [vmem:[%s18067_s8 + $0x670] sm:$0xff]  ;;  %v931_v37 = vld [vmem:[%s18067_s8 + $0x12b8] sm:$0x3] }
 0x1f7   : > { %v6149_v7 = vadd.f32 %v6148_v59, %v6079_v63  ;;  %v2062_v59 = vcombine.high %v2060_v47, %v2060_v47  ;;  %v920_v63 = vld [vmem:[%s18067_s8 + $0x1260] sm:$0x3]  ;;  %v922_v1 = vld [vmem:[%s18067_s8 + $0x1270] sm:$0x3] }
 0x1f8   : > { %v17189_v15 = vpack.c.bf16 %v922_v1, %v538_v0 }
 0x1f9   : > { %9857 = vmatmul.mubr.f32.vlgmr.msra.gmra.mrb[94].mxu0 %v2002_v33  ;;  %v2044_v33 = vcombine.high %v2036_v17, %v2036_v17 }
 0x1fa   : > { %9927 = vmatmul.mubr.f32.vlgmr.msra.gmra.mrb[94].mxu1 %v2009_v38  ;;  %17162 = vmatpush1.bf16.xpose.msra.mxu0 %v17161_v5  ;;  %v532_v38 = vld [vmem:[%s18067_s8 + $0x640] sm:$0xff]  ;;  %v541_v5 = vld [vmem:[%s18067_s8 + $0x688] sm:$0xff] }
 0x1fb   : > { %17166 = vmatpush1.bf16.xpose.msra.mxu1 %v17165_v6  ;;  %9996 = vmatprep.mubr.f32.mxu0 %v2027_v8  ;;  %v17177_v54 = vpack.c.bf16 %v916_v39, %v532_v38  ;;  %v925_v6 = vld [vmem:[%s18067_s8 + $0x1288] sm:$0x3] }
 0x1fc   : > { %17168 = vmatprep.subr.bf16.mxu0 %v17167_v9  ;;  %v6218_v18 = vpop.f32.mrb[42].mxu0  ;;  %10066 = vmatprep.mubr.f32.mxu1 %v2028_v10  ;;  %v289_v38 = vld [vmem:[%s18060_s10 + $0x1a8] sm:$0xff] }
 0x1fd   : > { %v6288_v19 = vpop.f32.mrb[42].mxu1  ;;  %17172 = vmatprep.subr.bf16.mxu1 %v17171_v11  ;;  %v6219_v23 = vadd.f32 %v6218_v18, %v6149_v7  ;;  %v6220_v24 = vpop.f32.mrb[43].mxu0  ;;  %v2077_v7 = vrot.slane %v2063_v61, %v18092_v25  ;;  %v543_v11 = vld [vmem:[%s18067_s8 + $0x698] sm:$0xff]  ;;  %v17191_v18 = vpack.c.bf16 %v925_v6, %v541_v5  ;;  %v2097_v46 = vcombine.high %v289_v38, %v289_v38 }
 0x1fe   : > { %v6290_v26 = vpop.f32.mrb[43].mxu1  ;;  %v17195_v20 = vpack.c.bf16 %v927_v12, %v543_v11  ;;  %v542_v24 = vld [vmem:[%s18067_s8 + $0x690] sm:$0xff]  ;;  %v2104_v51 = vrot.slane %v289_v38, %v18092_v25  ;;  %v935_v61 = vld [vmem:[%s18067_s8 + $0x12d8] sm:$0x3] }
 0x1ff   : > { %v6289_v32 = vadd.f32 %v6288_v19, %v6219_v23  ;;  %v2079_v19 = vcombine.high %v2077_v7, %v2077_v7  ;;  %v924_v23 = vld [vmem:[%s18067_s8 + $0x1280] sm:$0x3]  ;;  %v926_v26 = vld [vmem:[%s18067_s8 + $0x1290] sm:$0x3] }
 0x200   : > { %v17197_v40 = vpack.c.bf16 %v926_v26, %v542_v24 }
 0x201   : > { %9997 = vmatmul.mubr.f32.vlgmr.msra.gmra.mrb[96].mxu0 %v2019_v57  ;;  %v2061_v57 = vcombine.high %v2053_v42, %v2053_v42 }
 0x202   : > { %10067 = vmatmul.mubr.f32.vlgmr.msra.gmra.mrb[96].mxu1 %v2026_v62  ;;  %17170 = vmatpush1.bf16.xpose.msra.mxu0 %v17169_v30  ;;  %v536_v62 = vld [vmem:[%s18067_s8 + $0x660] sm:$0xff]  ;;  %v545_v30 = vld [vmem:[%s18067_s8 + $0x6a8] sm:$0xff] }
 0x203   : > { %17174 = vmatpush1.bf16.xpose.msra.mxu1 %v17173_v31  ;;  %10136 = vmatprep.mubr.f32.mxu0 %v2044_v33  ;;  %v17185_v14 = vpack.c.bf16 %v920_v63, %v536_v62  ;;  %v929_v31 = vld [vmem:[%s18067_s8 + $0x12a8] sm:$0x3]  ;;  %v290_v62 = vld [vmem:[%s18060_s10 + $0x1b0] sm:$0xff] }
 0x204   : > { %17176 = vmatprep.subr.bf16.mxu0 %v17175_v34  ;;  %v6358_v43 = vpop.f32.mrb[44].mxu0  ;;  %10206 = vmatprep.mubr.f32.mxu1 %v2045_v35  ;;  %v2114_v6 = vcombine.high %v290_v62, %v290_v62  ;;  %v2121_v11 = vrot.slane %v290_v62, %v18092_v25 }
 0x205   : > { %v6428_v44 = vpop.f32.mrb[44].mxu1  ;;  %17180 = vmatprep.subr.bf16.mxu1 %v17179_v36  ;;  %v6359_v48 = vadd.f32 %v6358_v43, %v6289_v32  ;;  %v6360_v49 = vpop.f32.mrb[45].mxu0  ;;  %v2094_v32 = vrot.slane %v2080_v21, %v18092_v25  ;;  %v547_v36 = vld [vmem:[%s18067_s8 + $0x6b8] sm:$0xff]  ;;  %v17199_v43 = vpack.c.bf16 %v929_v31, %v545_v30 }
 0x206   : > { %v6430_v50 = vpop.f32.mrb[45].mxu1  ;;  %v17203_v45 = vpack.c.bf16 %v931_v37, %v547_v36  ;;  %v546_v49 = vld [vmem:[%s18067_s8 + $0x6b0] sm:$0xff]  ;;  %v939_v21 = vld [vmem:[%s18067_s8 + $0x12f8] sm:$0x3] }
 0x207   : > { %v6429_v56 = vadd.f32 %v6428_v44, %v6359_v48  ;;  %v2096_v44 = vcombine.high %v2094_v32, %v2094_v32  ;;  %v928_v48 = vld [vmem:[%s18067_s8 + $0x12a0] sm:$0x3]  ;;  %v930_v50 = vld [vmem:[%s18067_s8 + $0x12b0] sm:$0x3] }
 0x208   : > { %v17205_v0 = vpack.c.bf16 %v930_v50, %v546_v49 }
 0x209   : > { %10137 = vmatmul.mubr.f32.vlgmr.msra.gmra.mrb[98].mxu0 %v2036_v17  ;;  %v2078_v17 = vcombine.high %v2070_v2, %v2070_v2 }
 0x20a   : > { %10207 = vmatmul.mubr.f32.vlgmr.msra.gmra.mrb[98].mxu1 %v2043_v22  ;;  %17178 = vmatpush1.bf16.xpose.msra.mxu0 %v17177_v54  ;;  %v540_v22 = vld [vmem:[%s18067_s8 + $0x680] sm:$0xff]  ;;  %v549_v54 = vld [vmem:[%s18067_s8 + $0x6c8] sm:$0xff] }
 0x20b   : > { %17182 = vmatpush1.bf16.xpose.msra.mxu1 %v17181_v55  ;;  %10276 = vmatprep.mubr.f32.mxu0 %v2061_v57  ;;  %v17193_v39 = vpack.c.bf16 %v924_v23, %v540_v22  ;;  %v933_v55 = vld [vmem:[%s18067_s8 + $0x12c8] sm:$0x3]  ;;  %v291_v22 = vld [vmem:[%s18060_s10 + $0x1b8] sm:$0xff] }
 0x20c   : > { %17184 = vmatprep.subr.bf16.mxu0 %v17183_v58  ;;  %v6498_v3 = vpop.f32.mrb[46].mxu0  ;;  %10346 = vmatprep.mubr.f32.mxu1 %v2062_v59  ;;  %v2131_v31 = vcombine.high %v291_v22, %v291_v22  ;;  %v2138_v36 = vrot.slane %v291_v22, %v18092_v25 }
 0x20d   : > { %v6568_v4 = vpop.f32.mrb[46].mxu1  ;;  %17188 = vmatprep.subr.bf16.mxu1 %v17187_v60  ;;  %v6499_v8 = vadd.f32 %v6498_v3, %v6429_v56  ;;  %v6500_v9 = vpop.f32.mrb[47].mxu0  ;;  %v2111_v56 = vrot.slane %v2097_v46, %v18092_v25  ;;  %v551_v60 = vld [vmem:[%s18067_s8 + $0x6d8] sm:$0xff]  ;;  %v17207_v3 = vpack.c.bf16 %v933_v55, %v549_v54 }
 0x20e   : > { %v6570_v10 = vpop.f32.mrb[47].mxu1  ;;  %v17211_v5 = vpack.c.bf16 %v935_v61, %v551_v60  ;;  %v550_v9 = vld [vmem:[%s18067_s8 + $0x6d0] sm:$0xff]  ;;  %v943_v46 = vld [vmem:[%s18067_s8 + $0x1318] sm:$0x3] }
 0x20f   : > { %v6569_v16 = vadd.f32 %v6568_v4, %v6499_v8  ;;  %v2113_v4 = vcombine.high %v2111_v56, %v2111_v56  ;;  %v932_v8 = vld [vmem:[%s18067_s8 + $0x12c0] sm:$0x3]  ;;  %v934_v10 = vld [vmem:[%s18067_s8 + $0x12d0] sm:$0x3] }
 0x210   : > { %v17213_v24 = vpack.c.bf16 %v934_v10, %v550_v9 }
 0x211   : > { %10277 = vmatmul.mubr.f32.vlgmr.msra.gmra.mrb[100].mxu0 %v2053_v42  ;;  %v2095_v42 = vcombine.high %v2087_v27, %v2087_v27 }
 0x212   : > { %10347 = vmatmul.mubr.f32.vlgmr.msra.gmra.mrb[100].mxu1 %v2060_v47  ;;  %17186 = vmatpush1.bf16.xpose.msra.mxu0 %v17185_v14  ;;  %v544_v47 = vld [vmem:[%s18067_s8 + $0x6a0] sm:$0xff]  ;;  %v553_v14 = vld [vmem:[%s18067_s8 + $0x6e8] sm:$0xff] }
 0x213   : > { %17190 = vmatpush1.bf16.xpose.msra.mxu1 %v17189_v15  ;;  %10416 = vmatprep.mubr.f32.mxu0 %v2078_v17  ;;  %v17201_v63 = vpack.c.bf16 %v928_v48, %v544_v47  ;;  %v937_v15 = vld [vmem:[%s18067_s8 + $0x12e8] sm:$0x3]  ;;  %v292_v47 = vld [vmem:[%s18060_s10 + $0x1c0] sm:$0xff] }
 0x214   : > { %17192 = vmatprep.subr.bf16.mxu0 %v17191_v18  ;;  %v6638_v28 = vpop.f32.mrb[48].mxu0  ;;  %10486 = vmatprep.mubr.f32.mxu1 %v2079_v19  ;;  %v2148_v55 = vcombine.high %v292_v47, %v292_v47  ;;  %v2155_v60 = vrot.slane %v292_v47, %v18092_v25 }
 0x215   : > { %v6708_v29 = vpop.f32.mrb[48].mxu1  ;;  %17196 = vmatprep.subr.bf16.mxu1 %v17195_v20  ;;  %v6639_v33 = vadd.f32 %v6638_v28, %v6569_v16  ;;  %v6640_v34 = vpop.f32.mrb[49].mxu0  ;;  %v2128_v16 = vrot.slane %v2114_v6, %v18092_v25  ;;  %v555_v20 = vld [vmem:[%s18067_s8 + $0x6f8] sm:$0xff]  ;;  %v17215_v28 = vpack.c.bf16 %v937_v15, %v553_v14 }
 0x216   : > { %v6710_v35 = vpop.f32.mrb[49].mxu1  ;;  %v17219_v30 = vpack.c.bf16 %v939_v21, %v555_v20  ;;  %v554_v34 = vld [vmem:[%s18067_s8 + $0x6f0] sm:$0xff]  ;;  %v947_v6 = vld [vmem:[%s18067_s8 + $0x1338] sm:$0x3] }
 0x217   : > { %v6709_v41 = vadd.f32 %v6708_v29, %v6639_v33  ;;  %v2130_v29 = vcombine.high %v2128_v16, %v2128_v16  ;;  %v936_v33 = vld [vmem:[%s18067_s8 + $0x12e0] sm:$0x3]  ;;  %v938_v35 = vld [vmem:[%s18067_s8 + $0x12f0] sm:$0x3] }
 0x218   : > { %v17221_v49 = vpack.c.bf16 %v938_v35, %v554_v34 }
 0x219   : > { %10417 = vmatmul.mubr.f32.vlgmr.msra.gmra.mrb[102].mxu0 %v2070_v2  ;;  %v2112_v2 = vcombine.high %v2104_v51, %v2104_v51 }
 0x21a   : > { %10487 = vmatmul.mubr.f32.vlgmr.msra.gmra.mrb[102].mxu1 %v2077_v7  ;;  %17194 = vmatpush1.bf16.xpose.msra.mxu0 %v17193_v39  ;;  %v548_v7 = vld [vmem:[%s18067_s8 + $0x6c0] sm:$0xff]  ;;  %v557_v39 = vld [vmem:[%s18067_s8 + $0x708] sm:$0xff] }
 0x21b   : > { %17198 = vmatpush1.bf16.xpose.msra.mxu1 %v17197_v40  ;;  %10556 = vmatprep.mubr.f32.mxu0 %v2095_v42  ;;  %v17209_v23 = vpack.c.bf16 %v932_v8, %v548_v7  ;;  %v941_v40 = vld [vmem:[%s18067_s8 + $0x1308] sm:$0x3] }
 0x21c   : > { %17200 = vmatprep.subr.bf16.mxu0 %v17199_v43  ;;  %v6778_v52 = vpop.f32.mrb[50].mxu0  ;;  %10626 = vmatprep.mubr.f32.mxu1 %v2096_v44  ;;  %v293_v7 = vld [vmem:[%s18060_s10 + $0x1c8] sm:$0xff] }
 0x21d   : > { %v6848_v53 = vpop.f32.mrb[50].mxu1  ;;  %17204 = vmatprep.subr.bf16.mxu1 %v17203_v45  ;;  %v6779_v57 = vadd.f32 %v6778_v52, %v6709_v41  ;;  %v6780_v58 = vpop.f32.mrb[51].mxu0  ;;  %v2145_v41 = vrot.slane %v2131_v31, %v18092_v25  ;;  %v559_v45 = vld [vmem:[%s18067_s8 + $0x718] sm:$0xff]  ;;  %v17223_v52 = vpack.c.bf16 %v941_v40, %v557_v39  ;;  %v2165_v15 = vcombine.high %v293_v7, %v293_v7 }
 0x21e   : > { %v6850_v59 = vpop.f32.mrb[51].mxu1  ;;  %v17227_v54 = vpack.c.bf16 %v943_v46, %v559_v45  ;;  %v558_v58 = vld [vmem:[%s18067_s8 + $0x710] sm:$0xff]  ;;  %v2172_v20 = vrot.slane %v293_v7, %v18092_v25  ;;  %v951_v31 = vld [vmem:[%s18067_s8 + $0x1358] sm:$0x3] }
 0x21f   : > { %v6849_v1 = vadd.f32 %v6848_v53, %v6779_v57  ;;  %v2147_v53 = vcombine.high %v2145_v41, %v2145_v41  ;;  %v940_v57 = vld [vmem:[%s18067_s8 + $0x1300] sm:$0x3]  ;;  %v942_v59 = vld [vmem:[%s18067_s8 + $0x1310] sm:$0x3] }
 0x220   : > { %v17229_v9 = vpack.c.bf16 %v942_v59, %v558_v58 }
 0x221   : > { %10557 = vmatmul.mubr.f32.vlgmr.msra.gmra.mrb[104].mxu0 %v2087_v27  ;;  %v2129_v27 = vcombine.high %v2121_v11, %v2121_v11 }
 0x222   : > { %10627 = vmatmul.mubr.f32.vlgmr.msra.gmra.mrb[104].mxu1 %v2094_v32  ;;  %17202 = vmatpush1.bf16.xpose.msra.mxu0 %v17201_v63  ;;  %v552_v32 = vld [vmem:[%s18067_s8 + $0x6e0] sm:$0xff]  ;;  %v561_v63 = vld [vmem:[%s18067_s8 + $0x728] sm:$0xff] }
 0x223   : > { %17206 = vmatpush1.bf16.xpose.msra.mxu1 %v17205_v0  ;;  %10696 = vmatprep.mubr.f32.mxu0 %v2112_v2  ;;  %v17217_v48 = vpack.c.bf16 %v936_v33, %v552_v32  ;;  %v945_v0 = vld [vmem:[%s18067_s8 + $0x1328] sm:$0x3]  ;;  %v294_v32 = vld [vmem:[%s18060_s10 + $0x1d0] sm:$0xff] }
 0x224   : > { %17208 = vmatprep.subr.bf16.mxu0 %v17207_v3  ;;  %v6918_v12 = vpop.f32.mrb[52].mxu0  ;;  %10766 = vmatprep.mubr.f32.mxu1 %v2113_v4  ;;  %v2182_v40 = vcombine.high %v294_v32, %v294_v32  ;;  %v2189_v45 = vrot.slane %v294_v32, %v18092_v25 }
 0x225   : > { %v6988_v13 = vpop.f32.mrb[52].mxu1  ;;  %17212 = vmatprep.subr.bf16.mxu1 %v17211_v5  ;;  %v6919_v17 = vadd.f32 %v6918_v12, %v6849_v1  ;;  %v6920_v18 = vpop.f32.mrb[53].mxu0  ;;  %v2162_v1 = vrot.slane %v2148_v55, %v18092_v25  ;;  %v563_v5 = vld [vmem:[%s18067_s8 + $0x738] sm:$0xff]  ;;  %v17231_v12 = vpack.c.bf16 %v945_v0, %v561_v63 }
 0x226   : > { %v6990_v19 = vpop.f32.mrb[53].mxu1  ;;  %v17235_v14 = vpack.c.bf16 %v947_v6, %v563_v5  ;;  %v562_v18 = vld [vmem:[%s18067_s8 + $0x730] sm:$0xff]  ;;  %v955_v55 = vld [vmem:[%s18067_s8 + $0x1378] sm:$0x3] }
 0x227   : > { %v6989_v26 = vadd.f32 %v6988_v13, %v6919_v17  ;;  %v2164_v13 = vcombine.high %v2162_v1, %v2162_v1  ;;  %v944_v17 = vld [vmem:[%s18067_s8 + $0x1320] sm:$0x3]  ;;  %v946_v19 = vld [vmem:[%s18067_s8 + $0x1330] sm:$0x3] }
 0x228   : > { %v17237_v34 = vpack.c.bf16 %v946_v19, %v562_v18 }
 0x229   : > { %10697 = vmatmul.mubr.f32.vlgmr.msra.gmra.mrb[106].mxu0 %v2104_v51  ;;  %v2146_v51 = vcombine.high %v2138_v36, %v2138_v36 }
 0x22a   : > { %10767 = vmatmul.mubr.f32.vlgmr.msra.gmra.mrb[106].mxu1 %v2111_v56  ;;  %17210 = vmatpush1.bf16.xpose.msra.mxu0 %v17209_v23  ;;  %v556_v56 = vld [vmem:[%s18067_s8 + $0x700] sm:$0xff]  ;;  %v565_v23 = vld [vmem:[%s18067_s8 + $0x748] sm:$0xff] }
 0x22b   : > { %17214 = vmatpush1.bf16.xpose.msra.mxu1 %v17213_v24  ;;  %10836 = vmatprep.mubr.f32.mxu0 %v2129_v27  ;;  %v17225_v8 = vpack.c.bf16 %v940_v57, %v556_v56  ;;  %v949_v24 = vld [vmem:[%s18067_s8 + $0x1348] sm:$0x3]  ;;  %v295_v56 = vld [vmem:[%s18060_s10 + $0x1d8] sm:$0xff] }
 0x22c   : > { %17216 = vmatprep.subr.bf16.mxu0 %v17215_v28  ;;  %v7058_v37 = vpop.f32.mrb[54].mxu0  ;;  %10906 = vmatprep.mubr.f32.mxu1 %v2130_v29  ;;  %v2199_v0 = vcombine.high %v295_v56, %v295_v56  ;;  %v2206_v5 = vrot.slane %v295_v56, %v18092_v25 }
 0x22d   : > { %v7128_v38 = vpop.f32.mrb[54].mxu1  ;;  %17220 = vmatprep.subr.bf16.mxu1 %v17219_v30  ;;  %v7059_v42 = vadd.f32 %v7058_v37, %v6989_v26  ;;  %v7060_v43 = vpop.f32.mrb[55].mxu0  ;;  %v2179_v26 = vrot.slane %v2165_v15, %v18092_v25  ;;  %v567_v30 = vld [vmem:[%s18067_s8 + $0x758] sm:$0xff]  ;;  %v17239_v37 = vpack.c.bf16 %v949_v24, %v565_v23 }
 0x22e   : > { %v7130_v44 = vpop.f32.mrb[55].mxu1  ;;  %v17243_v39 = vpack.c.bf16 %v951_v31, %v567_v30  ;;  %v566_v43 = vld [vmem:[%s18067_s8 + $0x750] sm:$0xff]  ;;  %v959_v15 = vld [vmem:[%s18067_s8 + $0x1398] sm:$0x3] }
 0x22f   : > { %v7129_v50 = vadd.f32 %v7128_v38, %v7059_v42  ;;  %v2181_v38 = vcombine.high %v2179_v26, %v2179_v26  ;;  %v948_v42 = vld [vmem:[%s18067_s8 + $0x1340] sm:$0x3]  ;;  %v950_v44 = vld [vmem:[%s18067_s8 + $0x1350] sm:$0x3] }
 0x230   : > { %v17245_v58 = vpack.c.bf16 %v950_v44, %v566_v43 }
 0x231   : > { %10837 = vmatmul.mubr.f32.vlgmr.msra.gmra.mrb[108].mxu0 %v2121_v11  ;;  %v2163_v11 = vcombine.high %v2155_v60, %v2155_v60 }
 0x232   : > { %10907 = vmatmul.mubr.f32.vlgmr.msra.gmra.mrb[108].mxu1 %v2128_v16  ;;  %17218 = vmatpush1.bf16.xpose.msra.mxu0 %v17217_v48  ;;  %v560_v16 = vld [vmem:[%s18067_s8 + $0x720] sm:$0xff]  ;;  %v569_v48 = vld [vmem:[%s18067_s8 + $0x768] sm:$0xff] }
 0x233   : > { %17222 = vmatpush1.bf16.xpose.msra.mxu1 %v17221_v49  ;;  %10976 = vmatprep.mubr.f32.mxu0 %v2146_v51  ;;  %v17233_v33 = vpack.c.bf16 %v944_v17, %v560_v16  ;;  %v953_v49 = vld [vmem:[%s18067_s8 + $0x1368] sm:$0x3]  ;;  %v296_v16 = vld [vmem:[%s18060_s10 + $0x1e0] sm:$0xff] }
 0x234   : > { %17224 = vmatprep.subr.bf16.mxu0 %v17223_v52  ;;  %v7198_v61 = vpop.f32.mrb[56].mxu0  ;;  %11046 = vmatprep.mubr.f32.mxu1 %v2147_v53  ;;  %v2216_v24 = vcombine.high %v296_v16, %v296_v16  ;;  %v2223_v30 = vrot.slane %v296_v16, %v18092_v25 }
 0x235   : > { %v7268_v62 = vpop.f32.mrb[56].mxu1  ;;  %17228 = vmatprep.subr.bf16.mxu1 %v17227_v54  ;;  %v7199_v2 = vadd.f32 %v7198_v61, %v7129_v50  ;;  %v7200_v3 = vpop.f32.mrb[57].mxu0  ;;  %v2196_v50 = vrot.slane %v2182_v40, %v18092_v25  ;;  %v571_v54 = vld [vmem:[%s18067_s8 + $0x778] sm:$0xff]  ;;  %v17247_v61 = vpack.c.bf16 %v953_v49, %v569_v48 }
 0x236   : > { %v7270_v4 = vpop.f32.mrb[57].mxu1  ;;  %v17251_v63 = vpack.c.bf16 %v955_v55, %v571_v54  ;;  %v570_v3 = vld [vmem:[%s18067_s8 + $0x770] sm:$0xff]  ;;  %v963_v40 = vld [vmem:[%s18067_s8 + $0x13b8] sm:$0x3] }
 0x237   : > { %v7269_v10 = vadd.f32 %v7268_v62, %v7199_v2  ;;  %v2198_v62 = vcombine.high %v2196_v50, %v2196_v50  ;;  %v952_v2 = vld [vmem:[%s18067_s8 + $0x1360] sm:$0x3]  ;;  %v954_v4 = vld [vmem:[%s18067_s8 + $0x1370] sm:$0x3] }
 0x238   : > { %v17253_v18 = vpack.c.bf16 %v954_v4, %v570_v3 }
 0x239   : > { %10977 = vmatmul.mubr.f32.vlgmr.msra.gmra.mrb[110].mxu0 %v2138_v36  ;;  %v2180_v36 = vcombine.high %v2172_v20, %v2172_v20 }
 0x23a   : > { %11047 = vmatmul.mubr.f32.vlgmr.msra.gmra.mrb[110].mxu1 %v2145_v41  ;;  %17226 = vmatpush1.bf16.xpose.msra.mxu0 %v17225_v8  ;;  %v564_v41 = vld [vmem:[%s18067_s8 + $0x740] sm:$0xff]  ;;  %v573_v8 = vld [vmem:[%s18067_s8 + $0x788] sm:$0xff] }
 0x23b   : > { %17230 = vmatpush1.bf16.xpose.msra.mxu1 %v17229_v9  ;;  %11116 = vmatprep.mubr.f32.mxu0 %v2163_v11  ;;  %v17241_v57 = vpack.c.bf16 %v948_v42, %v564_v41  ;;  %v957_v9 = vld [vmem:[%s18067_s8 + $0x1388] sm:$0x3] }
 0x23c   : > { %17232 = vmatprep.subr.bf16.mxu0 %v17231_v12  ;;  %v7338_v21 = vpop.f32.mrb[58].mxu0  ;;  %11186 = vmatprep.mubr.f32.mxu1 %v2164_v13  ;;  %v297_v41 = vld [vmem:[%s18060_s10 + $0x1e8] sm:$0xff] }
 0x23d   : > { %v7408_v22 = vpop.f32.mrb[58].mxu1  ;;  %17236 = vmatprep.subr.bf16.mxu1 %v17235_v14  ;;  %v7339_v27 = vadd.f32 %v7338_v21, %v7269_v10  ;;  %v7340_v28 = vpop.f32.mrb[59].mxu0  ;;  %v2213_v10 = vrot.slane %v2199_v0, %v18092_v25  ;;  %v575_v14 = vld [vmem:[%s18067_s8 + $0x798] sm:$0xff]  ;;  %v17255_v21 = vpack.c.bf16 %v957_v9, %v573_v8  ;;  %v2233_v49 = vcombine.high %v297_v41, %v297_v41 }
 0x23e   : > { %v7410_v29 = vpop.f32.mrb[59].mxu1  ;;  %v17259_v23 = vpack.c.bf16 %v959_v15, %v575_v14  ;;  %v574_v28 = vld [vmem:[%s18067_s8 + $0x790] sm:$0xff]  ;;  %v2240_v54 = vrot.slane %v297_v41, %v18092_v25  ;;  %v967_v0 = vld [vmem:[%s18067_s8 + $0x13d8] sm:$0x3] }
 0x23f   : > { %v7409_v35 = vadd.f32 %v7408_v22, %v7339_v27  ;;  %v2215_v22 = vcombine.high %v2213_v10, %v2213_v10  ;;  %v956_v27 = vld [vmem:[%s18067_s8 + $0x1380] sm:$0x3]  ;;  %v958_v29 = vld [vmem:[%s18067_s8 + $0x1390] sm:$0x3] }
 0x240   : > { %v17261_v43 = vpack.c.bf16 %v958_v29, %v574_v28 }
 0x241   : > { %11117 = vmatmul.mubr.f32.vlgmr.msra.gmra.mrb[112].mxu0 %v2155_v60  ;;  %v2197_v60 = vcombine.high %v2189_v45, %v2189_v45 }
 0x242   : > { %11187 = vmatmul.mubr.f32.vlgmr.msra.gmra.mrb[112].mxu1 %v2162_v1  ;;  %17234 = vmatpush1.bf16.xpose.msra.mxu0 %v17233_v33  ;;  %v568_v1 = vld [vmem:[%s18067_s8 + $0x760] sm:$0xff]  ;;  %v577_v33 = vld [vmem:[%s18067_s8 + $0x7a8] sm:$0xff] }
 0x243   : > { %17238 = vmatpush1.bf16.xpose.msra.mxu1 %v17237_v34  ;;  %11256 = vmatprep.mubr.f32.mxu0 %v2180_v36  ;;  %v17249_v17 = vpack.c.bf16 %v952_v2, %v568_v1  ;;  %v961_v34 = vld [vmem:[%s18067_s8 + $0x13a8] sm:$0x3]  ;;  %v298_v1 = vld [vmem:[%s18060_s10 + $0x1f0] sm:$0xff] }
 0x244   : > { %17240 = vmatprep.subr.bf16.mxu0 %v17239_v37  ;;  %v7478_v46 = vpop.f32.mrb[60].mxu0  ;;  %11326 = vmatprep.mubr.f32.mxu1 %v2181_v38  ;;  %v2250_v9 = vcombine.high %v298_v1, %v298_v1  ;;  %v2257_v14 = vrot.slane %v298_v1, %v18092_v25 }
 0x245   : > { %v7548_v47 = vpop.f32.mrb[60].mxu1  ;;  %17244 = vmatprep.subr.bf16.mxu1 %v17243_v39  ;;  %v7479_v51 = vadd.f32 %v7478_v46, %v7409_v35  ;;  %v7480_v52 = vpop.f32.mrb[61].mxu0  ;;  %v2230_v35 = vrot.slane %v2216_v24, %v18092_v25  ;;  %v579_v39 = vld [vmem:[%s18067_s8 + $0x7b8] sm:$0xff]  ;;  %v17263_v46 = vpack.c.bf16 %v961_v34, %v577_v33 }
 0x246   : > { %v7550_v53 = vpop.f32.mrb[61].mxu1  ;;  %v17267_v48 = vpack.c.bf16 %v963_v40, %v579_v39  ;;  %v578_v52 = vld [vmem:[%s18067_s8 + $0x7b0] sm:$0xff]  ;;  %v971_v24 = vld [vmem:[%s18067_s8 + $0x13f8] sm:$0x3] }
 0x247   : > { %v7549_v59 = vadd.f32 %v7548_v47, %v7479_v51  ;;  %v2232_v47 = vcombine.high %v2230_v35, %v2230_v35  ;;  %v960_v51 = vld [vmem:[%s18067_s8 + $0x13a0] sm:$0x3]  ;;  %v962_v53 = vld [vmem:[%s18067_s8 + $0x13b0] sm:$0x3] }
 0x248   : > { %v17269_v3 = vpack.c.bf16 %v962_v53, %v578_v52 }
 0x249   : > { %11257 = vmatmul.mubr.f32.vlgmr.msra.gmra.mrb[114].mxu0 %v2172_v20  ;;  %v2214_v20 = vcombine.high %v2206_v5, %v2206_v5 }
 0x24a   : > { %11327 = vmatmul.mubr.f32.vlgmr.msra.gmra.mrb[114].mxu1 %v2179_v26  ;;  %17242 = vmatpush1.bf16.xpose.msra.mxu0 %v17241_v57  ;;  %v572_v26 = vld [vmem:[%s18067_s8 + $0x780] sm:$0xff]  ;;  %v581_v57 = vld [vmem:[%s18067_s8 + $0x7c8] sm:$0xff] }
 0x24b   : > { %17246 = vmatpush1.bf16.xpose.msra.mxu1 %v17245_v58  ;;  %11396 = vmatprep.mubr.f32.mxu0 %v2197_v60  ;;  %v17257_v42 = vpack.c.bf16 %v956_v27, %v572_v26  ;;  %v965_v58 = vld [vmem:[%s18067_s8 + $0x13c8] sm:$0x3]  ;;  %v299_v26 = vld [vmem:[%s18060_s10 + $0x1f8] sm:$0xff] }
 0x24c   : > { %17248 = vmatprep.subr.bf16.mxu0 %v17247_v61  ;;  %v7618_v6 = vpop.f32.mrb[62].mxu0  ;;  %11466 = vmatprep.mubr.f32.mxu1 %v2198_v62  ;;  %v2267_v34 = vcombine.high %v299_v26, %v299_v26  ;;  %v2274_v39 = vrot.slane %v299_v26, %v18092_v25 }
 0x24d   : > { %v7688_v7 = vpop.f32.mrb[62].mxu1  ;;  %17252 = vmatprep.subr.bf16.mxu1 %v17251_v63  ;;  %v7619_v11 = vadd.f32 %v7618_v6, %v7549_v59  ;;  %v7620_v12 = vpop.f32.mrb[63].mxu0  ;;  %v2247_v59 = vrot.slane %v2233_v49, %v18092_v25  ;;  %v583_v63 = vld [vmem:[%s18067_s8 + $0x7d8] sm:$0xff]  ;;  %v17271_v6 = vpack.c.bf16 %v965_v58, %v581_v57 }
 0x24e   : > { %v7690_v13 = vpop.f32.mrb[63].mxu1  ;;  %v17275_v8 = vpack.c.bf16 %v967_v0, %v583_v63  ;;  %v582_v12 = vld [vmem:[%s18067_s8 + $0x7d0] sm:$0xff]  ;;  %v975_v49 = vld [vmem:[%s18067_s8 + $0x1418] sm:$0x3] }
 0x24f   : > { %v7689_v19 = vadd.f32 %v7688_v7, %v7619_v11  ;;  %v2249_v7 = vcombine.high %v2247_v59, %v2247_v59  ;;  %v964_v11 = vld [vmem:[%s18067_s8 + $0x13c0] sm:$0x3]  ;;  %v966_v13 = vld [vmem:[%s18067_s8 + $0x13d0] sm:$0x3] }
 0x250   : > { %v17277_v28 = vpack.c.bf16 %v966_v13, %v582_v12 }
 0x251   : > { %11397 = vmatmul.mubr.f32.vlgmr.msra.gmra.mrb[116].mxu0 %v2189_v45  ;;  %v2231_v45 = vcombine.high %v2223_v30, %v2223_v30 }
 0x252   : > { %11467 = vmatmul.mubr.f32.vlgmr.msra.gmra.mrb[116].mxu1 %v2196_v50  ;;  %17250 = vmatpush1.bf16.xpose.msra.mxu0 %v17249_v17  ;;  %v576_v50 = vld [vmem:[%s18067_s8 + $0x7a0] sm:$0xff]  ;;  %v585_v17 = vld [vmem:[%s18067_s8 + $0x7e8] sm:$0xff] }
 0x253   : > { %17254 = vmatpush1.bf16.xpose.msra.mxu1 %v17253_v18  ;;  %11536 = vmatprep.mubr.f32.mxu0 %v2214_v20  ;;  %v17265_v2 = vpack.c.bf16 %v960_v51, %v576_v50  ;;  %v969_v18 = vld [vmem:[%s18067_s8 + $0x13e8] sm:$0x3]  ;;  %v300_v50 = vld [vmem:[%s18060_s10 + $0x200] sm:$0xff] }
 0x254   : > { %17256 = vmatprep.subr.bf16.mxu0 %v17255_v21  ;;  %v7758_v31 = vpop.f32.mrb[64].mxu0  ;;  %11606 = vmatprep.mubr.f32.mxu1 %v2215_v22  ;;  %v2284_v58 = vcombine.high %v300_v50, %v300_v50  ;;  %v2291_v63 = vrot.slane %v300_v50, %v18092_v25 }
 0x255   : > { %v7828_v32 = vpop.f32.mrb[64].mxu1  ;;  %17260 = vmatprep.subr.bf16.mxu1 %v17259_v23  ;;  %v7759_v36 = vadd.f32 %v7758_v31, %v7689_v19  ;;  %v7760_v37 = vpop.f32.mrb[65].mxu0  ;;  %v2264_v19 = vrot.slane %v2250_v9, %v18092_v25  ;;  %v587_v23 = vld [vmem:[%s18067_s8 + $0x7f8] sm:$0xff]  ;;  %v17279_v31 = vpack.c.bf16 %v969_v18, %v585_v17 }
 0x256   : > { %v7830_v38 = vpop.f32.mrb[65].mxu1  ;;  %v17283_v33 = vpack.c.bf16 %v971_v24, %v587_v23  ;;  %v586_v37 = vld [vmem:[%s18067_s8 + $0x7f0] sm:$0xff]  ;;  %v979_v9 = vld [vmem:[%s18067_s8 + $0x1438] sm:$0x3] }
 0x257   : > { %v7829_v44 = vadd.f32 %v7828_v32, %v7759_v36  ;;  %v2266_v32 = vcombine.high %v2264_v19, %v2264_v19  ;;  %v968_v36 = vld [vmem:[%s18067_s8 + $0x13e0] sm:$0x3]  ;;  %v970_v38 = vld [vmem:[%s18067_s8 + $0x13f0] sm:$0x3] }
 0x258   : > { %v17285_v52 = vpack.c.bf16 %v970_v38, %v586_v37 }
 0x259   : > { %11537 = vmatmul.mubr.f32.vlgmr.msra.gmra.mrb[118].mxu0 %v2206_v5  ;;  %v2248_v5 = vcombine.high %v2240_v54, %v2240_v54 }
 0x25a   : > { %11607 = vmatmul.mubr.f32.vlgmr.msra.gmra.mrb[118].mxu1 %v2213_v10  ;;  %17258 = vmatpush1.bf16.xpose.msra.mxu0 %v17257_v42  ;;  %v580_v10 = vld [vmem:[%s18067_s8 + $0x7c0] sm:$0xff]  ;;  %v589_v42 = vld [vmem:[%s18067_s8 + $0x808] sm:$0xff] }
 0x25b   : > { %17262 = vmatpush1.bf16.xpose.msra.mxu1 %v17261_v43  ;;  %11676 = vmatprep.mubr.f32.mxu0 %v2231_v45  ;;  %v17273_v27 = vpack.c.bf16 %v964_v11, %v580_v10  ;;  %v973_v43 = vld [vmem:[%s18067_s8 + $0x1408] sm:$0x3] }
 0x25c   : > { %17264 = vmatprep.subr.bf16.mxu0 %v17263_v46  ;;  %v7898_v55 = vpop.f32.mrb[66].mxu0  ;;  %11746 = vmatprep.mubr.f32.mxu1 %v2232_v47  ;;  %v301_v10 = vld [vmem:[%s18060_s10 + $0x208] sm:$0xff] }
 0x25d   : > { %v7968_v56 = vpop.f32.mrb[66].mxu1  ;;  %17268 = vmatprep.subr.bf16.mxu1 %v17267_v48  ;;  %v7899_v60 = vadd.f32 %v7898_v55, %v7829_v44  ;;  %v7900_v61 = vpop.f32.mrb[67].mxu0  ;;  %v2281_v44 = vrot.slane %v2267_v34, %v18092_v25  ;;  %v591_v48 = vld [vmem:[%s18067_s8 + $0x818] sm:$0xff]  ;;  %v17287_v55 = vpack.c.bf16 %v973_v43, %v589_v42  ;;  %v2301_v18 = vcombine.high %v301_v10, %v301_v10 }
 0x25e   : > { %v7970_v62 = vpop.f32.mrb[67].mxu1  ;;  %v17291_v57 = vpack.c.bf16 %v975_v49, %v591_v48  ;;  %v590_v61 = vld [vmem:[%s18067_s8 + $0x810] sm:$0xff]  ;;  %v2308_v23 = vrot.slane %v301_v10, %v18092_v25  ;;  %v983_v34 = vld [vmem:[%s18067_s8 + $0x1458] sm:$0x3] }
 0x25f   : > { %v7969_v4 = vadd.f32 %v7968_v56, %v7899_v60  ;;  %v2283_v56 = vcombine.high %v2281_v44, %v2281_v44  ;;  %v972_v60 = vld [vmem:[%s18067_s8 + $0x1400] sm:$0x3]  ;;  %v974_v62 = vld [vmem:[%s18067_s8 + $0x1410] sm:$0x3] }
 0x260   : > { %v17293_v12 = vpack.c.bf16 %v974_v62, %v590_v61 }
 0x261   : > { %11677 = vmatmul.mubr.f32.vlgmr.msra.gmra.mrb[120].mxu0 %v2223_v30  ;;  %v2265_v30 = vcombine.high %v2257_v14, %v2257_v14 }
 0x262   : > { %11747 = vmatmul.mubr.f32.vlgmr.msra.gmra.mrb[120].mxu1 %v2230_v35  ;;  %17266 = vmatpush1.bf16.xpose.msra.mxu0 %v17265_v2  ;;  %v584_v35 = vld [vmem:[%s18067_s8 + $0x7e0] sm:$0xff]  ;;  %v593_v2 = vld [vmem:[%s18067_s8 + $0x828] sm:$0xff] }
 0x263   : > { %17270 = vmatpush1.bf16.xpose.msra.mxu1 %v17269_v3  ;;  %11816 = vmatprep.mubr.f32.mxu0 %v2248_v5  ;;  %v17281_v51 = vpack.c.bf16 %v968_v36, %v584_v35  ;;  %v977_v3 = vld [vmem:[%s18067_s8 + $0x1428] sm:$0x3]  ;;  %v302_v35 = vld [vmem:[%s18060_s10 + $0x210] sm:$0xff] }
 0x264   : > { %17272 = vmatprep.subr.bf16.mxu0 %v17271_v6  ;;  %v8038_v15 = vpop.f32.mrb[68].mxu0  ;;  %11886 = vmatprep.mubr.f32.mxu1 %v2249_v7  ;;  %v2318_v43 = vcombine.high %v302_v35, %v302_v35  ;;  %v2325_v48 = vrot.slane %v302_v35, %v18092_v25 }
 0x265   : > { %v8108_v16 = vpop.f32.mrb[68].mxu1  ;;  %17276 = vmatprep.subr.bf16.mxu1 %v17275_v8  ;;  %v8039_v20 = vadd.f32 %v8038_v15, %v7969_v4  ;;  %v8040_v21 = vpop.f32.mrb[69].mxu0  ;;  %v2298_v4 = vrot.slane %v2284_v58, %v18092_v25  ;;  %v595_v8 = vld [vmem:[%s18067_s8 + $0x838] sm:$0xff]  ;;  %v17295_v15 = vpack.c.bf16 %v977_v3, %v593_v2 }
 0x266   : > { %v8110_v22 = vpop.f32.mrb[69].mxu1  ;;  %v17299_v17 = vpack.c.bf16 %v979_v9, %v595_v8  ;;  %v594_v21 = vld [vmem:[%s18067_s8 + $0x830] sm:$0xff]  ;;  %v987_v58 = vld [vmem:[%s18067_s8 + $0x1478] sm:$0x3] }
 0x267   : > { %v8109_v29 = vadd.f32 %v8108_v16, %v8039_v20  ;;  %v2300_v16 = vcombine.high %v2298_v4, %v2298_v4  ;;  %v976_v20 = vld [vmem:[%s18067_s8 + $0x1420] sm:$0x3]  ;;  %v978_v22 = vld [vmem:[%s18067_s8 + $0x1430] sm:$0x3] }
 0x268   : > { %v17301_v37 = vpack.c.bf16 %v978_v22, %v594_v21 }
 0x269   : > { %11817 = vmatmul.mubr.f32.vlgmr.msra.gmra.mrb[122].mxu0 %v2240_v54  ;;  %v2282_v54 = vcombine.high %v2274_v39, %v2274_v39 }
 0x26a   : > { %11887 = vmatmul.mubr.f32.vlgmr.msra.gmra.mrb[122].mxu1 %v2247_v59  ;;  %17274 = vmatpush1.bf16.xpose.msra.mxu0 %v17273_v27  ;;  %v588_v59 = vld [vmem:[%s18067_s8 + $0x800] sm:$0xff]  ;;  %v597_v27 = vld [vmem:[%s18067_s8 + $0x848] sm:$0xff] }
 0x26b   : > { %17278 = vmatpush1.bf16.xpose.msra.mxu1 %v17277_v28  ;;  %11956 = vmatprep.mubr.f32.mxu0 %v2265_v30  ;;  %v17289_v11 = vpack.c.bf16 %v972_v60, %v588_v59  ;;  %v981_v28 = vld [vmem:[%s18067_s8 + $0x1448] sm:$0x3]  ;;  %v303_v59 = vld [vmem:[%s18060_s10 + $0x218] sm:$0xff] }
 0x26c   : > { %17280 = vmatprep.subr.bf16.mxu0 %v17279_v31  ;;  %v8178_v40 = vpop.f32.mrb[70].mxu0  ;;  %12026 = vmatprep.mubr.f32.mxu1 %v2266_v32  ;;  %v2335_v3 = vcombine.high %v303_v59, %v303_v59  ;;  %v2342_v8 = vrot.slane %v303_v59, %v18092_v25 }
 0x26d   : > { %v8248_v41 = vpop.f32.mrb[70].mxu1  ;;  %17284 = vmatprep.subr.bf16.mxu1 %v17283_v33  ;;  %v8179_v45 = vadd.f32 %v8178_v40, %v8109_v29  ;;  %v8180_v46 = vpop.f32.mrb[71].mxu0  ;;  %v2315_v29 = vrot.slane %v2301_v18, %v18092_v25  ;;  %v599_v33 = vld [vmem:[%s18067_s8 + $0x858] sm:$0xff]  ;;  %v17303_v40 = vpack.c.bf16 %v981_v28, %v597_v27 }
 0x26e   : > { %v8250_v47 = vpop.f32.mrb[71].mxu1  ;;  %v17307_v42 = vpack.c.bf16 %v983_v34, %v599_v33  ;;  %v598_v46 = vld [vmem:[%s18067_s8 + $0x850] sm:$0xff]  ;;  %v991_v18 = vld [vmem:[%s18067_s8 + $0x1498] sm:$0x3] }
 0x26f   : > { %v8249_v53 = vadd.f32 %v8248_v41, %v8179_v45  ;;  %v2317_v41 = vcombine.high %v2315_v29, %v2315_v29  ;;  %v980_v45 = vld [vmem:[%s18067_s8 + $0x1440] sm:$0x3]  ;;  %v982_v47 = vld [vmem:[%s18067_s8 + $0x1450] sm:$0x3] }
 0x270   : > { %v17309_v61 = vpack.c.bf16 %v982_v47, %v598_v46 }
 0x271   : > { %11957 = vmatmul.mubr.f32.vlgmr.msra.gmra.mrb[124].mxu0 %v2257_v14  ;;  %v2299_v14 = vcombine.high %v2291_v63, %v2291_v63 }
 0x272   : > { %12027 = vmatmul.mubr.f32.vlgmr.msra.gmra.mrb[124].mxu1 %v2264_v19  ;;  %17282 = vmatpush1.bf16.xpose.msra.mxu0 %v17281_v51  ;;  %v592_v19 = vld [vmem:[%s18067_s8 + $0x820] sm:$0xff]  ;;  %v601_v51 = vld [vmem:[%s18067_s8 + $0x868] sm:$0xff] }
 0x273   : > { %17286 = vmatpush1.bf16.xpose.msra.mxu1 %v17285_v52  ;;  %12096 = vmatprep.mubr.f32.mxu0 %v2282_v54  ;;  %v17297_v36 = vpack.c.bf16 %v976_v20, %v592_v19  ;;  %v985_v52 = vld [vmem:[%s18067_s8 + $0x1468] sm:$0x3]  ;;  %v304_v19 = vld [vmem:[%s18060_s10 + $0x220] sm:$0xff] }
 0x274   : > { %17288 = vmatprep.subr.bf16.mxu0 %v17287_v55  ;;  %v8318_v0 = vpop.f32.mrb[72].mxu0  ;;  %12166 = vmatprep.mubr.f32.mxu1 %v2283_v56  ;;  %v2352_v28 = vcombine.high %v304_v19, %v304_v19  ;;  %v2359_v33 = vrot.slane %v304_v19, %v18092_v25 }
 0x275   : > { %v8388_v1 = vpop.f32.mrb[72].mxu1  ;;  %17292 = vmatprep.subr.bf16.mxu1 %v17291_v57  ;;  %v8319_v5 = vadd.f32 %v8318_v0, %v8249_v53  ;;  %v8320_v6 = vpop.f32.mrb[73].mxu0  ;;  %v2332_v53 = vrot.slane %v2318_v43, %v18092_v25  ;;  %v603_v57 = vld [vmem:[%s18067_s8 + $0x878] sm:$0xff]  ;;  %v17311_v0 = vpack.c.bf16 %v985_v52, %v601_v51 }
 0x276   : > { %v8390_v7 = vpop.f32.mrb[73].mxu1  ;;  %v17315_v2 = vpack.c.bf16 %v987_v58, %v603_v57  ;;  %v602_v6 = vld [vmem:[%s18067_s8 + $0x870] sm:$0xff]  ;;  %v995_v43 = vld [vmem:[%s18067_s8 + $0x14b8] sm:$0x3] }
 0x277   : > { %v8389_v13 = vadd.f32 %v8388_v1, %v8319_v5  ;;  %v2334_v1 = vcombine.high %v2332_v53, %v2332_v53  ;;  %v984_v5 = vld [vmem:[%s18067_s8 + $0x1460] sm:$0x3]  ;;  %v986_v7 = vld [vmem:[%s18067_s8 + $0x1470] sm:$0x3] }
 0x278   : > { %v17317_v21 = vpack.c.bf16 %v986_v7, %v602_v6 }
 0x279   : > { %12097 = vmatmul.mubr.f32.vlgmr.msra.gmra.mrb[126].mxu0 %v2274_v39  ;;  %v2316_v39 = vcombine.high %v2308_v23, %v2308_v23 }
 0x27a   : > { %12167 = vmatmul.mubr.f32.vlgmr.msra.gmra.mrb[126].mxu1 %v2281_v44  ;;  %17290 = vmatpush1.bf16.xpose.msra.mxu0 %v17289_v11  ;;  %v596_v44 = vld [vmem:[%s18067_s8 + $0x840] sm:$0xff]  ;;  %v605_v11 = vld [vmem:[%s18067_s8 + $0x888] sm:$0xff] }
 0x27b   : > { %17294 = vmatpush1.bf16.xpose.msra.mxu1 %v17293_v12  ;;  %12236 = vmatprep.mubr.f32.mxu0 %v2299_v14  ;;  %v17305_v60 = vpack.c.bf16 %v980_v45, %v596_v44  ;;  %v989_v12 = vld [vmem:[%s18067_s8 + $0x1488] sm:$0x3] }
 0x27c   : > { %17296 = vmatprep.subr.bf16.mxu0 %v17295_v15  ;;  %v8458_v24 = vpop.f32.mrb[74].mxu0  ;;  %12306 = vmatprep.mubr.f32.mxu1 %v2300_v16  ;;  %v305_v44 = vld [vmem:[%s18060_s10 + $0x228] sm:$0xff] }
 0x27d   : > { %v8528_v26 = vpop.f32.mrb[74].mxu1  ;;  %17300 = vmatprep.subr.bf16.mxu1 %v17299_v17  ;;  %v8459_v30 = vadd.f32 %v8458_v24, %v8389_v13  ;;  %v8460_v31 = vpop.f32.mrb[75].mxu0  ;;  %v2349_v13 = vrot.slane %v2335_v3, %v18092_v25  ;;  %v607_v17 = vld [vmem:[%s18067_s8 + $0x898] sm:$0xff]  ;;  %v17319_v24 = vpack.c.bf16 %v989_v12, %v605_v11  ;;  %v2369_v52 = vcombine.high %v305_v44, %v305_v44 }
 0x27e   : > { %v8530_v32 = vpop.f32.mrb[75].mxu1  ;;  %v17323_v27 = vpack.c.bf16 %v991_v18, %v607_v17  ;;  %v606_v31 = vld [vmem:[%s18067_s8 + $0x890] sm:$0xff]  ;;  %v2376_v57 = vrot.slane %v305_v44, %v18092_v25  ;;  %v999_v3 = vld [vmem:[%s18067_s8 + $0x14d8] sm:$0x3] }
 0x27f   : > { %v8529_v38 = vadd.f32 %v8528_v26, %v8459_v30  ;;  %v2351_v26 = vcombine.high %v2349_v13, %v2349_v13  ;;  %v988_v30 = vld [vmem:[%s18067_s8 + $0x1480] sm:$0x3]  ;;  %v990_v32 = vld [vmem:[%s18067_s8 + $0x1490] sm:$0x3] }
 0x280   : > { %v17325_v46 = vpack.c.bf16 %v990_v32, %v606_v31 }
 0x281   : > { %12237 = vmatmul.mubr.f32.vlgmr.msra.gmra.mrb[128].mxu0 %v2291_v63  ;;  %v2333_v63 = vcombine.high %v2325_v48, %v2325_v48 }
 0x282   : > { %12307 = vmatmul.mubr.f32.vlgmr.msra.gmra.mrb[128].mxu1 %v2298_v4  ;;  %17298 = vmatpush1.bf16.xpose.msra.mxu0 %v17297_v36  ;;  %v600_v4 = vld [vmem:[%s18067_s8 + $0x860] sm:$0xff]  ;;  %v609_v36 = vld [vmem:[%s18067_s8 + $0x8a8] sm:$0xff] }
 0x283   : > { %17302 = vmatpush1.bf16.xpose.msra.mxu1 %v17301_v37  ;;  %12376 = vmatprep.mubr.f32.mxu0 %v2316_v39  ;;  %v17313_v20 = vpack.c.bf16 %v984_v5, %v600_v4  ;;  %v993_v37 = vld [vmem:[%s18067_s8 + $0x14a8] sm:$0x3]  ;;  %v306_v4 = vld [vmem:[%s18060_s10 + $0x230] sm:$0xff] }
 0x284   : > { %17304 = vmatprep.subr.bf16.mxu0 %v17303_v40  ;;  %v8598_v49 = vpop.f32.mrb[76].mxu0  ;;  %12446 = vmatprep.mubr.f32.mxu1 %v2317_v41  ;;  %v2386_v12 = vcombine.high %v306_v4, %v306_v4  ;;  %v2393_v17 = vrot.slane %v306_v4, %v18092_v25 }
 0x285   : > { %v8668_v50 = vpop.f32.mrb[76].mxu1  ;;  %17308 = vmatprep.subr.bf16.mxu1 %v17307_v42  ;;  %v8599_v54 = vadd.f32 %v8598_v49, %v8529_v38  ;;  %v8600_v55 = vpop.f32.mrb[77].mxu0  ;;  %v2366_v38 = vrot.slane %v2352_v28, %v18092_v25  ;;  %v611_v42 = vld [vmem:[%s18067_s8 + $0x8b8] sm:$0xff]  ;;  %v17327_v49 = vpack.c.bf16 %v993_v37, %v609_v36 }
 0x286   : > { %v8670_v56 = vpop.f32.mrb[77].mxu1  ;;  %v17331_v51 = vpack.c.bf16 %v995_v43, %v611_v42  ;;  %v610_v55 = vld [vmem:[%s18067_s8 + $0x8b0] sm:$0xff]  ;;  %v1003_v28 = vld [vmem:[%s18067_s8 + $0x14f8] sm:$0x3] }
 0x287   : > { %v8669_v62 = vadd.f32 %v8668_v50, %v8599_v54  ;;  %v2368_v50 = vcombine.high %v2366_v38, %v2366_v38  ;;  %v992_v54 = vld [vmem:[%s18067_s8 + $0x14a0] sm:$0x3]  ;;  %v994_v56 = vld [vmem:[%s18067_s8 + $0x14b0] sm:$0x3] }
 0x288   : > { %v17333_v6 = vpack.c.bf16 %v994_v56, %v610_v55 }
 0x289   : > { %12377 = vmatmul.mubr.f32.vlgmr.msra.gmra.mrb[130].mxu0 %v2308_v23  ;;  %v2350_v23 = vcombine.high %v2342_v8, %v2342_v8 }
 0x28a   : > { %12447 = vmatmul.mubr.f32.vlgmr.msra.gmra.mrb[130].mxu1 %v2315_v29  ;;  %17306 = vmatpush1.bf16.xpose.msra.mxu0 %v17305_v60  ;;  %v604_v29 = vld [vmem:[%s18067_s8 + $0x880] sm:$0xff]  ;;  %v613_v60 = vld [vmem:[%s18067_s8 + $0x8c8] sm:$0xff] }
 0x28b   : > { %17310 = vmatpush1.bf16.xpose.msra.mxu1 %v17309_v61  ;;  %12516 = vmatprep.mubr.f32.mxu0 %v2333_v63  ;;  %v17321_v45 = vpack.c.bf16 %v988_v30, %v604_v29  ;;  %v997_v61 = vld [vmem:[%s18067_s8 + $0x14c8] sm:$0x3]  ;;  %v307_v29 = vld [vmem:[%s18060_s10 + $0x238] sm:$0xff] }
 0x28c   : > { %17312 = vmatprep.subr.bf16.mxu0 %v17311_v0  ;;  %v8738_v9 = vpop.f32.mrb[78].mxu0  ;;  %12586 = vmatprep.mubr.f32.mxu1 %v2334_v1  ;;  %v2403_v37 = vcombine.high %v307_v29, %v307_v29  ;;  %v2410_v42 = vrot.slane %v307_v29, %v18092_v25 }
 0x28d   : > { %v8808_v10 = vpop.f32.mrb[78].mxu1  ;;  %17316 = vmatprep.subr.bf16.mxu1 %v17315_v2  ;;  %v8739_v14 = vadd.f32 %v8738_v9, %v8669_v62  ;;  %v8740_v15 = vpop.f32.mrb[79].mxu0  ;;  %v2383_v62 = vrot.slane %v2369_v52, %v18092_v25  ;;  %v615_v2 = vld [vmem:[%s18067_s8 + $0x8d8] sm:$0xff]  ;;  %v17335_v9 = vpack.c.bf16 %v997_v61, %v613_v60 }
 0x28e   : > { %v8810_v16 = vpop.f32.mrb[79].mxu1  ;;  %v17339_v11 = vpack.c.bf16 %v999_v3, %v615_v2  ;;  %v614_v15 = vld [vmem:[%s18067_s8 + $0x8d0] sm:$0xff]  ;;  %v1007_v52 = vld [vmem:[%s18067_s8 + $0x1518] sm:$0x3] }
 0x28f   : > { %v8809_v22 = vadd.f32 %v8808_v10, %v8739_v14  ;;  %v2385_v10 = vcombine.high %v2383_v62, %v2383_v62  ;;  %v996_v14 = vld [vmem:[%s18067_s8 + $0x14c0] sm:$0x3]  ;;  %v998_v16 = vld [vmem:[%s18067_s8 + $0x14d0] sm:$0x3] }
 0x290   : > { %v17341_v31 = vpack.c.bf16 %v998_v16, %v614_v15 }
 0x291   : > { %12517 = vmatmul.mubr.f32.vlgmr.msra.gmra.mrb[132].mxu0 %v2325_v48  ;;  %v2367_v48 = vcombine.high %v2359_v33, %v2359_v33 }
 0x292   : > { %12587 = vmatmul.mubr.f32.vlgmr.msra.gmra.mrb[132].mxu1 %v2332_v53  ;;  %17314 = vmatpush1.bf16.xpose.msra.mxu0 %v17313_v20  ;;  %v608_v53 = vld [vmem:[%s18067_s8 + $0x8a0] sm:$0xff]  ;;  %v617_v20 = vld [vmem:[%s18067_s8 + $0x8e8] sm:$0xff] }
 0x293   : > { %17318 = vmatpush1.bf16.xpose.msra.mxu1 %v17317_v21  ;;  %12656 = vmatprep.mubr.f32.mxu0 %v2350_v23  ;;  %v17329_v5 = vpack.c.bf16 %v992_v54, %v608_v53  ;;  %v1001_v21 = vld [vmem:[%s18067_s8 + $0x14e8] sm:$0x3]  ;;  %v308_v53 = vld [vmem:[%s18060_s10 + $0x240] sm:$0xff] }
 0x294   : > { %17320 = vmatprep.subr.bf16.mxu0 %v17319_v24  ;;  %v8878_v34 = vpop.f32.mrb[80].mxu0  ;;  %12726 = vmatprep.mubr.f32.mxu1 %v2351_v26  ;;  %v2420_v61 = vcombine.high %v308_v53, %v308_v53  ;;  %v2427_v2 = vrot.slane %v308_v53, %v18092_v25 }
 0x295   : > { %v8948_v35 = vpop.f32.mrb[80].mxu1  ;;  %17324 = vmatprep.subr.bf16.mxu1 %v17323_v27  ;;  %v8879_v39 = vadd.f32 %v8878_v34, %v8809_v22  ;;  %v8880_v40 = vpop.f32.mrb[81].mxu0  ;;  %v2400_v22 = vrot.slane %v2386_v12, %v18092_v25  ;;  %v619_v27 = vld [vmem:[%s18067_s8 + $0x8f8] sm:$0xff]  ;;  %v17343_v34 = vpack.c.bf16 %v1001_v21, %v617_v20 }
 0x296   : > { %v8950_v41 = vpop.f32.mrb[81].mxu1  ;;  %v17347_v36 = vpack.c.bf16 %v1003_v28, %v619_v27  ;;  %v618_v40 = vld [vmem:[%s18067_s8 + $0x8f0] sm:$0xff]  ;;  %v1011_v12 = vld [vmem:[%s18067_s8 + $0x1538] sm:$0x3] }
 0x297   : > { %v8949_v47 = vadd.f32 %v8948_v35, %v8879_v39  ;;  %v2402_v35 = vcombine.high %v2400_v22, %v2400_v22  ;;  %v1000_v39 = vld [vmem:[%s18067_s8 + $0x14e0] sm:$0x3]  ;;  %v1002_v41 = vld [vmem:[%s18067_s8 + $0x14f0] sm:$0x3] }
 0x298   : > { %v17349_v55 = vpack.c.bf16 %v1002_v41, %v618_v40 }
 0x299   : > { %12657 = vmatmul.mubr.f32.vlgmr.msra.gmra.mrb[134].mxu0 %v2342_v8  ;;  %v2384_v8 = vcombine.high %v2376_v57, %v2376_v57 }
 0x29a   : > { %12727 = vmatmul.mubr.f32.vlgmr.msra.gmra.mrb[134].mxu1 %v2349_v13  ;;  %17322 = vmatpush1.bf16.xpose.msra.mxu0 %v17321_v45  ;;  %v612_v13 = vld [vmem:[%s18067_s8 + $0x8c0] sm:$0xff]  ;;  %v621_v45 = vld [vmem:[%s18067_s8 + $0x908] sm:$0xff] }
 0x29b   : > { %17326 = vmatpush1.bf16.xpose.msra.mxu1 %v17325_v46  ;;  %12796 = vmatprep.mubr.f32.mxu0 %v2367_v48  ;;  %v17337_v30 = vpack.c.bf16 %v996_v14, %v612_v13  ;;  %v1005_v46 = vld [vmem:[%s18067_s8 + $0x1508] sm:$0x3] }
 0x29c   : > { %17328 = vmatprep.subr.bf16.mxu0 %v17327_v49  ;;  %v9018_v58 = vpop.f32.mrb[82].mxu0  ;;  %12866 = vmatprep.mubr.f32.mxu1 %v2368_v50  ;;  %v309_v13 = vld [vmem:[%s18060_s10 + $0x248] sm:$0xff] }
 0x29d   : > { %v9088_v59 = vpop.f32.mrb[82].mxu1  ;;  %17332 = vmatprep.subr.bf16.mxu1 %v17331_v51  ;;  %v9019_v63 = vadd.f32 %v9018_v58, %v8949_v47  ;;  %v9020_v0 = vpop.f32.mrb[83].mxu0  ;;  %v2417_v47 = vrot.slane %v2403_v37, %v18092_v25  ;;  %v623_v51 = vld [vmem:[%s18067_s8 + $0x918] sm:$0xff]  ;;  %v17351_v58 = vpack.c.bf16 %v1005_v46, %v621_v45  ;;  %v2437_v21 = vcombine.high %v309_v13, %v309_v13 }
 0x29e   : > { %v9090_v1 = vpop.f32.mrb[83].mxu1  ;;  %v17355_v60 = vpack.c.bf16 %v1007_v52, %v623_v51  ;;  %v622_v0 = vld [vmem:[%s18067_s8 + $0x910] sm:$0xff]  ;;  %v2444_v27 = vrot.slane %v309_v13, %v18092_v25  ;;  %v1015_v37 = vld [vmem:[%s18067_s8 + $0x1558] sm:$0x3] }
 0x29f   : > { %v9089_v7 = vadd.f32 %v9088_v59, %v9019_v63  ;;  %v2419_v59 = vcombine.high %v2417_v47, %v2417_v47  ;;  %v1004_v63 = vld [vmem:[%s18067_s8 + $0x1500] sm:$0x3]  ;;  %v1006_v1 = vld [vmem:[%s18067_s8 + $0x1510] sm:$0x3] }
 0x2a0   : > { %v17357_v15 = vpack.c.bf16 %v1006_v1, %v622_v0 }
 0x2a1   : > { %12797 = vmatmul.mubr.f32.vlgmr.msra.gmra.mrb[136].mxu0 %v2359_v33  ;;  %v2401_v33 = vcombine.high %v2393_v17, %v2393_v17 }
 0x2a2   : > { %12867 = vmatmul.mubr.f32.vlgmr.msra.gmra.mrb[136].mxu1 %v2366_v38  ;;  %17330 = vmatpush1.bf16.xpose.msra.mxu0 %v17329_v5  ;;  %v616_v38 = vld [vmem:[%s18067_s8 + $0x8e0] sm:$0xff]  ;;  %v625_v5 = vld [vmem:[%s18067_s8 + $0x928] sm:$0xff] }
 0x2a3   : > { %17334 = vmatpush1.bf16.xpose.msra.mxu1 %v17333_v6  ;;  %12936 = vmatprep.mubr.f32.mxu0 %v2384_v8  ;;  %v17345_v54 = vpack.c.bf16 %v1000_v39, %v616_v38  ;;  %v1009_v6 = vld [vmem:[%s18067_s8 + $0x1528] sm:$0x3]  ;;  %v310_v38 = vld [vmem:[%s18060_s10 + $0x250] sm:$0xff] }
 0x2a4   : > { %17336 = vmatprep.subr.bf16.mxu0 %v17335_v9  ;;  %v9158_v18 = vpop.f32.mrb[84].mxu0  ;;  %13006 = vmatprep.mubr.f32.mxu1 %v2385_v10  ;;  %v2454_v46 = vcombine.high %v310_v38, %v310_v38  ;;  %v2461_v51 = vrot.slane %v310_v38, %v18092_v25 }
 0x2a5   : > { %v9228_v19 = vpop.f32.mrb[84].mxu1  ;;  %17340 = vmatprep.subr.bf16.mxu1 %v17339_v11  ;;  %v9159_v23 = vadd.f32 %v9158_v18, %v9089_v7  ;;  %v9160_v24 = vpop.f32.mrb[85].mxu0  ;;  %v2434_v7 = vrot.slane %v2420_v61, %v18092_v25  ;;  %v627_v11 = vld [vmem:[%s18067_s8 + $0x938] sm:$0xff]  ;;  %v17359_v18 = vpack.c.bf16 %v1009_v6, %v625_v5 }
 0x2a6   : > { %v9230_v26 = vpop.f32.mrb[85].mxu1  ;;  %v17363_v20 = vpack.c.bf16 %v1011_v12, %v627_v11  ;;  %v626_v24 = vld [vmem:[%s18067_s8 + $0x930] sm:$0xff]  ;;  %v1019_v61 = vld [vmem:[%s18067_s8 + $0x1578] sm:$0x3] }
 0x2a7   : > { %v9229_v32 = vadd.f32 %v9228_v19, %v9159_v23  ;;  %v2436_v19 = vcombine.high %v2434_v7, %v2434_v7  ;;  %v1008_v23 = vld [vmem:[%s18067_s8 + $0x1520] sm:$0x3]  ;;  %v1010_v26 = vld [vmem:[%s18067_s8 + $0x1530] sm:$0x3] }
 0x2a8   : > { %v17365_v40 = vpack.c.bf16 %v1010_v26, %v626_v24 }
 0x2a9   : > { %12937 = vmatmul.mubr.f32.vlgmr.msra.gmra.mrb[138].mxu0 %v2376_v57  ;;  %v2418_v57 = vcombine.high %v2410_v42, %v2410_v42 }
 0x2aa   : > { %13007 = vmatmul.mubr.f32.vlgmr.msra.gmra.mrb[138].mxu1 %v2383_v62  ;;  %17338 = vmatpush1.bf16.xpose.msra.mxu0 %v17337_v30  ;;  %v620_v62 = vld [vmem:[%s18067_s8 + $0x900] sm:$0xff]  ;;  %v629_v30 = vld [vmem:[%s18067_s8 + $0x948] sm:$0xff] }
 0x2ab   : > { %17342 = vmatpush1.bf16.xpose.msra.mxu1 %v17341_v31  ;;  %13076 = vmatprep.mubr.f32.mxu0 %v2401_v33  ;;  %v17353_v14 = vpack.c.bf16 %v1004_v63, %v620_v62  ;;  %v1013_v31 = vld [vmem:[%s18067_s8 + $0x1548] sm:$0x3]  ;;  %v311_v62 = vld [vmem:[%s18060_s10 + $0x258] sm:$0xff] }
 0x2ac   : > { %17344 = vmatprep.subr.bf16.mxu0 %v17343_v34  ;;  %v9298_v43 = vpop.f32.mrb[86].mxu0  ;;  %13146 = vmatprep.mubr.f32.mxu1 %v2402_v35  ;;  %v2471_v6 = vcombine.high %v311_v62, %v311_v62  ;;  %v2478_v11 = vrot.slane %v311_v62, %v18092_v25 }
 0x2ad   : > { %v9368_v44 = vpop.f32.mrb[86].mxu1  ;;  %17348 = vmatprep.subr.bf16.mxu1 %v17347_v36  ;;  %v9299_v48 = vadd.f32 %v9298_v43, %v9229_v32  ;;  %v9300_v49 = vpop.f32.mrb[87].mxu0  ;;  %v2451_v32 = vrot.slane %v2437_v21, %v18092_v25  ;;  %v631_v36 = vld [vmem:[%s18067_s8 + $0x958] sm:$0xff]  ;;  %v17367_v43 = vpack.c.bf16 %v1013_v31, %v629_v30 }
 0x2ae   : > { %v9370_v50 = vpop.f32.mrb[87].mxu1  ;;  %v17371_v45 = vpack.c.bf16 %v1015_v37, %v631_v36  ;;  %v630_v49 = vld [vmem:[%s18067_s8 + $0x950] sm:$0xff]  ;;  %v1023_v21 = vld [vmem:[%s18067_s8 + $0x1598] sm:$0x3] }
 0x2af   : > { %v9369_v56 = vadd.f32 %v9368_v44, %v9299_v48  ;;  %v2453_v44 = vcombine.high %v2451_v32, %v2451_v32  ;;  %v1012_v48 = vld [vmem:[%s18067_s8 + $0x1540] sm:$0x3]  ;;  %v1014_v50 = vld [vmem:[%s18067_s8 + $0x1550] sm:$0x3] }
 0x2b0   : > { %v17373_v0 = vpack.c.bf16 %v1014_v50, %v630_v49 }
 0x2b1   : > { %13077 = vmatmul.mubr.f32.vlgmr.msra.gmra.mrb[140].mxu0 %v2393_v17  ;;  %v2435_v17 = vcombine.high %v2427_v2, %v2427_v2 }
 0x2b2   : > { %13147 = vmatmul.mubr.f32.vlgmr.msra.gmra.mrb[140].mxu1 %v2400_v22  ;;  %17346 = vmatpush1.bf16.xpose.msra.mxu0 %v17345_v54  ;;  %v624_v22 = vld [vmem:[%s18067_s8 + $0x920] sm:$0xff]  ;;  %v633_v54 = vld [vmem:[%s18067_s8 + $0x968] sm:$0xff] }
 0x2b3   : > { %17350 = vmatpush1.bf16.xpose.msra.mxu1 %v17349_v55  ;;  %13216 = vmatprep.mubr.f32.mxu0 %v2418_v57  ;;  %v17361_v39 = vpack.c.bf16 %v1008_v23, %v624_v22  ;;  %v1017_v55 = vld [vmem:[%s18067_s8 + $0x1568] sm:$0x3]  ;;  %v312_v22 = vld [vmem:[%s18060_s10 + $0x260] sm:$0xff] }
 0x2b4   : > { %17352 = vmatprep.subr.bf16.mxu0 %v17351_v58  ;;  %v9438_v3 = vpop.f32.mrb[88].mxu0  ;;  %13286 = vmatprep.mubr.f32.mxu1 %v2419_v59  ;;  %v2488_v31 = vcombine.high %v312_v22, %v312_v22  ;;  %v2495_v36 = vrot.slane %v312_v22, %v18092_v25 }
 0x2b5   : > { %v9508_v4 = vpop.f32.mrb[88].mxu1  ;;  %17356 = vmatprep.subr.bf16.mxu1 %v17355_v60  ;;  %v9439_v8 = vadd.f32 %v9438_v3, %v9369_v56  ;;  %v9440_v9 = vpop.f32.mrb[89].mxu0  ;;  %v2468_v56 = vrot.slane %v2454_v46, %v18092_v25  ;;  %v635_v60 = vld [vmem:[%s18067_s8 + $0x978] sm:$0xff]  ;;  %v17375_v3 = vpack.c.bf16 %v1017_v55, %v633_v54 }
 0x2b6   : > { %v9510_v10 = vpop.f32.mrb[89].mxu1  ;;  %v17379_v5 = vpack.c.bf16 %v1019_v61, %v635_v60  ;;  %v634_v9 = vld [vmem:[%s18067_s8 + $0x970] sm:$0xff]  ;;  %v1027_v46 = vld [vmem:[%s18067_s8 + $0x15b8] sm:$0x3] }
 0x2b7   : > { %v9509_v16 = vadd.f32 %v9508_v4, %v9439_v8  ;;  %v2470_v4 = vcombine.high %v2468_v56, %v2468_v56  ;;  %v1016_v8 = vld [vmem:[%s18067_s8 + $0x1560] sm:$0x3]  ;;  %v1018_v10 = vld [vmem:[%s18067_s8 + $0x1570] sm:$0x3] }
 0x2b8   : > { %v17381_v24 = vpack.c.bf16 %v1018_v10, %v634_v9 }
 0x2b9   : > { %13217 = vmatmul.mubr.f32.vlgmr.msra.gmra.mrb[142].mxu0 %v2410_v42  ;;  %v2452_v42 = vcombine.high %v2444_v27, %v2444_v27 }
 0x2ba   : > { %13287 = vmatmul.mubr.f32.vlgmr.msra.gmra.mrb[142].mxu1 %v2417_v47  ;;  %17354 = vmatpush1.bf16.xpose.msra.mxu0 %v17353_v14  ;;  %v628_v47 = vld [vmem:[%s18067_s8 + $0x940] sm:$0xff]  ;;  %v637_v14 = vld [vmem:[%s18067_s8 + $0x988] sm:$0xff] }
 0x2bb   : > { %17358 = vmatpush1.bf16.xpose.msra.mxu1 %v17357_v15  ;;  %13356 = vmatprep.mubr.f32.mxu0 %v2435_v17  ;;  %v17369_v63 = vpack.c.bf16 %v1012_v48, %v628_v47  ;;  %v1021_v15 = vld [vmem:[%s18067_s8 + $0x1588] sm:$0x3] }
 0x2bc   : > { %17360 = vmatprep.subr.bf16.mxu0 %v17359_v18  ;;  %v9578_v28 = vpop.f32.mrb[90].mxu0  ;;  %13426 = vmatprep.mubr.f32.mxu1 %v2436_v19  ;;  %v313_v47 = vld [vmem:[%s18060_s10 + $0x268] sm:$0xff] }
 0x2bd   : > { %v9648_v29 = vpop.f32.mrb[90].mxu1  ;;  %17364 = vmatprep.subr.bf16.mxu1 %v17363_v20  ;;  %v9579_v33 = vadd.f32 %v9578_v28, %v9509_v16  ;;  %v9580_v34 = vpop.f32.mrb[91].mxu0  ;;  %v2485_v16 = vrot.slane %v2471_v6, %v18092_v25  ;;  %v639_v20 = vld [vmem:[%s18067_s8 + $0x998] sm:$0xff]  ;;  %v17383_v28 = vpack.c.bf16 %v1021_v15, %v637_v14  ;;  %v2505_v55 = vcombine.high %v313_v47, %v313_v47 }
 0x2be   : > { %v9650_v35 = vpop.f32.mrb[91].mxu1  ;;  %v17387_v30 = vpack.c.bf16 %v1023_v21, %v639_v20  ;;  %v638_v34 = vld [vmem:[%s18067_s8 + $0x990] sm:$0xff]  ;;  %v2512_v60 = vrot.slane %v313_v47, %v18092_v25  ;;  %v1031_v6 = vld [vmem:[%s18067_s8 + $0x15d8] sm:$0x3] }
 0x2bf   : > { %v9649_v41 = vadd.f32 %v9648_v29, %v9579_v33  ;;  %v2487_v29 = vcombine.high %v2485_v16, %v2485_v16  ;;  %v1020_v33 = vld [vmem:[%s18067_s8 + $0x1580] sm:$0x3]  ;;  %v1022_v35 = vld [vmem:[%s18067_s8 + $0x1590] sm:$0x3] }
 0x2c0   : > { %v17389_v49 = vpack.c.bf16 %v1022_v35, %v638_v34 }
 0x2c1   : > { %13357 = vmatmul.mubr.f32.vlgmr.msra.gmra.mrb[144].mxu0 %v2427_v2  ;;  %v2469_v2 = vcombine.high %v2461_v51, %v2461_v51 }
 0x2c2   : > { %13427 = vmatmul.mubr.f32.vlgmr.msra.gmra.mrb[144].mxu1 %v2434_v7  ;;  %17362 = vmatpush1.bf16.xpose.msra.mxu0 %v17361_v39  ;;  %v632_v7 = vld [vmem:[%s18067_s8 + $0x960] sm:$0xff]  ;;  %v641_v39 = vld [vmem:[%s18067_s8 + $0x9a8] sm:$0xff] }
 0x2c3   : > { %17366 = vmatpush1.bf16.xpose.msra.mxu1 %v17365_v40  ;;  %13496 = vmatprep.mubr.f32.mxu0 %v2452_v42  ;;  %v17377_v23 = vpack.c.bf16 %v1016_v8, %v632_v7  ;;  %v1025_v40 = vld [vmem:[%s18067_s8 + $0x15a8] sm:$0x3]  ;;  %v314_v7 = vld [vmem:[%s18060_s10 + $0x270] sm:$0xff] }
 0x2c4   : > { %17368 = vmatprep.subr.bf16.mxu0 %v17367_v43  ;;  %v9718_v52 = vpop.f32.mrb[92].mxu0  ;;  %13566 = vmatprep.mubr.f32.mxu1 %v2453_v44  ;;  %v2522_v15 = vcombine.high %v314_v7, %v314_v7  ;;  %v2529_v20 = vrot.slane %v314_v7, %v18092_v25 }
 0x2c5   : > { %v9788_v53 = vpop.f32.mrb[92].mxu1  ;;  %17372 = vmatprep.subr.bf16.mxu1 %v17371_v45  ;;  %v9719_v57 = vadd.f32 %v9718_v52, %v9649_v41  ;;  %v9720_v58 = vpop.f32.mrb[93].mxu0  ;;  %v2502_v41 = vrot.slane %v2488_v31, %v18092_v25  ;;  %v643_v45 = vld [vmem:[%s18067_s8 + $0x9b8] sm:$0xff]  ;;  %v17391_v52 = vpack.c.bf16 %v1025_v40, %v641_v39 }
 0x2c6   : > { %v9790_v59 = vpop.f32.mrb[93].mxu1  ;;  %v17395_v54 = vpack.c.bf16 %v1027_v46, %v643_v45  ;;  %v642_v58 = vld [vmem:[%s18067_s8 + $0x9b0] sm:$0xff]  ;;  %v1035_v31 = vld [vmem:[%s18067_s8 + $0x15f8] sm:$0x3] }
 0x2c7   : > { %v9789_v1 = vadd.f32 %v9788_v53, %v9719_v57  ;;  %v2504_v53 = vcombine.high %v2502_v41, %v2502_v41  ;;  %v1024_v57 = vld [vmem:[%s18067_s8 + $0x15a0] sm:$0x3]  ;;  %v1026_v59 = vld [vmem:[%s18067_s8 + $0x15b0] sm:$0x3] }
 0x2c8   : > { %v17397_v9 = vpack.c.bf16 %v1026_v59, %v642_v58 }
 0x2c9   : > { %13497 = vmatmul.mubr.f32.vlgmr.msra.gmra.mrb[146].mxu0 %v2444_v27  ;;  %v2486_v27 = vcombine.high %v2478_v11, %v2478_v11 }
 0x2ca   : > { %13567 = vmatmul.mubr.f32.vlgmr.msra.gmra.mrb[146].mxu1 %v2451_v32  ;;  %17370 = vmatpush1.bf16.xpose.msra.mxu0 %v17369_v63  ;;  %v636_v32 = vld [vmem:[%s18067_s8 + $0x980] sm:$0xff]  ;;  %v645_v63 = vld [vmem:[%s18067_s8 + $0x9c8] sm:$0xff] }
 0x2cb   : > { %17374 = vmatpush1.bf16.xpose.msra.mxu1 %v17373_v0  ;;  %13636 = vmatprep.mubr.f32.mxu0 %v2469_v2  ;;  %v17385_v48 = vpack.c.bf16 %v1020_v33, %v636_v32  ;;  %v1029_v0 = vld [vmem:[%s18067_s8 + $0x15c8] sm:$0x3]  ;;  %v315_v32 = vld [vmem:[%s18060_s10 + $0x278] sm:$0xff] }
 0x2cc   : > { %17376 = vmatprep.subr.bf16.mxu0 %v17375_v3  ;;  %v9858_v12 = vpop.f32.mrb[94].mxu0  ;;  %13706 = vmatprep.mubr.f32.mxu1 %v2470_v4  ;;  %v2539_v40 = vcombine.high %v315_v32, %v315_v32  ;;  %v2546_v45 = vrot.slane %v315_v32, %v18092_v25 }
 0x2cd   : > { %v9928_v13 = vpop.f32.mrb[94].mxu1  ;;  %17380 = vmatprep.subr.bf16.mxu1 %v17379_v5  ;;  %v9859_v17 = vadd.f32 %v9858_v12, %v9789_v1  ;;  %v9860_v18 = vpop.f32.mrb[95].mxu0  ;;  %v2519_v1 = vrot.slane %v2505_v55, %v18092_v25  ;;  %v647_v5 = vld [vmem:[%s18067_s8 + $0x9d8] sm:$0xff]  ;;  %v17399_v12 = vpack.c.bf16 %v1029_v0, %v645_v63 }
 0x2ce   : > { %v9930_v19 = vpop.f32.mrb[95].mxu1  ;;  %v17403_v14 = vpack.c.bf16 %v1031_v6, %v647_v5  ;;  %v646_v18 = vld [vmem:[%s18067_s8 + $0x9d0] sm:$0xff]  ;;  %v1039_v55 = vld [vmem:[%s18067_s8 + $0x1618] sm:$0x3] }
 0x2cf   : > { %v9929_v26 = vadd.f32 %v9928_v13, %v9859_v17  ;;  %v2521_v13 = vcombine.high %v2519_v1, %v2519_v1  ;;  %v1028_v17 = vld [vmem:[%s18067_s8 + $0x15c0] sm:$0x3]  ;;  %v1030_v19 = vld [vmem:[%s18067_s8 + $0x15d0] sm:$0x3] }
 0x2d0   : > { %v17405_v34 = vpack.c.bf16 %v1030_v19, %v646_v18 }
 0x2d1   : > { %13637 = vmatmul.mubr.f32.vlgmr.msra.gmra.mrb[148].mxu0 %v2461_v51  ;;  %v2503_v51 = vcombine.high %v2495_v36, %v2495_v36 }
 0x2d2   : > { %13707 = vmatmul.mubr.f32.vlgmr.msra.gmra.mrb[148].mxu1 %v2468_v56  ;;  %17378 = vmatpush1.bf16.xpose.msra.mxu0 %v17377_v23  ;;  %v640_v56 = vld [vmem:[%s18067_s8 + $0x9a0] sm:$0xff]  ;;  %v649_v23 = vld [vmem:[%s18067_s8 + $0x9e8] sm:$0xff] }
 0x2d3   : > { %17382 = vmatpush1.bf16.xpose.msra.mxu1 %v17381_v24  ;;  %13776 = vmatprep.mubr.f32.mxu0 %v2486_v27  ;;  %v17393_v8 = vpack.c.bf16 %v1024_v57, %v640_v56  ;;  %v1033_v24 = vld [vmem:[%s18067_s8 + $0x15e8] sm:$0x3]  ;;  %v316_v56 = vld [vmem:[%s18060_s10 + $0x280] sm:$0xff] }
 0x2d4   : > { %17384 = vmatprep.subr.bf16.mxu0 %v17383_v28  ;;  %v9998_v37 = vpop.f32.mrb[96].mxu0  ;;  %13846 = vmatprep.mubr.f32.mxu1 %v2487_v29  ;;  %v2556_v0 = vcombine.high %v316_v56, %v316_v56  ;;  %v2563_v5 = vrot.slane %v316_v56, %v18092_v25 }
 0x2d5   : > { %v10068_v38 = vpop.f32.mrb[96].mxu1  ;;  %17388 = vmatprep.subr.bf16.mxu1 %v17387_v30  ;;  %v9999_v42 = vadd.f32 %v9998_v37, %v9929_v26  ;;  %v10000_v43 = vpop.f32.mrb[97].mxu0  ;;  %v2536_v26 = vrot.slane %v2522_v15, %v18092_v25  ;;  %v651_v30 = vld [vmem:[%s18067_s8 + $0x9f8] sm:$0xff]  ;;  %v17407_v37 = vpack.c.bf16 %v1033_v24, %v649_v23 }
 0x2d6   : > { %v10070_v44 = vpop.f32.mrb[97].mxu1  ;;  %v17411_v39 = vpack.c.bf16 %v1035_v31, %v651_v30  ;;  %v650_v43 = vld [vmem:[%s18067_s8 + $0x9f0] sm:$0xff]  ;;  %v1043_v15 = vld [vmem:[%s18067_s8 + $0x1638] sm:$0x3] }
 0x2d7   : > { %v10069_v50 = vadd.f32 %v10068_v38, %v9999_v42  ;;  %v2538_v38 = vcombine.high %v2536_v26, %v2536_v26  ;;  %v1032_v42 = vld [vmem:[%s18067_s8 + $0x15e0] sm:$0x3]  ;;  %v1034_v44 = vld [vmem:[%s18067_s8 + $0x15f0] sm:$0x3] }
 0x2d8   : > { %v17413_v58 = vpack.c.bf16 %v1034_v44, %v650_v43 }
 0x2d9   : > { %13777 = vmatmul.mubr.f32.vlgmr.msra.gmra.mrb[150].mxu0 %v2478_v11  ;;  %v2520_v11 = vcombine.high %v2512_v60, %v2512_v60 }
 0x2da   : > { %13847 = vmatmul.mubr.f32.vlgmr.msra.gmra.mrb[150].mxu1 %v2485_v16  ;;  %17386 = vmatpush1.bf16.xpose.msra.mxu0 %v17385_v48  ;;  %v644_v16 = vld [vmem:[%s18067_s8 + $0x9c0] sm:$0xff]  ;;  %v653_v48 = vld [vmem:[%s18067_s8 + $0xa08] sm:$0xff] }
 0x2db   : > { %17390 = vmatpush1.bf16.xpose.msra.mxu1 %v17389_v49  ;;  %13916 = vmatprep.mubr.f32.mxu0 %v2503_v51  ;;  %v17401_v33 = vpack.c.bf16 %v1028_v17, %v644_v16  ;;  %v1037_v49 = vld [vmem:[%s18067_s8 + $0x1608] sm:$0x3] }
 0x2dc   : > { %17392 = vmatprep.subr.bf16.mxu0 %v17391_v52  ;;  %v10138_v61 = vpop.f32.mrb[98].mxu0  ;;  %13986 = vmatprep.mubr.f32.mxu1 %v2504_v53  ;;  %v317_v16 = vld [vmem:[%s18060_s10 + $0x288] sm:$0xff] }
 0x2dd   : > { %v10208_v62 = vpop.f32.mrb[98].mxu1  ;;  %17396 = vmatprep.subr.bf16.mxu1 %v17395_v54  ;;  %v10139_v2 = vadd.f32 %v10138_v61, %v10069_v50  ;;  %v10140_v3 = vpop.f32.mrb[99].mxu0  ;;  %v2553_v50 = vrot.slane %v2539_v40, %v18092_v25  ;;  %v655_v54 = vld [vmem:[%s18067_s8 + $0xa18] sm:$0xff]  ;;  %v17415_v61 = vpack.c.bf16 %v1037_v49, %v653_v48  ;;  %v2573_v24 = vcombine.high %v317_v16, %v317_v16 }
 0x2de   : > { %v10210_v4 = vpop.f32.mrb[99].mxu1  ;;  %v17419_v63 = vpack.c.bf16 %v1039_v55, %v655_v54  ;;  %v654_v3 = vld [vmem:[%s18067_s8 + $0xa10] sm:$0xff]  ;;  %v2580_v30 = vrot.slane %v317_v16, %v18092_v25  ;;  %v1047_v40 = vld [vmem:[%s18067_s8 + $0x1658] sm:$0x3] }
 0x2df   : > { %v10209_v10 = vadd.f32 %v10208_v62, %v10139_v2  ;;  %v2555_v62 = vcombine.high %v2553_v50, %v2553_v50  ;;  %v1036_v2 = vld [vmem:[%s18067_s8 + $0x1600] sm:$0x3]  ;;  %v1038_v4 = vld [vmem:[%s18067_s8 + $0x1610] sm:$0x3] }
 0x2e0   : > { %v17421_v18 = vpack.c.bf16 %v1038_v4, %v654_v3 }
 0x2e1   : > { %13917 = vmatmul.mubr.f32.vlgmr.msra.gmra.mrb[152].mxu0 %v2495_v36  ;;  %v2537_v36 = vcombine.high %v2529_v20, %v2529_v20 }
 0x2e2   : > { %13987 = vmatmul.mubr.f32.vlgmr.msra.gmra.mrb[152].mxu1 %v2502_v41  ;;  %17394 = vmatpush1.bf16.xpose.msra.mxu0 %v17393_v8  ;;  %v648_v41 = vld [vmem:[%s18067_s8 + $0x9e0] sm:$0xff]  ;;  %v657_v8 = vld [vmem:[%s18067_s8 + $0xa28] sm:$0xff] }
 0x2e3   : > { %17398 = vmatpush1.bf16.xpose.msra.mxu1 %v17397_v9  ;;  %14056 = vmatprep.mubr.f32.mxu0 %v2520_v11  ;;  %v17409_v57 = vpack.c.bf16 %v1032_v42, %v648_v41  ;;  %v1041_v9 = vld [vmem:[%s18067_s8 + $0x1628] sm:$0x3]  ;;  %v318_v41 = vld [vmem:[%s18060_s10 + $0x290] sm:$0xff] }
 0x2e4   : > { %17400 = vmatprep.subr.bf16.mxu0 %v17399_v12  ;;  %v10278_v21 = vpop.f32.mrb[100].mxu0  ;;  %14126 = vmatprep.mubr.f32.mxu1 %v2521_v13  ;;  %v2590_v49 = vcombine.high %v318_v41, %v318_v41  ;;  %v2597_v54 = vrot.slane %v318_v41, %v18092_v25 }
 0x2e5   : > { %v10348_v22 = vpop.f32.mrb[100].mxu1  ;;  %17404 = vmatprep.subr.bf16.mxu1 %v17403_v14  ;;  %v10279_v27 = vadd.f32 %v10278_v21, %v10209_v10  ;;  %v10280_v28 = vpop.f32.mrb[101].mxu0  ;;  %v2570_v10 = vrot.slane %v2556_v0, %v18092_v25  ;;  %v659_v14 = vld [vmem:[%s18067_s8 + $0xa38] sm:$0xff]  ;;  %v17423_v21 = vpack.c.bf16 %v1041_v9, %v657_v8 }
 0x2e6   : > { %v10350_v29 = vpop.f32.mrb[101].mxu1  ;;  %v17427_v23 = vpack.c.bf16 %v1043_v15, %v659_v14  ;;  %v658_v28 = vld [vmem:[%s18067_s8 + $0xa30] sm:$0xff]  ;;  %v1051_v0 = vld [vmem:[%s18067_s8 + $0x1678] sm:$0x3] }
 0x2e7   : > { %v10349_v35 = vadd.f32 %v10348_v22, %v10279_v27  ;;  %v2572_v22 = vcombine.high %v2570_v10, %v2570_v10  ;;  %v1040_v27 = vld [vmem:[%s18067_s8 + $0x1620] sm:$0x3]  ;;  %v1042_v29 = vld [vmem:[%s18067_s8 + $0x1630] sm:$0x3] }
 0x2e8   : > { %v17429_v43 = vpack.c.bf16 %v1042_v29, %v658_v28 }
 0x2e9   : > { %14057 = vmatmul.mubr.f32.vlgmr.msra.gmra.mrb[154].mxu0 %v2512_v60  ;;  %v2554_v60 = vcombine.high %v2546_v45, %v2546_v45 }
 0x2ea   : > { %14127 = vmatmul.mubr.f32.vlgmr.msra.gmra.mrb[154].mxu1 %v2519_v1  ;;  %17402 = vmatpush1.bf16.xpose.msra.mxu0 %v17401_v33  ;;  %v652_v1 = vld [vmem:[%s18067_s8 + $0xa00] sm:$0xff]  ;;  %v661_v33 = vld [vmem:[%s18067_s8 + $0xa48] sm:$0xff] }
 0x2eb   : > { %17406 = vmatpush1.bf16.xpose.msra.mxu1 %v17405_v34  ;;  %14196 = vmatprep.mubr.f32.mxu0 %v2537_v36  ;;  %v17417_v17 = vpack.c.bf16 %v1036_v2, %v652_v1  ;;  %v1045_v34 = vld [vmem:[%s18067_s8 + $0x1648] sm:$0x3]  ;;  %v319_v1 = vld [vmem:[%s18060_s10 + $0x298] sm:$0xff] }
 0x2ec   : > { %17408 = vmatprep.subr.bf16.mxu0 %v17407_v37  ;;  %v10418_v46 = vpop.f32.mrb[102].mxu0  ;;  %14266 = vmatprep.mubr.f32.mxu1 %v2538_v38  ;;  %v2607_v9 = vcombine.high %v319_v1, %v319_v1  ;;  %v2614_v14 = vrot.slane %v319_v1, %v18092_v25 }
 0x2ed   : > { %v10488_v47 = vpop.f32.mrb[102].mxu1  ;;  %17412 = vmatprep.subr.bf16.mxu1 %v17411_v39  ;;  %v10419_v51 = vadd.f32 %v10418_v46, %v10349_v35  ;;  %v10420_v52 = vpop.f32.mrb[103].mxu0  ;;  %v2587_v35 = vrot.slane %v2573_v24, %v18092_v25  ;;  %v663_v39 = vld [vmem:[%s18067_s8 + $0xa58] sm:$0xff]  ;;  %v17431_v46 = vpack.c.bf16 %v1045_v34, %v661_v33 }
 0x2ee   : > { %v10490_v53 = vpop.f32.mrb[103].mxu1  ;;  %v17435_v48 = vpack.c.bf16 %v1047_v40, %v663_v39  ;;  %v662_v52 = vld [vmem:[%s18067_s8 + $0xa50] sm:$0xff]  ;;  %v1055_v24 = vld [vmem:[%s18067_s8 + $0x1698] sm:$0x3] }
 0x2ef   : > { %v10489_v59 = vadd.f32 %v10488_v47, %v10419_v51  ;;  %v2589_v47 = vcombine.high %v2587_v35, %v2587_v35  ;;  %v1044_v51 = vld [vmem:[%s18067_s8 + $0x1640] sm:$0x3]  ;;  %v1046_v53 = vld [vmem:[%s18067_s8 + $0x1650] sm:$0x3] }
 0x2f0   : > { %v17437_v3 = vpack.c.bf16 %v1046_v53, %v662_v52 }
 0x2f1   : > { %14197 = vmatmul.mubr.f32.vlgmr.msra.gmra.mrb[156].mxu0 %v2529_v20  ;;  %v2571_v20 = vcombine.high %v2563_v5, %v2563_v5 }
 0x2f2   : > { %14267 = vmatmul.mubr.f32.vlgmr.msra.gmra.mrb[156].mxu1 %v2536_v26  ;;  %17410 = vmatpush1.bf16.xpose.msra.mxu0 %v17409_v57  ;;  %v656_v26 = vld [vmem:[%s18067_s8 + $0xa20] sm:$0xff]  ;;  %v665_v57 = vld [vmem:[%s18067_s8 + $0xa68] sm:$0xff] }
 0x2f3   : > { %17414 = vmatpush1.bf16.xpose.msra.mxu1 %v17413_v58  ;;  %14336 = vmatprep.mubr.f32.mxu0 %v2554_v60  ;;  %v17425_v42 = vpack.c.bf16 %v1040_v27, %v656_v26  ;;  %v1049_v58 = vld [vmem:[%s18067_s8 + $0x1668] sm:$0x3]  ;;  %v320_v26 = vld [vmem:[%s18060_s10 + $0x2a0] sm:$0xff] }
 0x2f4   : > { %17416 = vmatprep.subr.bf16.mxu0 %v17415_v61  ;;  %v10558_v6 = vpop.f32.mrb[104].mxu0  ;;  %14406 = vmatprep.mubr.f32.mxu1 %v2555_v62  ;;  %v2624_v34 = vcombine.high %v320_v26, %v320_v26  ;;  %v2631_v39 = vrot.slane %v320_v26, %v18092_v25 }
 0x2f5   : > { %v10628_v7 = vpop.f32.mrb[104].mxu1  ;;  %17420 = vmatprep.subr.bf16.mxu1 %v17419_v63  ;;  %v10559_v11 = vadd.f32 %v10558_v6, %v10489_v59  ;;  %v10560_v12 = vpop.f32.mrb[105].mxu0  ;;  %v2604_v59 = vrot.slane %v2590_v49, %v18092_v25  ;;  %v667_v63 = vld [vmem:[%s18067_s8 + $0xa78] sm:$0xff]  ;;  %v17439_v6 = vpack.c.bf16 %v1049_v58, %v665_v57 }
 0x2f6   : > { %v10630_v13 = vpop.f32.mrb[105].mxu1  ;;  %v17443_v8 = vpack.c.bf16 %v1051_v0, %v667_v63  ;;  %v666_v12 = vld [vmem:[%s18067_s8 + $0xa70] sm:$0xff]  ;;  %v1059_v49 = vld [vmem:[%s18067_s8 + $0x16b8] sm:$0x3] }
 0x2f7   : > { %v10629_v19 = vadd.f32 %v10628_v7, %v10559_v11  ;;  %v2606_v7 = vcombine.high %v2604_v59, %v2604_v59  ;;  %v1048_v11 = vld [vmem:[%s18067_s8 + $0x1660] sm:$0x3]  ;;  %v1050_v13 = vld [vmem:[%s18067_s8 + $0x1670] sm:$0x3] }
 0x2f8   : > { %v17445_v28 = vpack.c.bf16 %v1050_v13, %v666_v12 }
 0x2f9   : > { %14337 = vmatmul.mubr.f32.vlgmr.msra.gmra.mrb[158].mxu0 %v2546_v45  ;;  %v2588_v45 = vcombine.high %v2580_v30, %v2580_v30 }
 0x2fa   : > { %14407 = vmatmul.mubr.f32.vlgmr.msra.gmra.mrb[158].mxu1 %v2553_v50  ;;  %17418 = vmatpush1.bf16.xpose.msra.mxu0 %v17417_v17  ;;  %v660_v50 = vld [vmem:[%s18067_s8 + $0xa40] sm:$0xff]  ;;  %v669_v17 = vld [vmem:[%s18067_s8 + $0xa88] sm:$0xff] }
 0x2fb   : > { %17422 = vmatpush1.bf16.xpose.msra.mxu1 %v17421_v18  ;;  %14476 = vmatprep.mubr.f32.mxu0 %v2571_v20  ;;  %v17433_v2 = vpack.c.bf16 %v1044_v51, %v660_v50  ;;  %v1053_v18 = vld [vmem:[%s18067_s8 + $0x1688] sm:$0x3] }
 0x2fc   : > { %17424 = vmatprep.subr.bf16.mxu0 %v17423_v21  ;;  %v10698_v31 = vpop.f32.mrb[106].mxu0  ;;  %14546 = vmatprep.mubr.f32.mxu1 %v2572_v22  ;;  %v321_v50 = vld [vmem:[%s18060_s10 + $0x2a8] sm:$0xff] }
 0x2fd   : > { %v10768_v32 = vpop.f32.mrb[106].mxu1  ;;  %17428 = vmatprep.subr.bf16.mxu1 %v17427_v23  ;;  %v10699_v36 = vadd.f32 %v10698_v31, %v10629_v19  ;;  %v10700_v37 = vpop.f32.mrb[107].mxu0  ;;  %v2621_v19 = vrot.slane %v2607_v9, %v18092_v25  ;;  %v671_v23 = vld [vmem:[%s18067_s8 + $0xa98] sm:$0xff]  ;;  %v17447_v31 = vpack.c.bf16 %v1053_v18, %v669_v17  ;;  %v2641_v58 = vcombine.high %v321_v50, %v321_v50 }
 0x2fe   : > { %v10770_v38 = vpop.f32.mrb[107].mxu1  ;;  %v17451_v33 = vpack.c.bf16 %v1055_v24, %v671_v23  ;;  %v670_v37 = vld [vmem:[%s18067_s8 + $0xa90] sm:$0xff]  ;;  %v2648_v63 = vrot.slane %v321_v50, %v18092_v25  ;;  %v1063_v9 = vld [vmem:[%s18067_s8 + $0x16d8] sm:$0x3] }
 0x2ff   : > { %v10769_v44 = vadd.f32 %v10768_v32, %v10699_v36  ;;  %v2623_v32 = vcombine.high %v2621_v19, %v2621_v19  ;;  %v1052_v36 = vld [vmem:[%s18067_s8 + $0x1680] sm:$0x3]  ;;  %v1054_v38 = vld [vmem:[%s18067_s8 + $0x1690] sm:$0x3] }
 0x300   : > { %v17453_v52 = vpack.c.bf16 %v1054_v38, %v670_v37 }
 0x301   : > { %14477 = vmatmul.mubr.f32.vlgmr.msra.gmra.mrb[160].mxu0 %v2563_v5  ;;  %v2605_v5 = vcombine.high %v2597_v54, %v2597_v54 }
 0x302   : > { %14547 = vmatmul.mubr.f32.vlgmr.msra.gmra.mrb[160].mxu1 %v2570_v10  ;;  %17426 = vmatpush1.bf16.xpose.msra.mxu0 %v17425_v42  ;;  %v664_v10 = vld [vmem:[%s18067_s8 + $0xa60] sm:$0xff]  ;;  %v673_v42 = vld [vmem:[%s18067_s8 + $0xaa8] sm:$0xff] }
 0x303   : > { %17430 = vmatpush1.bf16.xpose.msra.mxu1 %v17429_v43  ;;  %14616 = vmatprep.mubr.f32.mxu0 %v2588_v45  ;;  %v17441_v27 = vpack.c.bf16 %v1048_v11, %v664_v10  ;;  %v1057_v43 = vld [vmem:[%s18067_s8 + $0x16a8] sm:$0x3]  ;;  %v322_v10 = vld [vmem:[%s18060_s10 + $0x2b0] sm:$0xff] }
 0x304   : > { %17432 = vmatprep.subr.bf16.mxu0 %v17431_v46  ;;  %v10838_v55 = vpop.f32.mrb[108].mxu0  ;;  %14686 = vmatprep.mubr.f32.mxu1 %v2589_v47  ;;  %v2658_v18 = vcombine.high %v322_v10, %v322_v10  ;;  %v2665_v23 = vrot.slane %v322_v10, %v18092_v25 }
 0x305   : > { %v10908_v56 = vpop.f32.mrb[108].mxu1  ;;  %17436 = vmatprep.subr.bf16.mxu1 %v17435_v48  ;;  %v10839_v60 = vadd.f32 %v10838_v55, %v10769_v44  ;;  %v10840_v61 = vpop.f32.mrb[109].mxu0  ;;  %v2638_v44 = vrot.slane %v2624_v34, %v18092_v25  ;;  %v675_v48 = vld [vmem:[%s18067_s8 + $0xab8] sm:$0xff]  ;;  %v17455_v55 = vpack.c.bf16 %v1057_v43, %v673_v42 }
 0x306   : > { %v10910_v62 = vpop.f32.mrb[109].mxu1  ;;  %v17459_v57 = vpack.c.bf16 %v1059_v49, %v675_v48  ;;  %v674_v61 = vld [vmem:[%s18067_s8 + $0xab0] sm:$0xff]  ;;  %v1067_v34 = vld [vmem:[%s18067_s8 + $0x16f8] sm:$0x3] }
 0x307   : > { %v10909_v4 = vadd.f32 %v10908_v56, %v10839_v60  ;;  %v2640_v56 = vcombine.high %v2638_v44, %v2638_v44  ;;  %v1056_v60 = vld [vmem:[%s18067_s8 + $0x16a0] sm:$0x3]  ;;  %v1058_v62 = vld [vmem:[%s18067_s8 + $0x16b0] sm:$0x3] }
 0x308   : > { %v17461_v12 = vpack.c.bf16 %v1058_v62, %v674_v61 }
 0x309   : > { %14617 = vmatmul.mubr.f32.vlgmr.msra.gmra.mrb[162].mxu0 %v2580_v30  ;;  %v2622_v30 = vcombine.high %v2614_v14, %v2614_v14 }
 0x30a   : > { %14687 = vmatmul.mubr.f32.vlgmr.msra.gmra.mrb[162].mxu1 %v2587_v35  ;;  %17434 = vmatpush1.bf16.xpose.msra.mxu0 %v17433_v2  ;;  %v668_v35 = vld [vmem:[%s18067_s8 + $0xa80] sm:$0xff]  ;;  %v677_v2 = vld [vmem:[%s18067_s8 + $0xac8] sm:$0xff] }
 0x30b   : > { %17438 = vmatpush1.bf16.xpose.msra.mxu1 %v17437_v3  ;;  %14756 = vmatprep.mubr.f32.mxu0 %v2605_v5  ;;  %v17449_v51 = vpack.c.bf16 %v1052_v36, %v668_v35  ;;  %v1061_v3 = vld [vmem:[%s18067_s8 + $0x16c8] sm:$0x3]  ;;  %v323_v35 = vld [vmem:[%s18060_s10 + $0x2b8] sm:$0xff] }
 0x30c   : > { %17440 = vmatprep.subr.bf16.mxu0 %v17439_v6  ;;  %v10978_v15 = vpop.f32.mrb[110].mxu0  ;;  %14826 = vmatprep.mubr.f32.mxu1 %v2606_v7  ;;  %v2675_v43 = vcombine.high %v323_v35, %v323_v35  ;;  %v2682_v48 = vrot.slane %v323_v35, %v18092_v25 }
 0x30d   : > { %v11048_v16 = vpop.f32.mrb[110].mxu1  ;;  %17444 = vmatprep.subr.bf16.mxu1 %v17443_v8  ;;  %v10979_v20 = vadd.f32 %v10978_v15, %v10909_v4  ;;  %v10980_v21 = vpop.f32.mrb[111].mxu0  ;;  %v2655_v4 = vrot.slane %v2641_v58, %v18092_v25  ;;  %v679_v8 = vld [vmem:[%s18067_s8 + $0xad8] sm:$0xff]  ;;  %v17463_v15 = vpack.c.bf16 %v1061_v3, %v677_v2 }
 0x30e   : > { %v11050_v22 = vpop.f32.mrb[111].mxu1  ;;  %v17467_v17 = vpack.c.bf16 %v1063_v9, %v679_v8  ;;  %v678_v21 = vld [vmem:[%s18067_s8 + $0xad0] sm:$0xff]  ;;  %v1071_v58 = vld [vmem:[%s18067_s8 + $0x1718] sm:$0x3] }
 0x30f   : > { %v11049_v29 = vadd.f32 %v11048_v16, %v10979_v20  ;;  %v2657_v16 = vcombine.high %v2655_v4, %v2655_v4  ;;  %v1060_v20 = vld [vmem:[%s18067_s8 + $0x16c0] sm:$0x3]  ;;  %v1062_v22 = vld [vmem:[%s18067_s8 + $0x16d0] sm:$0x3] }
 0x310   : > { %v17469_v37 = vpack.c.bf16 %v1062_v22, %v678_v21 }
 0x311   : > { %14757 = vmatmul.mubr.f32.vlgmr.msra.gmra.mrb[164].mxu0 %v2597_v54  ;;  %v2639_v54 = vcombine.high %v2631_v39, %v2631_v39 }
 0x312   : > { %14827 = vmatmul.mubr.f32.vlgmr.msra.gmra.mrb[164].mxu1 %v2604_v59  ;;  %17442 = vmatpush1.bf16.xpose.msra.mxu0 %v17441_v27  ;;  %v672_v59 = vld [vmem:[%s18067_s8 + $0xaa0] sm:$0xff]  ;;  %v681_v27 = vld [vmem:[%s18067_s8 + $0xae8] sm:$0xff] }
 0x313   : > { %17446 = vmatpush1.bf16.xpose.msra.mxu1 %v17445_v28  ;;  %14896 = vmatprep.mubr.f32.mxu0 %v2622_v30  ;;  %v17457_v11 = vpack.c.bf16 %v1056_v60, %v672_v59  ;;  %v1065_v28 = vld [vmem:[%s18067_s8 + $0x16e8] sm:$0x3]  ;;  %v324_v59 = vld [vmem:[%s18060_s10 + $0x2c0] sm:$0xff] }
 0x314   : > { %17448 = vmatprep.subr.bf16.mxu0 %v17447_v31  ;;  %v11118_v40 = vpop.f32.mrb[112].mxu0  ;;  %14966 = vmatprep.mubr.f32.mxu1 %v2623_v32  ;;  %v2692_v3 = vcombine.high %v324_v59, %v324_v59  ;;  %v2699_v8 = vrot.slane %v324_v59, %v18092_v25 }
 0x315   : > { %v11188_v41 = vpop.f32.mrb[112].mxu1  ;;  %17452 = vmatprep.subr.bf16.mxu1 %v17451_v33  ;;  %v11119_v45 = vadd.f32 %v11118_v40, %v11049_v29  ;;  %v11120_v46 = vpop.f32.mrb[113].mxu0  ;;  %v2672_v29 = vrot.slane %v2658_v18, %v18092_v25  ;;  %v683_v33 = vld [vmem:[%s18067_s8 + $0xaf8] sm:$0xff]  ;;  %v17471_v40 = vpack.c.bf16 %v1065_v28, %v681_v27 }
 0x316   : > { %v11190_v47 = vpop.f32.mrb[113].mxu1  ;;  %v17475_v42 = vpack.c.bf16 %v1067_v34, %v683_v33  ;;  %v682_v46 = vld [vmem:[%s18067_s8 + $0xaf0] sm:$0xff]  ;;  %v1075_v18 = vld [vmem:[%s18067_s8 + $0x1738] sm:$0x3] }
 0x317   : > { %v11189_v53 = vadd.f32 %v11188_v41, %v11119_v45  ;;  %v2674_v41 = vcombine.high %v2672_v29, %v2672_v29  ;;  %v1064_v45 = vld [vmem:[%s18067_s8 + $0x16e0] sm:$0x3]  ;;  %v1066_v47 = vld [vmem:[%s18067_s8 + $0x16f0] sm:$0x3] }
 0x318   : > { %v17477_v61 = vpack.c.bf16 %v1066_v47, %v682_v46 }
 0x319   : > { %14897 = vmatmul.mubr.f32.vlgmr.msra.gmra.mrb[166].mxu0 %v2614_v14  ;;  %v2656_v14 = vcombine.high %v2648_v63, %v2648_v63 }
 0x31a   : > { %14967 = vmatmul.mubr.f32.vlgmr.msra.gmra.mrb[166].mxu1 %v2621_v19  ;;  %17450 = vmatpush1.bf16.xpose.msra.mxu0 %v17449_v51  ;;  %v676_v19 = vld [vmem:[%s18067_s8 + $0xac0] sm:$0xff]  ;;  %v685_v51 = vld [vmem:[%s18067_s8 + $0xb08] sm:$0xff] }
 0x31b   : > { %17454 = vmatpush1.bf16.xpose.msra.mxu1 %v17453_v52  ;;  %15036 = vmatprep.mubr.f32.mxu0 %v2639_v54  ;;  %v17465_v36 = vpack.c.bf16 %v1060_v20, %v676_v19  ;;  %v1069_v52 = vld [vmem:[%s18067_s8 + $0x1708] sm:$0x3] }
 0x31c   : > { %17456 = vmatprep.subr.bf16.mxu0 %v17455_v55  ;;  %v11258_v0 = vpop.f32.mrb[114].mxu0  ;;  %15106 = vmatprep.mubr.f32.mxu1 %v2640_v56  ;;  %v325_v19 = vld [vmem:[%s18060_s10 + $0x2c8] sm:$0xff] }
 0x31d   : > { %v11328_v1 = vpop.f32.mrb[114].mxu1  ;;  %17460 = vmatprep.subr.bf16.mxu1 %v17459_v57  ;;  %v11259_v5 = vadd.f32 %v11258_v0, %v11189_v53  ;;  %v11260_v6 = vpop.f32.mrb[115].mxu0  ;;  %v2689_v53 = vrot.slane %v2675_v43, %v18092_v25  ;;  %v687_v57 = vld [vmem:[%s18067_s8 + $0xb18] sm:$0xff]  ;;  %v17479_v0 = vpack.c.bf16 %v1069_v52, %v685_v51  ;;  %v2709_v28 = vcombine.high %v325_v19, %v325_v19 }
 0x31e   : > { %v11330_v7 = vpop.f32.mrb[115].mxu1  ;;  %v17483_v2 = vpack.c.bf16 %v1071_v58, %v687_v57  ;;  %v686_v6 = vld [vmem:[%s18067_s8 + $0xb10] sm:$0xff]  ;;  %v2716_v33 = vrot.slane %v325_v19, %v18092_v25  ;;  %v1079_v43 = vld [vmem:[%s18067_s8 + $0x1758] sm:$0x3] }
 0x31f   : > { %v11329_v13 = vadd.f32 %v11328_v1, %v11259_v5  ;;  %v2691_v1 = vcombine.high %v2689_v53, %v2689_v53  ;;  %v1068_v5 = vld [vmem:[%s18067_s8 + $0x1700] sm:$0x3]  ;;  %v1070_v7 = vld [vmem:[%s18067_s8 + $0x1710] sm:$0x3] }
 0x320   : > { %v17485_v21 = vpack.c.bf16 %v1070_v7, %v686_v6 }
 0x321   : > { %15037 = vmatmul.mubr.f32.vlgmr.msra.gmra.mrb[168].mxu0 %v2631_v39  ;;  %v2673_v39 = vcombine.high %v2665_v23, %v2665_v23 }
 0x322   : > { %15107 = vmatmul.mubr.f32.vlgmr.msra.gmra.mrb[168].mxu1 %v2638_v44  ;;  %17458 = vmatpush1.bf16.xpose.msra.mxu0 %v17457_v11  ;;  %v680_v44 = vld [vmem:[%s18067_s8 + $0xae0] sm:$0xff]  ;;  %v689_v11 = vld [vmem:[%s18067_s8 + $0xb28] sm:$0xff] }
 0x323   : > { %17462 = vmatpush1.bf16.xpose.msra.mxu1 %v17461_v12  ;;  %15176 = vmatprep.mubr.f32.mxu0 %v2656_v14  ;;  %v17473_v60 = vpack.c.bf16 %v1064_v45, %v680_v44  ;;  %v1073_v12 = vld [vmem:[%s18067_s8 + $0x1728] sm:$0x3]  ;;  %v326_v44 = vld [vmem:[%s18060_s10 + $0x2d0] sm:$0xff] }
 0x324   : > { %17464 = vmatprep.subr.bf16.mxu0 %v17463_v15  ;;  %v11398_v24 = vpop.f32.mrb[116].mxu0  ;;  %15246 = vmatprep.mubr.f32.mxu1 %v2657_v16  ;;  %v2726_v52 = vcombine.high %v326_v44, %v326_v44  ;;  %v2733_v57 = vrot.slane %v326_v44, %v18092_v25 }
 0x325   : > { %v11468_v26 = vpop.f32.mrb[116].mxu1  ;;  %17468 = vmatprep.subr.bf16.mxu1 %v17467_v17  ;;  %v11399_v30 = vadd.f32 %v11398_v24, %v11329_v13  ;;  %v11400_v31 = vpop.f32.mrb[117].mxu0  ;;  %v2706_v13 = vrot.slane %v2692_v3, %v18092_v25  ;;  %v691_v17 = vld [vmem:[%s18067_s8 + $0xb38] sm:$0xff]  ;;  %v17487_v24 = vpack.c.bf16 %v1073_v12, %v689_v11 }
 0x326   : > { %v11470_v32 = vpop.f32.mrb[117].mxu1  ;;  %v17491_v27 = vpack.c.bf16 %v1075_v18, %v691_v17  ;;  %v690_v31 = vld [vmem:[%s18067_s8 + $0xb30] sm:$0xff]  ;;  %v1083_v3 = vld [vmem:[%s18067_s8 + $0x1778] sm:$0x3] }
 0x327   : > { %v11469_v38 = vadd.f32 %v11468_v26, %v11399_v30  ;;  %v2708_v26 = vcombine.high %v2706_v13, %v2706_v13  ;;  %v1072_v30 = vld [vmem:[%s18067_s8 + $0x1720] sm:$0x3]  ;;  %v1074_v32 = vld [vmem:[%s18067_s8 + $0x1730] sm:$0x3] }
 0x328   : > { %v17493_v46 = vpack.c.bf16 %v1074_v32, %v690_v31 }
 0x329   : > { %15177 = vmatmul.mubr.f32.vlgmr.msra.gmra.mrb[170].mxu0 %v2648_v63  ;;  %v2690_v63 = vcombine.high %v2682_v48, %v2682_v48 }
 0x32a   : > { %15247 = vmatmul.mubr.f32.vlgmr.msra.gmra.mrb[170].mxu1 %v2655_v4  ;;  %17466 = vmatpush1.bf16.xpose.msra.mxu0 %v17465_v36  ;;  %v684_v4 = vld [vmem:[%s18067_s8 + $0xb00] sm:$0xff]  ;;  %v693_v36 = vld [vmem:[%s18067_s8 + $0xb48] sm:$0xff] }
 0x32b   : > { %17470 = vmatpush1.bf16.xpose.msra.mxu1 %v17469_v37  ;;  %15316 = vmatprep.mubr.f32.mxu0 %v2673_v39  ;;  %v17481_v20 = vpack.c.bf16 %v1068_v5, %v684_v4  ;;  %v1077_v37 = vld [vmem:[%s18067_s8 + $0x1748] sm:$0x3]  ;;  %v327_v4 = vld [vmem:[%s18060_s10 + $0x2d8] sm:$0xff] }
 0x32c   : > { %17472 = vmatprep.subr.bf16.mxu0 %v17471_v40  ;;  %v11538_v49 = vpop.f32.mrb[118].mxu0  ;;  %15386 = vmatprep.mubr.f32.mxu1 %v2674_v41  ;;  %v2743_v12 = vcombine.high %v327_v4, %v327_v4  ;;  %v2750_v17 = vrot.slane %v327_v4, %v18092_v25 }
 0x32d   : > { %v11608_v50 = vpop.f32.mrb[118].mxu1  ;;  %17476 = vmatprep.subr.bf16.mxu1 %v17475_v42  ;;  %v11539_v54 = vadd.f32 %v11538_v49, %v11469_v38  ;;  %v11540_v55 = vpop.f32.mrb[119].mxu0  ;;  %v2723_v38 = vrot.slane %v2709_v28, %v18092_v25  ;;  %v695_v42 = vld [vmem:[%s18067_s8 + $0xb58] sm:$0xff]  ;;  %v17495_v49 = vpack.c.bf16 %v1077_v37, %v693_v36 }
 0x32e   : > { %v11610_v56 = vpop.f32.mrb[119].mxu1  ;;  %v17499_v51 = vpack.c.bf16 %v1079_v43, %v695_v42  ;;  %v694_v55 = vld [vmem:[%s18067_s8 + $0xb50] sm:$0xff]  ;;  %v1087_v28 = vld [vmem:[%s18067_s8 + $0x1798] sm:$0x3] }
 0x32f   : > { %v11609_v62 = vadd.f32 %v11608_v50, %v11539_v54  ;;  %v2725_v50 = vcombine.high %v2723_v38, %v2723_v38  ;;  %v1076_v54 = vld [vmem:[%s18067_s8 + $0x1740] sm:$0x3]  ;;  %v1078_v56 = vld [vmem:[%s18067_s8 + $0x1750] sm:$0x3] }
 0x330   : > { %v17501_v6 = vpack.c.bf16 %v1078_v56, %v694_v55 }
 0x331   : > { %15317 = vmatmul.mubr.f32.vlgmr.msra.gmra.mrb[172].mxu0 %v2665_v23  ;;  %v2707_v23 = vcombine.high %v2699_v8, %v2699_v8 }
 0x332   : > { %15387 = vmatmul.mubr.f32.vlgmr.msra.gmra.mrb[172].mxu1 %v2672_v29  ;;  %17474 = vmatpush1.bf16.xpose.msra.mxu0 %v17473_v60  ;;  %v688_v29 = vld [vmem:[%s18067_s8 + $0xb20] sm:$0xff]  ;;  %v697_v60 = vld [vmem:[%s18067_s8 + $0xb68] sm:$0xff] }
 0x333   : > { %17478 = vmatpush1.bf16.xpose.msra.mxu1 %v17477_v61  ;;  %15456 = vmatprep.mubr.f32.mxu0 %v2690_v63  ;;  %v17489_v45 = vpack.c.bf16 %v1072_v30, %v688_v29  ;;  %v1081_v61 = vld [vmem:[%s18067_s8 + $0x1768] sm:$0x3]  ;;  %v328_v29 = vld [vmem:[%s18060_s10 + $0x2e0] sm:$0xff] }
 0x334   : > { %17480 = vmatprep.subr.bf16.mxu0 %v17479_v0  ;;  %v11678_v9 = vpop.f32.mrb[120].mxu0  ;;  %15526 = vmatprep.mubr.f32.mxu1 %v2691_v1  ;;  %v2760_v37 = vcombine.high %v328_v29, %v328_v29  ;;  %v2767_v42 = vrot.slane %v328_v29, %v18092_v25 }
 0x335   : > { %v11748_v10 = vpop.f32.mrb[120].mxu1  ;;  %17484 = vmatprep.subr.bf16.mxu1 %v17483_v2  ;;  %v11679_v14 = vadd.f32 %v11678_v9, %v11609_v62  ;;  %v11680_v15 = vpop.f32.mrb[121].mxu0  ;;  %v2740_v62 = vrot.slane %v2726_v52, %v18092_v25  ;;  %v699_v2 = vld [vmem:[%s18067_s8 + $0xb78] sm:$0xff]  ;;  %v17503_v9 = vpack.c.bf16 %v1081_v61, %v697_v60 }
 0x336   : > { %v11750_v16 = vpop.f32.mrb[121].mxu1  ;;  %v17507_v11 = vpack.c.bf16 %v1083_v3, %v699_v2  ;;  %v698_v15 = vld [vmem:[%s18067_s8 + $0xb70] sm:$0xff]  ;;  %v1091_v52 = vld [vmem:[%s18067_s8 + $0x17b8] sm:$0x3] }
 0x337   : > { %v11749_v22 = vadd.f32 %v11748_v10, %v11679_v14  ;;  %v2742_v10 = vcombine.high %v2740_v62, %v2740_v62  ;;  %v1080_v14 = vld [vmem:[%s18067_s8 + $0x1760] sm:$0x3]  ;;  %v1082_v16 = vld [vmem:[%s18067_s8 + $0x1770] sm:$0x3] }
 0x338   : > { %v17509_v31 = vpack.c.bf16 %v1082_v16, %v698_v15 }
 0x339   : > { %15457 = vmatmul.mubr.f32.vlgmr.msra.gmra.mrb[174].mxu0 %v2682_v48  ;;  %v2724_v48 = vcombine.high %v2716_v33, %v2716_v33 }
 0x33a   : > { %15527 = vmatmul.mubr.f32.vlgmr.msra.gmra.mrb[174].mxu1 %v2689_v53  ;;  %17482 = vmatpush1.bf16.xpose.msra.mxu0 %v17481_v20  ;;  %v692_v53 = vld [vmem:[%s18067_s8 + $0xb40] sm:$0xff]  ;;  %v701_v20 = vld [vmem:[%s18067_s8 + $0xb88] sm:$0xff] }
 0x33b   : > { %17486 = vmatpush1.bf16.xpose.msra.mxu1 %v17485_v21  ;;  %15596 = vmatprep.mubr.f32.mxu0 %v2707_v23  ;;  %v17497_v5 = vpack.c.bf16 %v1076_v54, %v692_v53  ;;  %v1085_v21 = vld [vmem:[%s18067_s8 + $0x1788] sm:$0x3] }
 0x33c   : > { %17488 = vmatprep.subr.bf16.mxu0 %v17487_v24  ;;  %v11818_v34 = vpop.f32.mrb[122].mxu0  ;;  %15666 = vmatprep.mubr.f32.mxu1 %v2708_v26  ;;  %v329_v53 = vld [vmem:[%s18060_s10 + $0x2e8] sm:$0xff] }
 0x33d   : > { %v11888_v35 = vpop.f32.mrb[122].mxu1  ;;  %17492 = vmatprep.subr.bf16.mxu1 %v17491_v27  ;;  %v11819_v39 = vadd.f32 %v11818_v34, %v11749_v22  ;;  %v11820_v40 = vpop.f32.mrb[123].mxu0  ;;  %v2757_v22 = vrot.slane %v2743_v12, %v18092_v25  ;;  %v703_v27 = vld [vmem:[%s18067_s8 + $0xb98] sm:$0xff]  ;;  %v17511_v34 = vpack.c.bf16 %v1085_v21, %v701_v20  ;;  %v2777_v61 = vcombine.high %v329_v53, %v329_v53 }
 0x33e   : > { %v11890_v41 = vpop.f32.mrb[123].mxu1  ;;  %v17515_v36 = vpack.c.bf16 %v1087_v28, %v703_v27  ;;  %v702_v40 = vld [vmem:[%s18067_s8 + $0xb90] sm:$0xff]  ;;  %v2784_v2 = vrot.slane %v329_v53, %v18092_v25  ;;  %v1095_v12 = vld [vmem:[%s18067_s8 + $0x17d8] sm:$0x3] }
 0x33f   : > { %v11889_v47 = vadd.f32 %v11888_v35, %v11819_v39  ;;  %v2759_v35 = vcombine.high %v2757_v22, %v2757_v22  ;;  %v1084_v39 = vld [vmem:[%s18067_s8 + $0x1780] sm:$0x3]  ;;  %v1086_v41 = vld [vmem:[%s18067_s8 + $0x1790] sm:$0x3] }
 0x340   : > { %v17517_v55 = vpack.c.bf16 %v1086_v41, %v702_v40 }
 0x341   : > { %15597 = vmatmul.mubr.f32.vlgmr.msra.gmra.mrb[176].mxu0 %v2699_v8  ;;  %v2741_v8 = vcombine.high %v2733_v57, %v2733_v57 }
 0x342   : > { %15667 = vmatmul.mubr.f32.vlgmr.msra.gmra.mrb[176].mxu1 %v2706_v13  ;;  %17490 = vmatpush1.bf16.xpose.msra.mxu0 %v17489_v45  ;;  %v696_v13 = vld [vmem:[%s18067_s8 + $0xb60] sm:$0xff]  ;;  %v705_v45 = vld [vmem:[%s18067_s8 + $0xba8] sm:$0xff] }
 0x343   : > { %17494 = vmatpush1.bf16.xpose.msra.mxu1 %v17493_v46  ;;  %15736 = vmatprep.mubr.f32.mxu0 %v2724_v48  ;;  %v17505_v30 = vpack.c.bf16 %v1080_v14, %v696_v13  ;;  %v1089_v46 = vld [vmem:[%s18067_s8 + $0x17a8] sm:$0x3]  ;;  %v330_v13 = vld [vmem:[%s18060_s10 + $0x2f0] sm:$0xff] }
 0x344   : > { %17496 = vmatprep.subr.bf16.mxu0 %v17495_v49  ;;  %v11958_v58 = vpop.f32.mrb[124].mxu0  ;;  %15806 = vmatprep.mubr.f32.mxu1 %v2725_v50  ;;  %v2794_v21 = vcombine.high %v330_v13, %v330_v13  ;;  %v2801_v27 = vrot.slane %v330_v13, %v18092_v25 }
 0x345   : > { %v12028_v59 = vpop.f32.mrb[124].mxu1  ;;  %17500 = vmatprep.subr.bf16.mxu1 %v17499_v51  ;;  %v11959_v63 = vadd.f32 %v11958_v58, %v11889_v47  ;;  %v11960_v0 = vpop.f32.mrb[125].mxu0  ;;  %v2774_v47 = vrot.slane %v2760_v37, %v18092_v25  ;;  %v707_v51 = vld [vmem:[%s18067_s8 + $0xbb8] sm:$0xff]  ;;  %v17519_v58 = vpack.c.bf16 %v1089_v46, %v705_v45 }
 0x346   : > { %v12030_v1 = vpop.f32.mrb[125].mxu1  ;;  %v17523_v60 = vpack.c.bf16 %v1091_v52, %v707_v51  ;;  %v706_v0 = vld [vmem:[%s18067_s8 + $0xbb0] sm:$0xff]  ;;  %v715_v37 = vld [vmem:[%s18067_s8 + $0xbf8] sm:$0xff] }
 0x347   : > { %v12029_v7 = vadd.f32 %v12028_v59, %v11959_v63  ;;  %v2776_v59 = vcombine.high %v2774_v47, %v2774_v47  ;;  %v1088_v63 = vld [vmem:[%s18067_s8 + $0x17a0] sm:$0x3]  ;;  %v1090_v1 = vld [vmem:[%s18067_s8 + $0x17b0] sm:$0x3] }
 0x348   : > { %v17525_v15 = vpack.c.bf16 %v1090_v1, %v706_v0 }
 0x349   : > { %15737 = vmatmul.mubr.f32.vlgmr.msra.gmra.mrb[178].mxu0 %v2716_v33  ;;  %v2758_v33 = vcombine.high %v2750_v17, %v2750_v17 }
 0x34a   : > { %15807 = vmatmul.mubr.f32.vlgmr.msra.gmra.mrb[178].mxu1 %v2723_v38  ;;  %17498 = vmatpush1.bf16.xpose.msra.mxu0 %v17497_v5  ;;  %v700_v38 = vld [vmem:[%s18067_s8 + $0xb80] sm:$0xff]  ;;  %v709_v5 = vld [vmem:[%s18067_s8 + $0xbc8] sm:$0xff] }
 0x34b   : > { %17502 = vmatpush1.bf16.xpose.msra.mxu1 %v17501_v6  ;;  %15876 = vmatprep.mubr.f32.mxu0 %v2741_v8  ;;  %v17513_v54 = vpack.c.bf16 %v1084_v39, %v700_v38  ;;  %v1093_v6 = vld [vmem:[%s18067_s8 + $0x17c8] sm:$0x3]  ;;  %v1099_v38 = vld [vmem:[%s18067_s8 + $0x17f8] sm:$0x3] }
 0x34c   : > { %17504 = vmatprep.subr.bf16.mxu0 %v17503_v9  ;;  %v12098_v18 = vpop.f32.mrb[126].mxu0  ;;  %15946 = vmatprep.mubr.f32.mxu1 %v2742_v10  ;;  %v17539_v46 = vpack.c.bf16 %v1099_v38, %v715_v37 }
 0x34d   : > { %v12168_v19 = vpop.f32.mrb[126].mxu1  ;;  %17508 = vmatprep.subr.bf16.mxu1 %v17507_v11  ;;  %v12099_v23 = vadd.f32 %v12098_v18, %v12029_v7  ;;  %v12100_v24 = vpop.f32.mrb[127].mxu0  ;;  %v2791_v7 = vrot.slane %v2777_v61, %v18092_v25  ;;  %v711_v11 = vld [vmem:[%s18067_s8 + $0xbd8] sm:$0xff]  ;;  %v17527_v18 = vpack.c.bf16 %v1093_v6, %v709_v5 }
 0x34e   : > { %v12170_v26 = vpop.f32.mrb[127].mxu1  ;;  %v17531_v20 = vpack.c.bf16 %v1095_v12, %v711_v11  ;;  %v710_v24 = vld [vmem:[%s18067_s8 + $0xbd0] sm:$0xff] }
 0x34f   : > { %v12169_v32 = vadd.f32 %v12168_v19, %v12099_v23  ;;  %v2793_v19 = vcombine.high %v2791_v7, %v2791_v7  ;;  %v1092_v23 = vld [vmem:[%s18067_s8 + $0x17c0] sm:$0x3]  ;;  %v1094_v26 = vld [vmem:[%s18067_s8 + $0x17d0] sm:$0x3] }
 0x350   : > { %v17533_v40 = vpack.c.bf16 %v1094_v26, %v710_v24 }
 0x351   : > { %15877 = vmatmul.mubr.f32.vlgmr.msra.gmra.mrb[180].mxu0 %v2733_v57  ;;  %v2775_v57 = vcombine.high %v2767_v42, %v2767_v42 }
 0x352   : > { %15947 = vmatmul.mubr.f32.vlgmr.msra.gmra.mrb[180].mxu1 %v2740_v62  ;;  %17506 = vmatpush1.bf16.xpose.msra.mxu0 %v17505_v30  ;;  %v704_v62 = vld [vmem:[%s18067_s8 + $0xba0] sm:$0xff]  ;;  %v713_v30 = vld [vmem:[%s18067_s8 + $0xbe8] sm:$0xff] }
 0x353   : > { %17510 = vmatpush1.bf16.xpose.msra.mxu1 %v17509_v31  ;;  %16016 = vmatprep.mubr.f32.mxu0 %v2758_v33  ;;  %v17521_v14 = vpack.c.bf16 %v1088_v63, %v704_v62  ;;  %v1097_v31 = vld [vmem:[%s18067_s8 + $0x17e8] sm:$0x3]  ;;  %v331_v33 = vld [vmem:[%s18060_s10 + $0x2f8] sm:$0xff] }
 0x354   : > { %17512 = vmatprep.subr.bf16.mxu0 %v17511_v34  ;;  %v12238_v43 = vpop.f32.mrb[128].mxu0  ;;  %16086 = vmatprep.mubr.f32.mxu1 %v2759_v35  ;;  %v2818_v51 = vrot.slane %v331_v33, %v18092_v25 }
 0x355   : > { %v12308_v44 = vpop.f32.mrb[128].mxu1  ;;  %17516 = vmatprep.subr.bf16.mxu1 %v17515_v36  ;;  %v12239_v48 = vadd.f32 %v12238_v43, %v12169_v32  ;;  %v12240_v49 = vpop.f32.mrb[129].mxu0  ;;  %v2808_v32 = vrot.slane %v2794_v21, %v18092_v25  ;;  %v17535_v43 = vpack.c.bf16 %v1097_v31, %v713_v30 }
 0x356   : > { %v12310_v50 = vpop.f32.mrb[129].mxu1  ;;  %v714_v49 = vld [vmem:[%s18067_s8 + $0xbf0] sm:$0xff]  ;;  %v2826_v61 = vcombine.high %v2818_v51, %v2818_v51 }
 0x357   : > { %v12309_v56 = vadd.f32 %v12308_v44, %v12239_v48  ;;  %v2811_v44 = vcombine.high %v331_v33, %v331_v33  ;;  %v2810_v45 = vcombine.high %v2808_v32, %v2808_v32  ;;  %v1096_v48 = vld [vmem:[%s18067_s8 + $0x17e0] sm:$0x3]  ;;  %v1098_v50 = vld [vmem:[%s18067_s8 + $0x17f0] sm:$0x3] }
 0x359   : > { %16017 = vmatmul.mubr.f32.vlgmr.msra.gmra.mrb[182].mxu0 %v2750_v17  ;;  %v2792_v17 = vcombine.high %v2784_v2, %v2784_v2  ;;  %v2825_v52 = vrot.slane %v2811_v44, %v18092_v25 }
 0x35a   : > { %16087 = vmatmul.mubr.f32.vlgmr.msra.gmra.mrb[182].mxu1 %v2757_v22  ;;  %17514 = vmatpush1.bf16.xpose.msra.mxu0 %v17513_v54  ;;  %v708_v22 = vld [vmem:[%s18067_s8 + $0xbc0] sm:$0xff] }
 0x35b   : > { %17518 = vmatpush1.bf16.xpose.msra.mxu1 %v17517_v55  ;;  %16156 = vmatprep.mubr.f32.mxu0 %v2775_v57  ;;  %v17529_v39 = vpack.c.bf16 %v1092_v23, %v708_v22  ;;  %v2827_v62 = vcombine.high %v2825_v52, %v2825_v52 }
 0x35c   : > { %17520 = vmatprep.subr.bf16.mxu0 %v17519_v58  ;;  %v12378_v3 = vpop.f32.mrb[130].mxu0  ;;  %16226 = vmatprep.mubr.f32.mxu1 %v2776_v59  ;;  %v17541_v59 = vpack.c.bf16 %v1098_v50, %v714_v49 }
 0x35d   : > { %v12448_v4 = vpop.f32.mrb[130].mxu1  ;;  %17524 = vmatprep.subr.bf16.mxu1 %v17523_v60  ;;  %v12379_v8 = vadd.f32 %v12378_v3, %v12309_v56  ;;  %v12380_v9 = vpop.f32.mrb[131].mxu0 }
 0x35e   : > { %v12450_v10 = vpop.f32.mrb[131].mxu1 }
 0x35f   : > { %v12449_v16 = vadd.f32 %v12448_v4, %v12379_v8 }
 0x361   : > { %16157 = vmatmul.mubr.f32.vlgmr.msra.gmra.mrb[184].mxu0 %v2767_v42  ;;  %v2809_v42 = vcombine.high %v2801_v27, %v2801_v27 }
 0x362   : > { %16227 = vmatmul.mubr.f32.vlgmr.msra.gmra.mrb[184].mxu1 %v2774_v47  ;;  %17522 = vmatpush1.bf16.xpose.msra.mxu0 %v17521_v14  ;;  %v712_v47 = vld [vmem:[%s18067_s8 + $0xbe0] sm:$0xff] }
 0x363   : > { %17526 = vmatpush1.bf16.xpose.msra.mxu1 %v17525_v15  ;;  %16296 = vmatprep.mubr.f32.mxu0 %v2792_v17  ;;  %v17537_v58 = vpack.c.bf16 %v1096_v48, %v712_v47 }
 0x364   : > { %17528 = vmatprep.subr.bf16.mxu0 %v17527_v18  ;;  %v12518_v28 = vpop.f32.mrb[132].mxu0  ;;  %16366 = vmatprep.mubr.f32.mxu1 %v2793_v19 }
 0x365   : > { %v12588_v29 = vpop.f32.mrb[132].mxu1  ;;  %17532 = vmatprep.subr.bf16.mxu1 %v17531_v20  ;;  %v12519_v34 = vadd.f32 %v12518_v28, %v12449_v16  ;;  %v12520_v35 = vpop.f32.mrb[133].mxu0 }
 0x366   : > { %v12590_v36 = vpop.f32.mrb[133].mxu1 }
 0x367   : > { %v12589_v41 = vadd.f32 %v12588_v29, %v12519_v34 }
 0x369   : > { %16297 = vmatmul.mubr.f32.vlgmr.msra.gmra.mrb[186].mxu0 %v2784_v2 }
 0x36a   : > { %16367 = vmatmul.mubr.f32.vlgmr.msra.gmra.mrb[186].mxu1 %v2791_v7  ;;  %17530 = vmatpush1.bf16.xpose.msra.mxu0 %v17529_v39 }
 0x36b   : > { %17534 = vmatpush1.bf16.xpose.msra.mxu1 %v17533_v40  ;;  %16436 = vmatprep.mubr.f32.mxu0 %v2809_v42 }
 0x36c   : > { %17536 = vmatprep.subr.bf16.mxu0 %v17535_v43  ;;  %v12658_v53 = vpop.f32.mrb[134].mxu0  ;;  %16506 = vmatprep.mubr.f32.mxu1 %v2810_v45 }
 0x36d   : > { %v12728_v54 = vpop.f32.mrb[134].mxu1  ;;  %17540 = vmatprep.subr.bf16.mxu1 %v17539_v46  ;;  %v12659_v55 = vadd.f32 %v12658_v53, %v12589_v41  ;;  %v12660_v56 = vpop.f32.mrb[135].mxu0 }
 0x36e   : > { %v12730_v57 = vpop.f32.mrb[135].mxu1 }
 0x36f   : > { %v12729_v60 = vadd.f32 %v12728_v54, %v12659_v55 }
 0x371   : > { %16437 = vmatmul.mubr.f32.vlgmr.msra.gmra.mrb[188].mxu0 %v2801_v27 }
 0x372   : > { %16507 = vmatmul.mubr.f32.vlgmr.msra.gmra.mrb[188].mxu1 %v2808_v32  ;;  %17538 = vmatpush1.bf16.xpose.msra.mxu0 %v17537_v58 }
 0x373   : > { %17542 = vmatpush1.bf16.xpose.msra.mxu1 %v17541_v59  ;;  %16576 = vmatprep.mubr.f32.mxu0 %v2826_v61 }
 0x374   : > { %16646 = vmatprep.mubr.f32.mxu1 %v2827_v62  ;;  %v12798_v63 = vpop.f32.mrb[136].mxu0 }
 0x375   : > { %v12868_v25 = vpop.f32.mrb[136].mxu1  ;;  %v12799_v0 = vadd.f32 %v12798_v63, %v12729_v60  ;;  %v12800_v1 = vpop.f32.mrb[137].mxu0 }
 0x376   : > { %v12870_v2 = vpop.f32.mrb[137].mxu1 }
 0x377   : > { %v12869_v3 = vadd.f32 %v12868_v25, %v12799_v0 }
 0x379   : > { %16577 = vmatmul.mubr.f32.vlgmr.msra.gmra.mrb[190].mxu0 %v2818_v51 }
 0x37a   : > { %16647 = vmatmul.mubr.f32.vlgmr.msra.gmra.mrb[190].mxu1 %v2825_v52 }
 0x37c   : > { %v12938_v4 = vpop.f32.mrb[138].mxu0 }
 0x37d   : > { %v13008_v5 = vpop.f32.mrb[138].mxu1  ;;  %v12939_v6 = vadd.f32 %v12938_v4, %v12869_v3  ;;  %v12940_v7 = vpop.f32.mrb[139].mxu0 }
 0x37e   : > { %v13010_v8 = vpop.f32.mrb[139].mxu1 }
 0x37f   : > { %v13009_v9 = vadd.f32 %v13008_v5, %v12939_v6 }
 0x384   : > { %v13078_v10 = vpop.f32.mrb[140].mxu0 }
 0x385   : > { %v13148_v11 = vpop.f32.mrb[140].mxu1  ;;  %v13079_v12 = vadd.f32 %v13078_v10, %v13009_v9  ;;  %v13080_v13 = vpop.f32.mrb[141].mxu0 }
 0x386   : > { %v13150_v14 = vpop.f32.mrb[141].mxu1 }
 0x387   : > { %v13149_v15 = vadd.f32 %v13148_v11, %v13079_v12 }
 0x38c   : > { %v13218_v16 = vpop.f32.mrb[142].mxu0 }
 0x38d   : > { %v13288_v17 = vpop.f32.mrb[142].mxu1  ;;  %v13219_v18 = vadd.f32 %v13218_v16, %v13149_v15  ;;  %v13220_v19 = vpop.f32.mrb[143].mxu0 }
 0x38e   : > { %v13290_v20 = vpop.f32.mrb[143].mxu1 }
 0x38f   : > { %v13289_v21 = vadd.f32 %v13288_v17, %v13219_v18 }
 0x394   : > { %v13358_v22 = vpop.f32.mrb[144].mxu0 }
 0x395   : > { %v13428_v23 = vpop.f32.mrb[144].mxu1  ;;  %v13359_v24 = vadd.f32 %v13358_v22, %v13289_v21  ;;  %v13360_v26 = vpop.f32.mrb[145].mxu0 }
 0x396   : > { %v13430_v27 = vpop.f32.mrb[145].mxu1 }
 0x397   : > { %v13429_v28 = vadd.f32 %v13428_v23, %v13359_v24 }
 0x39c   : > { %v13498_v29 = vpop.f32.mrb[146].mxu0 }
 0x39d   : > { %v13568_v30 = vpop.f32.mrb[146].mxu1  ;;  %v13499_v31 = vadd.f32 %v13498_v29, %v13429_v28  ;;  %v13500_v32 = vpop.f32.mrb[147].mxu0 }
 0x39e   : > { %v13570_v33 = vpop.f32.mrb[147].mxu1 }
 0x39f   : > { %v13569_v34 = vadd.f32 %v13568_v30, %v13499_v31 }
 0x3a4   : > { %v13638_v35 = vpop.f32.mrb[148].mxu0 }
 0x3a5   : > { %v13708_v36 = vpop.f32.mrb[148].mxu1  ;;  %v13639_v37 = vadd.f32 %v13638_v35, %v13569_v34  ;;  %v13640_v38 = vpop.f32.mrb[149].mxu0 }
 0x3a6   : > { %v13710_v39 = vpop.f32.mrb[149].mxu1 }
 0x3a7   : > { %v13709_v40 = vadd.f32 %v13708_v36, %v13639_v37 }
 0x3ac   : > { %v13778_v41 = vpop.f32.mrb[150].mxu0 }
 0x3ad   : > { %v13848_v42 = vpop.f32.mrb[150].mxu1  ;;  %v13779_v43 = vadd.f32 %v13778_v41, %v13709_v40  ;;  %v13780_v44 = vpop.f32.mrb[151].mxu0 }
 0x3ae   : > { %v13850_v45 = vpop.f32.mrb[151].mxu1 }
 0x3af   : > { %v13849_v46 = vadd.f32 %v13848_v42, %v13779_v43 }
 0x3b4   : > { %v13918_v47 = vpop.f32.mrb[152].mxu0 }
 0x3b5   : > { %v13988_v48 = vpop.f32.mrb[152].mxu1  ;;  %v13919_v49 = vadd.f32 %v13918_v47, %v13849_v46  ;;  %v13920_v50 = vpop.f32.mrb[153].mxu0 }
 0x3b6   : > { %v13990_v51 = vpop.f32.mrb[153].mxu1 }
 0x3b7   : > { %v13989_v52 = vadd.f32 %v13988_v48, %v13919_v49 }
 0x3bc   : > { %v14058_v53 = vpop.f32.mrb[154].mxu0 }
 0x3bd   : > { %v14128_v54 = vpop.f32.mrb[154].mxu1  ;;  %v14059_v55 = vadd.f32 %v14058_v53, %v13989_v52  ;;  %v14060_v56 = vpop.f32.mrb[155].mxu0 }
 0x3be   : > { %v14130_v57 = vpop.f32.mrb[155].mxu1 }
 0x3bf   : > { %v14129_v58 = vadd.f32 %v14128_v54, %v14059_v55 }
 0x3c4   : > { %v14198_v59 = vpop.f32.mrb[156].mxu0 }
 0x3c5   : > { %v14268_v60 = vpop.f32.mrb[156].mxu1  ;;  %v14199_v61 = vadd.f32 %v14198_v59, %v14129_v58  ;;  %v14200_v62 = vpop.f32.mrb[157].mxu0 }
 0x3c6   : > { %v14270_v63 = vpop.f32.mrb[157].mxu1 }
 0x3c7   : > { %v14269_v25 = vadd.f32 %v14268_v60, %v14199_v61 }
 0x3cc   : > { %v14338_v0 = vpop.f32.mrb[158].mxu0 }
 0x3cd   : > { %v14408_v1 = vpop.f32.mrb[158].mxu1  ;;  %v14339_v2 = vadd.f32 %v14338_v0, %v14269_v25  ;;  %v14340_v3 = vpop.f32.mrb[159].mxu0 }
 0x3ce   : > { %v14410_v4 = vpop.f32.mrb[159].mxu1 }
 0x3cf   : > { %v14409_v5 = vadd.f32 %v14408_v1, %v14339_v2 }
 0x3d4   : > { %v14478_v6 = vpop.f32.mrb[160].mxu0 }
 0x3d5   : > { %v14548_v7 = vpop.f32.mrb[160].mxu1  ;;  %v14479_v8 = vadd.f32 %v14478_v6, %v14409_v5  ;;  %v14480_v9 = vpop.f32.mrb[161].mxu0 }
 0x3d6   : > { %v14550_v10 = vpop.f32.mrb[161].mxu1 }
 0x3d7   : > { %v14549_v11 = vadd.f32 %v14548_v7, %v14479_v8 }
 0x3dc   : > { %v14618_v12 = vpop.f32.mrb[162].mxu0 }
 0x3dd   : > { %v14688_v13 = vpop.f32.mrb[162].mxu1  ;;  %v14619_v14 = vadd.f32 %v14618_v12, %v14549_v11  ;;  %v14620_v15 = vpop.f32.mrb[163].mxu0 }
 0x3de   : > { %v14690_v16 = vpop.f32.mrb[163].mxu1 }
 0x3df   : > { %v14689_v17 = vadd.f32 %v14688_v13, %v14619_v14 }
 0x3e4   : > { %v14758_v18 = vpop.f32.mrb[164].mxu0 }
 0x3e5   : > { %v14828_v19 = vpop.f32.mrb[164].mxu1  ;;  %v14759_v20 = vadd.f32 %v14758_v18, %v14689_v17  ;;  %v14760_v21 = vpop.f32.mrb[165].mxu0 }
 0x3e6   : > { %v14830_v22 = vpop.f32.mrb[165].mxu1 }
 0x3e7   : > { %v14829_v23 = vadd.f32 %v14828_v19, %v14759_v20 }
 0x3ec   : > { %v14898_v24 = vpop.f32.mrb[166].mxu0 }
 0x3ed   : > { %v14968_v26 = vpop.f32.mrb[166].mxu1  ;;  %v14899_v27 = vadd.f32 %v14898_v24, %v14829_v23  ;;  %v14900_v28 = vpop.f32.mrb[167].mxu0 }
 0x3ee   : > { %v14970_v29 = vpop.f32.mrb[167].mxu1 }
 0x3ef   : > { %v14969_v30 = vadd.f32 %v14968_v26, %v14899_v27 }
 0x3f4   : > { %v15038_v31 = vpop.f32.mrb[168].mxu0 }
 0x3f5   : > { %v15108_v32 = vpop.f32.mrb[168].mxu1  ;;  %v15039_v33 = vadd.f32 %v15038_v31, %v14969_v30  ;;  %v15040_v34 = vpop.f32.mrb[169].mxu0 }
 0x3f6   : > { %v15110_v35 = vpop.f32.mrb[169].mxu1 }
 0x3f7   : > { %v15109_v36 = vadd.f32 %v15108_v32, %v15039_v33 }
 0x3fc   : > { %v15178_v37 = vpop.f32.mrb[170].mxu0 }
 0x3fd   : > { %v15248_v38 = vpop.f32.mrb[170].mxu1  ;;  %v15179_v39 = vadd.f32 %v15178_v37, %v15109_v36  ;;  %v15180_v40 = vpop.f32.mrb[171].mxu0 }
 0x3fe   : > { %v15250_v41 = vpop.f32.mrb[171].mxu1 }
 0x3ff   : > { %v15249_v42 = vadd.f32 %v15248_v38, %v15179_v39  ;;  %v235_v38 = vld [vmem:[#allocation8] sm:$0x3] }
 0x404   : > { %v15318_v43 = vpop.f32.mrb[172].mxu0 }
 0x405   : > { %v15388_v44 = vpop.f32.mrb[172].mxu1  ;;  %v15319_v45 = vadd.f32 %v15318_v43, %v15249_v42  ;;  %v15320_v46 = vpop.f32.mrb[173].mxu0  ;;  %v16768_v42 = vld [vmem:[#allocation7] ss:$0 sm:$0xff] (!%p16767_p12) }
 0x406   : > { %v15390_v47 = vpop.f32.mrb[173].mxu1 }
 0x407   : > { %v15389_v48 = vadd.f32 %v15388_v44, %v15319_v45 }
 0x40c   : > { %v15458_v49 = vpop.f32.mrb[174].mxu0 }
 0x40d   : > { %v15528_v50 = vpop.f32.mrb[174].mxu1  ;;  %v15459_v51 = vadd.f32 %v15458_v49, %v15389_v48  ;;  %v15460_v52 = vpop.f32.mrb[175].mxu0 }
 0x40e   : > { %v15530_v53 = vpop.f32.mrb[175].mxu1 }
 0x40f   : > { %v15529_v54 = vadd.f32 %v15528_v50, %v15459_v51 }
 0x414   : > { %v15598_v55 = vpop.f32.mrb[176].mxu0 }
 0x415   : > { %v15668_v56 = vpop.f32.mrb[176].mxu1  ;;  %v15599_v57 = vadd.f32 %v15598_v55, %v15529_v54  ;;  %v15600_v58 = vpop.f32.mrb[177].mxu0 }
 0x416   : > { %v15670_v59 = vpop.f32.mrb[177].mxu1 }
 0x417   : > { %v15669_v60 = vadd.f32 %v15668_v56, %v15599_v57 }
 0x41c   : > { %v15738_v61 = vpop.f32.mrb[178].mxu0 }
 0x41d   : > { %v15808_v62 = vpop.f32.mrb[178].mxu1  ;;  %v15739_v63 = vadd.f32 %v15738_v61, %v15669_v60  ;;  %v15740_v25 = vpop.f32.mrb[179].mxu0 }
 0x41e   : > { %v15810_v0 = vpop.f32.mrb[179].mxu1 }
 0x41f   : > { %v15809_v1 = vadd.f32 %v15808_v62, %v15739_v63 }
 0x424   : > { %v15878_v2 = vpop.f32.mrb[180].mxu0 }
 0x425   : > { %v15948_v3 = vpop.f32.mrb[180].mxu1  ;;  %v15879_v4 = vadd.f32 %v15878_v2, %v15809_v1  ;;  %v15880_v5 = vpop.f32.mrb[181].mxu0 }
 0x426   : > { %v15950_v6 = vpop.f32.mrb[181].mxu1 }
 0x427   : > { %v15949_v7 = vadd.f32 %v15948_v3, %v15879_v4 }
 0x42c   : > { %v16018_v8 = vpop.f32.mrb[182].mxu0 }
 0x42d   : > { %v16088_v9 = vpop.f32.mrb[182].mxu1  ;;  %v16019_v10 = vadd.f32 %v16018_v8, %v15949_v7  ;;  %v16020_v11 = vpop.f32.mrb[183].mxu0 }
 0x42e   : > { %v16090_v12 = vpop.f32.mrb[183].mxu1 }
 0x42f   : > { %v16089_v13 = vadd.f32 %v16088_v9, %v16019_v10 }
 0x434   : > { %v16158_v14 = vpop.f32.mrb[184].mxu0 }
 0x435   : > { %v16228_v15 = vpop.f32.mrb[184].mxu1  ;;  %v16159_v16 = vadd.f32 %v16158_v14, %v16089_v13  ;;  %v16160_v17 = vpop.f32.mrb[185].mxu0 }
 0x436   : > { %v16230_v18 = vpop.f32.mrb[185].mxu1 }
 0x437   : > { %v16229_v19 = vadd.f32 %v16228_v15, %v16159_v16 }
 0x43c   : > { %v16298_v20 = vpop.f32.mrb[186].mxu0 }
 0x43d   : > { %v16368_v21 = vpop.f32.mrb[186].mxu1  ;;  %v16299_v22 = vadd.f32 %v16298_v20, %v16229_v19  ;;  %v16300_v23 = vpop.f32.mrb[187].mxu0 }
 0x43e   : > { %v16370_v24 = vpop.f32.mrb[187].mxu1 }
 0x43f   : > { %v16369_v26 = vadd.f32 %v16368_v21, %v16299_v22 }
 0x444   : > { %v16438_v27 = vpop.f32.mrb[188].mxu0 }
 0x445   : > { %v16508_v28 = vpop.f32.mrb[188].mxu1  ;;  %v16439_v29 = vadd.f32 %v16438_v27, %v16369_v26  ;;  %v16440_v30 = vpop.f32.mrb[189].mxu0 }
 0x446   : > { %v16510_v31 = vpop.f32.mrb[189].mxu1 }
 0x447   : > { %v16509_v32 = vadd.f32 %v16508_v28, %v16439_v29 }
 0x44c   : > { %v16578_v33 = vpop.f32.mrb[190].mxu0 }
 0x44d   : > { %v16648_v34 = vpop.f32.mrb[190].mxu1  ;;  %v16579_v35 = vadd.f32 %v16578_v33, %v16509_v32  ;;  %v16580_v36 = vpop.f32.mrb[191].mxu0  ;;  %16658 = sbr.rel (%p16767_p12) target bundleno = 1118 (0x45e), region = 52 }
 0x44e   : > { %v16650_v37 = vpop.f32.mrb[191].mxu1 }
 0x44f   : > { %v16649_v39 = vadd.f32 %v16648_v34, %v16579_v35 }
 0x451   : > { %v16652_v40 = vadd.f32 %v16649_v39, %v235_v38 }
 0x453   : > { %16654 = vst.msk [vmem:[#allocation8] sm:$0x3] %vm16653_vm1, %v16652_v40 }
 0x45a   : > { %v16659_v41 = vld [vmem:[#allocation8] sm:$0x3] }
 0x45b   : > { %v16667_v43 = vadd.f32 %v16768_v42, %v16659_v41 }
 0x45d   : > { %16668 = vst.msk [vmem:[#allocation8] sm:$0x3] %vm16653_vm1, %v16667_v43 }
 0x45e PF: > { %p17573_p3 = scmp.eq.s32.totalorder %s17920_s16, 3  ;;  %s17880_s21 = smov [#allocation8]  }
 0x45f   : > { %s16676_s22 = sshll.u32 %s17880_s21, 4  ;;  %s16677_s22 = int_to_ptr.vmem [resolvable:$true] %s16676_s22 }
 0x460   : > { %s17798_s9 = scalar_lea.vmem %s16677_s22, 32  ;;  %p17805_p13 = scmp.lt.s32.totalorder %s16677_s22, %s16677_s22 }
 0x461   : > { %p17799_p8 = scmp.ne.s32.totalorder %s16677_s22, %s17798_s9  ;;  %p17806_p2 = scmp.lt.s32.totalorder %s17798_s9, %s17798_s9 }
 0x463   : > { %p17800_p0 = pnand %p17799_p8, %p17573_p3  ;;  %p17807_p6 = por %p17806_p2, %p17805_p13 }
 0x465   : > { %p17801_p1 = pneg %p17800_p0 }
 0x467   : > { %p17808_p9 = pnand %p17807_p6, %p17801_p1 }
 0x469   : > { %17811 = shalt.err (!%p17808_p9)
}
 0x46a   : > { %s17812_s5 = scalar_lea.hbm %s19177_s3, 32 }
 0x46b   : > { %p17813_p7 = scmp.ne.s32.totalorder %s19177_s3, %s17812_s5  ;;  %p17818_p10 = scmp.lt.u32.totalorder %s17812_s5, %s19177_s3 }
 0x46d   : > { %p17814_p5 = pnand %p17813_p7, %p17573_p3 }
 0x46f   : > { %p17815_p4 = pneg %p17814_p5 }
 0x471   : > { %p17820_p11 = pnand %p17818_p10, %p17815_p4 }
 0x473   : > { %17823 = shalt.err (!%p17820_p11)
}
 0x474   : > { %17556 = dma.vmem_to_hbm [thread:$0]  (%p17573_p3), %s16677_s22, 32, %s19177_s3, [#allocation4]  }
 0x475   : > { %17853 = dma.done.wait (%p17573_p3), [#allocation4], 32  }
 0x476   : > { %17855 = vsyncadd (%p17573_p3), [#allocation4], 4294967264 }
 0x477 PF: > { %p17_p12 = scmp.ge.s32.totalorder %s17923_s17, 6   ;;  %s19192_s12 = smov %s17862_s13 }
 0x478   : > { %s19193_s13 = smov %s17866_s14  ;;  %s19194_s14 = smov %s17933_s20 }
 0x479   : > { %s19195_s15 = smov %s17923_s17  ;;  %19 = sbr.rel (!%p17_p12) target bundleno = 6 (0x6), region = 94 }
 0x480   :  { %16689 = vsyncpa [#allocation3], 1 }
 0x481   :  { %16691 = vsyncpa [#allocation3 + $0x1], 1 }
 0x482   :  { %16692 = vsyncpa [#allocation6], 1 }
 0x483   :  { %16694 = vsyncpa [#allocation6 + $0x1], 1 }
 0x484   :  { %16695 = vsyncpa [#allocation4], 1 }
 0x485   :  { %16697 = vsyncpa [#allocation4 + $0x1], 1 }

</bundles_post_ra>
